<compile_context>
chip_gen: v6e
topology: v6e:2x2x1
jax: 0.10.0
libtpu: 0.0.40
codegen_flags: <defaults>
</compile_context>

<pallas_src>
import functools

import jax
import jax.numpy as jnp
from jax import lax
from jax.experimental import pallas as pl
from jax.experimental.pallas import tpu as pltpu


_COMPILER_PARAMS = pltpu.CompilerParams(
    dimension_semantics=("parallel",),
    vmem_limit_bytes=32 * 1024 * 1024,
)


def _matmul_nt(a, b):
    """a: (M, K), b: (N, K) -> a @ b.T = (M, N), f32 accumulation (MXU)."""
    return lax.dot_general(
        a, b, (((1,), (1,)), ((), ())), preferred_element_type=jnp.float32
    )


def _pick_rows(m, target):
    """Largest row tile <= target dividing m with 8-sublane alignment."""
    if m <= target:
        return m
    for tm in range(target, 7, -1):
        if m % tm == 0 and tm % 8 == 0:
            return tm
    return m


def _pick_mha_batch(n, l, target_rows=128):
    """How many batch elements to fold per MHA grid step (bb*l rows/step)."""
    divisors = [d for d in range(1, n + 1) if n % d == 0]
    ok = [d for d in divisors if (d * l) % 8 == 0 or d == n]
    small = [d for d in ok if d * l <= max(target_rows, l)]
    if small:
        return max(small)
    return min(ok)


# ---------------------------------------------------------------------------
# Row-tiled Linear kernel: y = x @ W.T + b   (input / output projections)
# ---------------------------------------------------------------------------
def _linear_kernel(x_ref, w_ref, b_ref, o_ref):
    y = _matmul_nt(x_ref[...].astype(jnp.bfloat16), w_ref[...]) + b_ref[...]
    o_ref[...] = y.astype(o_ref.dtype)


def linear(x, w, b, tm_target=512):
    M, K = x.shape
    N = w.shape[0]
    tm = _pick_rows(M, tm_target)
    return pl.pallas_call(
        _linear_kernel,
        out_shape=jax.ShapeDtypeStruct((M, N), x.dtype),
        grid=(M // tm,),
        in_specs=[
            pl.BlockSpec((tm, K), lambda i: (i, 0)),
            pl.BlockSpec((N, K), lambda i: (0, 0)),
            pl.BlockSpec((1, N), lambda i: (0, 0)),
        ],
        out_specs=pl.BlockSpec((tm, N), lambda i: (i, 0)),
        compiler_params=_COMPILER_PARAMS,
    )(x, w.astype(jnp.bfloat16), b.reshape(1, N).astype(jnp.float32))


# ---------------------------------------------------------------------------
# Fused multi-head self-attention kernel.
#   * bb batch elements folded onto the row axis per grid step.
#   * A block-diagonal additive mask keeps attention within each element
#     (and encodes the causal mask for the temporal branch).
#   * QKV projection, per-head softmax-attention and ONE (rows, D) @ (D, D)
#     output projection all happen in-kernel.
# ---------------------------------------------------------------------------
def _mha_kernel(x_ref, w_in_ref, b_in_ref, wo_ref, bo_ref, mask_ref, o_ref,
                *, n_heads):
    D = w_in_ref.shape[-1]
    hd = D // n_heads
    scale = 1.0 / float(hd) ** 0.5

    x = x_ref[...].astype(jnp.bfloat16)                    # (rows, D)
    qkv = _matmul_nt(x, w_in_ref[...]) + b_in_ref[...]     # (rows, 3D) f32
    mask = mask_ref[...]                                   # (rows, rows) additive

    head_outs = []
    for h in range(n_heads):                               # small static unroll
        q = (qkv[:, h * hd:(h + 1) * hd] * scale).astype(jnp.bfloat16)
        k = qkv[:, D + h * hd:D + (h + 1) * hd].astype(jnp.bfloat16)
        v = qkv[:, 2 * D + h * hd:2 * D + (h + 1) * hd].astype(jnp.bfloat16)
        s = _matmul_nt(q, k) + mask                        # (rows, rows)
        s = s - jnp.max(s, axis=-1, keepdims=True)
        p = jnp.exp(s)
        p = p * pl.reciprocal(jnp.sum(p, axis=-1, keepdims=True), approx=True)
        head_outs.append(
            jnp.dot(p.astype(jnp.bfloat16), v, preferred_element_type=jnp.float32))
    o_all = jnp.concatenate(head_outs, axis=-1).astype(jnp.bfloat16)   # (rows, D)
    out = _matmul_nt(o_all, wo_ref[...]) + bo_ref[...]     # single out-proj matmul
    o_ref[...] = out.astype(o_ref.dtype)


def multihead_attention(x, w_in, b_in, wo, bo, mask, n_heads):
    """x: (N, L, D), mask: (L, L) additive f32 (0 / -1e30)."""
    N, L, D = x.shape
    bb = _pick_mha_batch(N, L)
    rows = bb * L

    # block-diagonal additive mask over the bb folded elements
    seg = jnp.arange(rows, dtype=jnp.int32) // L
    same_elem = seg[:, None] == seg[None, :]
    big_mask = jnp.where(same_elem,
                         jnp.tile(mask.astype(jnp.float32), (bb, bb)),
                         jnp.float32(-1e30))

    kernel = functools.partial(_mha_kernel, n_heads=n_heads)
    out = pl.pallas_call(
        kernel,
        out_shape=jax.ShapeDtypeStruct((N * L, D), x.dtype),
        grid=(N // bb,),
        in_specs=[
            pl.BlockSpec((rows, D), lambda i: (i, 0)),
            pl.BlockSpec((3 * D, D), lambda i: (0, 0)),
            pl.BlockSpec((1, 3 * D), lambda i: (0, 0)),
            pl.BlockSpec((D, D), lambda i: (0, 0)),
            pl.BlockSpec((1, D), lambda i: (0, 0)),
            pl.BlockSpec((rows, rows), lambda i: (0, 0)),
        ],
        out_specs=pl.BlockSpec((rows, D), lambda i: (i, 0)),
        compiler_params=_COMPILER_PARAMS,
    )(x.reshape(N * L, D),
      w_in.astype(jnp.bfloat16),
      b_in.reshape(1, 3 * D).astype(jnp.float32),
      wo.astype(jnp.bfloat16),
      bo.reshape(1, D).astype(jnp.float32),
      big_mask)
    return out.reshape(N, L, D)


# ---------------------------------------------------------------------------
# Fused merge + residual + LayerNorm kernel:
#   LN( x + temp @ Wm[:, :D].T + spat @ Wm[:, D:].T + b_m )
# (avoids materializing the (M, 2D) concat in HBM)
# ---------------------------------------------------------------------------
def _merge_ln_kernel(temp_ref, spat_ref, res_ref, wt_ref, ws_ref, mb_ref,
                     g_ref, b_ref, o_ref, *, eps):
    t = temp_ref[...].astype(jnp.bfloat16)
    s = spat_ref[...].astype(jnp.bfloat16)
    merged = _matmul_nt(t, wt_ref[...]) + _matmul_nt(s, ws_ref[...]) + mb_ref[...]
    z = res_ref[...] + merged
    mean = jnp.mean(z, axis=-1, keepdims=True)
    zc = z - mean
    var = jnp.mean(zc * zc, axis=-1, keepdims=True)
    zn = zc * lax.rsqrt(var + eps)
    o_ref[...] = (zn * g_ref[...] + b_ref[...]).astype(o_ref.dtype)


def merge_layernorm(temp, spat, res, merge_w, merge_b, gamma, beta,
                    eps=1e-5, tm_target=512):
    M, D = temp.shape
    tm = _pick_rows(M, tm_target)
    wt = merge_w[:, :D].astype(jnp.bfloat16)   # (D, D) half acting on temp
    ws = merge_w[:, D:].astype(jnp.bfloat16)   # (D, D) half acting on spat
    kernel = functools.partial(_merge_ln_kernel, eps=eps)
    return pl.pallas_call(
        kernel,
        out_shape=jax.ShapeDtypeStruct((M, D), temp.dtype),
        grid=(M // tm,),
        in_specs=[
            pl.BlockSpec((tm, D), lambda i: (i, 0)),
            pl.BlockSpec((tm, D), lambda i: (i, 0)),
            pl.BlockSpec((tm, D), lambda i: (i, 0)),
            pl.BlockSpec((D, D), lambda i: (0, 0)),
            pl.BlockSpec((D, D), lambda i: (0, 0)),
            pl.BlockSpec((1, D), lambda i: (0, 0)),
            pl.BlockSpec((1, D), lambda i: (0, 0)),
            pl.BlockSpec((1, D), lambda i: (0, 0)),
        ],
        out_specs=pl.BlockSpec((tm, D), lambda i: (i, 0)),
        compiler_params=_COMPILER_PARAMS,
    )(temp, spat, res, wt, ws,
      merge_b.reshape(1, D).astype(jnp.float32),
      gamma.reshape(1, D).astype(jnp.float32),
      beta.reshape(1, D).astype(jnp.float32))


# ---------------------------------------------------------------------------
# Fused FFN + residual + LayerNorm kernel:  LN( x + W2 @ relu(W1 @ x) )
# ---------------------------------------------------------------------------
def _ffn_ln_kernel(x_ref, w1_ref, b1_ref, w2_ref, b2_ref, g_ref, b_ref, o_ref,
                   *, eps):
    x = x_ref[...]
    h = _matmul_nt(x.astype(jnp.bfloat16), w1_ref[...]) + b1_ref[...]
    h = jnp.maximum(h, 0.0)
    y = _matmul_nt(h.astype(jnp.bfloat16), w2_ref[...]) + b2_ref[...]
    z = x + y
    mean = jnp.mean(z, axis=-1, keepdims=True)
    zc = z - mean
    var = jnp.mean(zc * zc, axis=-1, keepdims=True)
    zn = zc * lax.rsqrt(var + eps)
    o_ref[...] = (zn * g_ref[...] + b_ref[...]).astype(o_ref.dtype)


def ffn_layernorm(x, w1, b1, w2, b2, gamma, beta, eps=1e-5, tm_target=256):
    M, D = x.shape
    H = w1.shape[0]
    tm = _pick_rows(M, tm_target)
    kernel = functools.partial(_ffn_ln_kernel, eps=eps)
    return pl.pallas_call(
        kernel,
        out_shape=jax.ShapeDtypeStruct((M, D), x.dtype),
        grid=(M // tm,),
        in_specs=[
            pl.BlockSpec((tm, D), lambda i: (i, 0)),
            pl.BlockSpec((H, D), lambda i: (0, 0)),
            pl.BlockSpec((1, H), lambda i: (0, 0)),
            pl.BlockSpec((D, H), lambda i: (0, 0)),
            pl.BlockSpec((1, D), lambda i: (0, 0)),
            pl.BlockSpec((1, D), lambda i: (0, 0)),
            pl.BlockSpec((1, D), lambda i: (0, 0)),
        ],
        out_specs=pl.BlockSpec((tm, D), lambda i: (i, 0)),
        compiler_params=_COMPILER_PARAMS,
    )(x, w1.astype(jnp.bfloat16), b1.reshape(1, H).astype(jnp.float32),
      w2.astype(jnp.bfloat16), b2.reshape(1, D).astype(jnp.float32),
      gamma.reshape(1, D).astype(jnp.float32),
      beta.reshape(1, D).astype(jnp.float32))


# ---------------------------------------------------------------------------
# Model wiring (glue in plain JAX; all matmuls / attention / LN in Pallas)
# ---------------------------------------------------------------------------
def st_attention(x, p, n_heads):
    B, T, V, D = x.shape
    causal = jnp.where(jnp.triu(jnp.ones((T, T), dtype=bool), k=1),
                       jnp.float32(-1e30), jnp.float32(0.0))
    no_mask = jnp.zeros((V, V), jnp.float32)

    # temporal attention: sequence over T, batch = B*V, causal mask
    # TODO(synk): the permute to (B, V, T, D) and back is done by XLA; a
    # strided (B, V)-gridded BlockSpec could avoid these two HBM passes.
    temp_in = jnp.transpose(x, (0, 2, 1, 3)).reshape(B * V, T, D)
    temp = multihead_attention(
        temp_in, p["t_w_in"], p["t_b_in"], p["t_wo"], p["t_bo"], causal, n_heads)
    temp = temp.reshape(B, V, T, D).transpose(0, 2, 1, 3)

    # spatial attention: sequence over V, batch = B*T, no mask
    spat = multihead_attention(
        x.reshape(B * T, V, D), p["s_w_in"], p["s_b_in"], p["s_wo"], p["s_bo"],
        no_mask, n_heads,
    ).reshape(B, T, V, D)
    return temp, spat


def decoder_layer(x, p, n_heads):
    B, T, V, D = x.shape
    temp, spat = st_attention(x, p, n_heads)
    x1 = merge_layernorm(
        temp.reshape(-1, D), spat.reshape(-1, D), x.reshape(-1, D),
        p["merge_w"], p["merge_b"], p["ln1_g"], p["ln1_b"])
    x2 = ffn_layernorm(
        x1, p["ffn_w1"], p["ffn_b1"], p["ffn_w2"], p["ffn_b2"],
        p["ln2_g"], p["ln2_b"])
    return x2.reshape(B, T, V, D)


def motion_gpt_forward(x, params, n_heads):
    B, T, V, Cin = x.shape
    D = params["input_w"].shape[0]
    h = linear(x.reshape(B * T * V, Cin), params["input_w"], params["input_b"])
    h = h.reshape(B, T, V, D)
    # positional embedding over T, broadcast across B and V
    pos = params["pos_embed"][:T]                 # (T, D)
    h = h + pos[None, :, None, :]
    for p in params["layers"]:
        h = decoder_layer(h, p, n_heads)
    out_dim = params["output_w"].shape[0]
    out = linear(h.reshape(B * T * V, D), params["output_w"], params["output_b"])
    return out.reshape(B, T, V, out_dim)


# ---------------------------------------------------------------------------
# Deterministic synthetic parameter init (shapes follow the torch module)
# ---------------------------------------------------------------------------
def init_params(key, d_model, num_layers, max_seq_len, input_dim, output_dim):
    def nrm(k, shape, scale=0.1):
        return jax.random.normal(k, shape, jnp.float32) * scale

    D = d_model
    keys = jax.random.split(key, 3 + num_layers)
    params = {}
    k1, k2 = jax.random.split(keys[0])
    params["input_w"] = nrm(k1, (D, input_dim))
    params["input_b"] = nrm(k2, (D,))
    params["pos_embed"] = nrm(keys[1], (max_seq_len, D))
    k1, k2 = jax.random.split(keys[2])
    params["output_w"] = nrm(k1, (output_dim, D))
    params["output_b"] = nrm(k2, (output_dim,))

    layers = []
    for li in range(num_layers):
        lk = jax.random.split(keys[3 + li], 12)
        layers.append({
            "t_w_in": nrm(lk[0], (3 * D, D)),
            "t_b_in": nrm(lk[1], (3 * D,)),
            "t_wo": nrm(lk[2], (D, D)),
            "t_bo": nrm(lk[3], (D,)),
            "s_w_in": nrm(lk[4], (3 * D, D)),
            "s_b_in": nrm(lk[5], (3 * D,)),
            "s_wo": nrm(lk[6], (D, D)),
            "s_bo": nrm(lk[7], (D,)),
            "merge_w": nrm(lk[8], (D, 2 * D)),
            "merge_b": nrm(lk[9], (D,)),
            "ffn_w1": nrm(lk[10], (4 * D, D)),
            "ffn_b1": jnp.zeros((4 * D,), jnp.float32),
            "ffn_w2": nrm(lk[11], (D, 4 * D)),
            "ffn_b2": jnp.zeros((D,), jnp.float32),
            "ln1_g": jnp.ones((D,), jnp.float32),
            "ln1_b": jnp.zeros((D,), jnp.float32),
            "ln2_g": jnp.ones((D,), jnp.float32),
            "ln2_b": jnp.zeros((D,), jnp.float32),
        })
    params["layers"] = layers
    return params


if __name__ == "__main__":
    B, T, V = 2, 8, 4
    d_model, n_heads, num_layers = 32, 4, 2
    max_seq_len, input_dim, output_dim = 64, 6, 3

    key = jax.random.PRNGKey(0)
    k_params, k_x = jax.random.split(key)
    params = init_params(k_params, d_model, num_layers, max_seq_len,
                         input_dim, output_dim)
    x = jax.random.normal(k_x, (B, T, V, input_dim), jnp.float32)

    fwd = jax.jit(lambda xx, pp: motion_gpt_forward(xx, pp, n_heads))
    out = jax.block_until_ready(fwd(x, params))

    assert out.shape == (B, T, V, output_dim), out.shape
    assert bool(jnp.all(jnp.isfinite(out)))
    print("KERNEL_OK")
</pallas_src>

<mosaic_0001>
module attributes {stable_mosaic.version = 11 : i64} {
  func.func @_linear_kernel(%arg0: i32, %arg1: memref<64x6xf32, #tpu.memory_space<vmem>>, %arg2: memref<32x6xbf16, #tpu.memory_space<vmem>>, %arg3: memref<1x32xf32, #tpu.memory_space<vmem>>, %arg4: memref<64x32xf32, #tpu.memory_space<vmem>>) attributes {dimension_semantics = [#tpu.dimension_semantics<parallel>], iteration_bounds = array<i64: 1>, scalar_prefetch = 0 : i64, scratch_operands = 0 : i64, tpu.core_type = #tpu.core_type<tc>, window_params = [{transform_indices = @transform_0, window_bounds = array<i64: 64, 6>}, {pipeline_mode = #tpu.pipeline_mode<synchronous>, transform_indices = @transform_1, window_bounds = array<i64: 32, 6>}, {pipeline_mode = #tpu.pipeline_mode<synchronous>, transform_indices = @transform_2, window_bounds = array<i64: 1, 32>}, {transform_indices = @transform_3, window_bounds = array<i64: 64, 32>}]} {
    %c0 = arith.constant 0 : index
    %c0_0 = arith.constant 0 : index
    %0 = vector.load %arg1[%c0, %c0_0] : memref<64x6xf32, #tpu.memory_space<vmem>>, vector<64x6xf32>
    %1 = arith.truncf %0 : vector<64x6xf32> to vector<64x6xbf16>
    %c0_1 = arith.constant 0 : index
    %c0_2 = arith.constant 0 : index
    %2 = vector.load %arg2[%c0_1, %c0_2] : memref<32x6xbf16, #tpu.memory_space<vmem>>, vector<32x6xbf16>
    %cst = arith.constant dense<0.000000e+00> : vector<64x32xf32>
    %3 = tpu.matmul %1, %2, %cst {dimension_numbers = #tpu.dot_dimension_numbers<[1], [1], [0], [0], [0, 0, 1, 0], [], []>} : vector<64x6xbf16>, vector<32x6xbf16>, vector<64x32xf32> -> vector<64x32xf32>
    %c0_3 = arith.constant 0 : index
    %c0_4 = arith.constant 0 : index
    %4 = vector.load %arg3[%c0_3, %c0_4] : memref<1x32xf32, #tpu.memory_space<vmem>>, vector<1x32xf32>
    %5 = vector.broadcast %4 : vector<1x32xf32> to vector<64x32xf32>
    %6 = arith.addf %3, %5 : vector<64x32xf32>
    %c0_5 = arith.constant 0 : index
    %c0_6 = arith.constant 0 : index
    %7 = vector.load %arg4[%c0_5, %c0_6] : memref<64x32xf32, #tpu.memory_space<vmem>>, vector<64x32xf32>
    tpu.vector_store %arg4[%c0_5, %c0_6], %6 {strides = array<i32>} : memref<64x32xf32, #tpu.memory_space<vmem>>, vector<64x32xf32>,
    return
  }
  func.func @transform_0(%arg0: i32) -> (i32, i32) {
    %c0_i32 = arith.constant 0 : i32
    %c0_i32_0 = arith.constant 0 : i32
    return %arg0, %c0_i32 : i32, i32
  }
  func.func @transform_1(%arg0: i32) -> (i32, i32) {
    %c0_i32 = arith.constant 0 : i32
    %c0_i32_0 = arith.constant 0 : i32
    %c0_i32_1 = arith.constant 0 : i32
    return %c0_i32, %c0_i32_0 : i32, i32
  }
  func.func @transform_2(%arg0: i32) -> (i32, i32) {
    %c0_i32 = arith.constant 0 : i32
    %c0_i32_0 = arith.constant 0 : i32
    %c0_i32_1 = arith.constant 0 : i32
    return %c0_i32, %c0_i32_0 : i32, i32
  }
  func.func @transform_3(%arg0: i32) -> (i32, i32) {
    %c0_i32 = arith.constant 0 : i32
    %c0_i32_0 = arith.constant 0 : i32
    return %arg0, %c0_i32 : i32, i32
  }
}

module attributes {stable_mosaic.version = 11 : i64} {
  func.func @_mha_kernel(%arg0: i32, %arg1: memref<64x32xf32, #tpu.memory_space<vmem>>, %arg2: memref<96x32xbf16, #tpu.memory_space<vmem>>, %arg3: memref<1x96xf32, #tpu.memory_space<vmem>>, %arg4: memref<32x32xbf16, #tpu.memory_space<vmem>>, %arg5: memref<1x32xf32, #tpu.memory_space<vmem>>, %arg6: memref<64x64xf32, #tpu.memory_space<vmem>>, %arg7: memref<64x32xf32, #tpu.memory_space<vmem>>) attributes {dimension_semantics = [#tpu.dimension_semantics<parallel>], iteration_bounds = array<i64: 1>, scalar_prefetch = 0 : i64, scratch_operands = 0 : i64, tpu.core_type = #tpu.core_type<tc>, window_params = [{transform_indices = @transform_0, window_bounds = array<i64: 64, 32>}, {pipeline_mode = #tpu.pipeline_mode<synchronous>, transform_indices = @transform_1, window_bounds = array<i64: 96, 32>}, {pipeline_mode = #tpu.pipeline_mode<synchronous>, transform_indices = @transform_2, window_bounds = array<i64: 1, 96>}, {pipeline_mode = #tpu.pipeline_mode<synchronous>, transform_indices = @transform_3, window_bounds = array<i64: 32, 32>}, {pipeline_mode = #tpu.pipeline_mode<synchronous>, transform_indices = @transform_4, window_bounds = array<i64: 1, 32>}, {pipeline_mode = #tpu.pipeline_mode<synchronous>, transform_indices = @transform_5, window_bounds = array<i64: 64, 64>}, {transform_indices = @transform_6, window_bounds = array<i64: 64, 32>}]} {
    %c0 = arith.constant 0 : index
    %c0_0 = arith.constant 0 : index
    %0 = vector.load %arg1[%c0, %c0_0] : memref<64x32xf32, #tpu.memory_space<vmem>>, vector<64x32xf32>
    %1 = arith.truncf %0 : vector<64x32xf32> to vector<64x32xbf16>
    %c0_1 = arith.constant 0 : index
    %c0_2 = arith.constant 0 : index
    %2 = vector.load %arg2[%c0_1, %c0_2] : memref<96x32xbf16, #tpu.memory_space<vmem>>, vector<96x32xbf16>
    %cst = arith.constant dense<0.000000e+00> : vector<64x96xf32>
    %3 = tpu.matmul %1, %2, %cst {dimension_numbers = #tpu.dot_dimension_numbers<[1], [1], [0], [0], [0, 0, 1, 0], [], []>} : vector<64x32xbf16>, vector<96x32xbf16>, vector<64x96xf32> -> vector<64x96xf32>
    %c0_3 = arith.constant 0 : index
    %c0_4 = arith.constant 0 : index
    %4 = vector.load %arg3[%c0_3, %c0_4] : memref<1x96xf32, #tpu.memory_space<vmem>>, vector<1x96xf32>
    %5 = vector.broadcast %4 : vector<1x96xf32> to vector<64x96xf32>
    %6 = arith.addf %3, %5 : vector<64x96xf32>
    %c0_5 = arith.constant 0 : index
    %c0_6 = arith.constant 0 : index
    %7 = vector.load %arg6[%c0_5, %c0_6] : memref<64x64xf32, #tpu.memory_space<vmem>>, vector<64x64xf32>
    %8 = vector.extract_strided_slice %6 {offsets = [0, 0], sizes = [64, 8], strides = [1, 1]} : vector<64x96xf32> to vector<64x8xf32>
    %cst_7 = arith.constant 0.353553385 : f32
    %9 = vector.broadcast %cst_7 : f32 to vector<64x8xf32>
    %10 = arith.mulf %8, %9 : vector<64x8xf32>
    %11 = arith.truncf %10 : vector<64x8xf32> to vector<64x8xbf16>
    %12 = vector.extract_strided_slice %6 {offsets = [0, 32], sizes = [64, 8], strides = [1, 1]} : vector<64x96xf32> to vector<64x8xf32>
    %13 = arith.truncf %12 : vector<64x8xf32> to vector<64x8xbf16>
    %14 = vector.extract_strided_slice %6 {offsets = [0, 64], sizes = [64, 8], strides = [1, 1]} : vector<64x96xf32> to vector<64x8xf32>
    %15 = arith.truncf %14 : vector<64x8xf32> to vector<64x8xbf16>
    %cst_8 = arith.constant dense<0.000000e+00> : vector<64x64xf32>
    %16 = tpu.matmul %11, %13, %cst_8 {dimension_numbers = #tpu.dot_dimension_numbers<[1], [1], [0], [0], [0, 0, 1, 0], [], []>} : vector<64x8xbf16>, vector<64x8xbf16>, vector<64x64xf32> -> vector<64x64xf32>
    %17 = arith.addf %16, %7 : vector<64x64xf32>
    %cst_9 = arith.constant dense<0xFF800000> : vector<64xf32>
    %18 = vector.multi_reduction <maximumf>, %17, %cst_9 [1] : vector<64x64xf32> to vector<64xf32>
    %19 = vector.shape_cast %18 : vector<64xf32> to vector<64x1xf32>
    %20 = vector.broadcast %19 : vector<64x1xf32> to vector<64x64xf32>
    %21 = arith.subf %17, %20 : vector<64x64xf32>
    %22 = math.exp %21 : vector<64x64xf32>
    %cst_10 = arith.constant dense<0.000000e+00> : vector<64xf32>
    %23 = vector.multi_reduction <add>, %22, %cst_10 [1] : vector<64x64xf32> to vector<64xf32>
    %24 = vector.shape_cast %23 : vector<64xf32> to vector<64x1xf32>
    %25 = tpu.reciprocal %24 {approx = true} : vector<64x1xf32> -> vector<64x1xf32>
    %26 = vector.broadcast %25 : vector<64x1xf32> to vector<64x64xf32>
    %27 = arith.mulf %22, %26 : vector<64x64xf32>
    %28 = arith.truncf %27 : vector<64x64xf32> to vector<64x64xbf16>
    %cst_11 = arith.constant dense<0.000000e+00> : vector<64x8xf32>
    %29 = tpu.matmul %28, %15, %cst_11 {dimension_numbers = #tpu.dot_dimension_numbers<[1], [0], [0], [1], [0, 0, 1, 1], [], []>} : vector<64x64xbf16>, vector<64x8xbf16>, vector<64x8xf32> -> vector<64x8xf32>
    %30 = vector.extract_strided_slice %6 {offsets = [0, 8], sizes = [64, 8], strides = [1, 1]} : vector<64x96xf32> to vector<64x8xf32>
    %cst_12 = arith.constant 0.353553385 : f32
    %31 = vector.broadcast %cst_12 : f32 to vector<64x8xf32>
    %32 = arith.mulf %30, %31 : vector<64x8xf32>
    %33 = arith.truncf %32 : vector<64x8xf32> to vector<64x8xbf16>
    %34 = vector.extract_strided_slice %6 {offsets = [0, 40], sizes = [64, 8], strides = [1, 1]} : vector<64x96xf32> to vector<64x8xf32>
    %35 = arith.truncf %34 : vector<64x8xf32> to vector<64x8xbf16>
    %36 = vector.extract_strided_slice %6 {offsets = [0, 72], sizes = [64, 8], strides = [1, 1]} : vector<64x96xf32> to vector<64x8xf32>
    %37 = arith.truncf %36 : vector<64x8xf32> to vector<64x8xbf16>
    %cst_13 = arith.constant dense<0.000000e+00> : vector<64x64xf32>
    %38 = tpu.matmul %33, %35, %cst_13 {dimension_numbers = #tpu.dot_dimension_numbers<[1], [1], [0], [0], [0, 0, 1, 0], [], []>} : vector<64x8xbf16>, vector<64x8xbf16>, vector<64x64xf32> -> vector<64x64xf32>
    %39 = arith.addf %38, %7 : vector<64x64xf32>
    %cst_14 = arith.constant dense<0xFF800000> : vector<64xf32>
    %40 = vector.multi_reduction <maximumf>, %39, %cst_14 [1] : vector<64x64xf32> to vector<64xf32>
    %41 = vector.shape_cast %40 : vector<64xf32> to vector<64x1xf32>
    %42 = vector.broadcast %41 : vector<64x1xf32> to vector<64x64xf32>
    %43 = arith.subf %39, %42 : vector<64x64xf32>
    %44 = math.exp %43 : vector<64x64xf32>
    %cst_15 = arith.constant dense<0.000000e+00> : vector<64xf32>
    %45 = vector.multi_reduction <add>, %44, %cst_15 [1] : vector<64x64xf32> to vector<64xf32>
    %46 = vector.shape_cast %45 : vector<64xf32> to vector<64x1xf32>
    %47 = tpu.reciprocal %46 {approx = true} : vector<64x1xf32> -> vector<64x1xf32>
    %48 = vector.broadcast %47 : vector<64x1xf32> to vector<64x64xf32>
    %49 = arith.mulf %44, %48 : vector<64x64xf32>
    %50 = arith.truncf %49 : vector<64x64xf32> to vector<64x64xbf16>
    %cst_16 = arith.constant dense<0.000000e+00> : vector<64x8xf32>
    %51 = tpu.matmul %50, %37, %cst_16 {dimension_numbers = #tpu.dot_dimension_numbers<[1], [0], [0], [1], [0, 0, 1, 1], [], []>} : vector<64x64xbf16>, vector<64x8xbf16>, vector<64x8xf32> -> vector<64x8xf32>
    %52 = vector.extract_strided_slice %6 {offsets = [0, 16], sizes = [64, 8], strides = [1, 1]} : vector<64x96xf32> to vector<64x8xf32>
    %cst_17 = arith.constant 0.353553385 : f32
    %53 = vector.broadcast %cst_17 : f32 to vector<64x8xf32>
    %54 = arith.mulf %52, %53 : vector<64x8xf32>
    %55 = arith.truncf %54 : vector<64x8xf32> to vector<64x8xbf16>
    %56 = vector.extract_strided_slice %6 {offsets = [0, 48], sizes = [64, 8], strides = [1, 1]} : vector<64x96xf32> to vector<64x8xf32>
    %57 = arith.truncf %56 : vector<64x8xf32> to vector<64x8xbf16>
    %58 = vector.extract_strided_slice %6 {offsets = [0, 80], sizes = [64, 8], strides = [1, 1]} : vector<64x96xf32> to vector<64x8xf32>
    %59 = arith.truncf %58 : vector<64x8xf32> to vector<64x8xbf16>
    %cst_18 = arith.constant dense<0.000000e+00> : vector<64x64xf32>
    %60 = tpu.matmul %55, %57, %cst_18 {dimension_numbers = #tpu.dot_dimension_numbers<[1], [1], [0], [0], [0, 0, 1, 0], [], []>} : vector<64x8xbf16>, vector<64x8xbf16>, vector<64x64xf32> -> vector<64x64xf32>
    %61 = arith.addf %60, %7 : vector<64x64xf32>
    %cst_19 = arith.constant dense<0xFF800000> : vector<64xf32>
    %62 = vector.multi_reduction <maximumf>, %61, %cst_19 [1] : vector<64x64xf32> to vector<64xf32>
    %63 = vector.shape_cast %62 : vector<64xf32> to vector<64x1xf32>
    %64 = vector.broadcast %63 : vector<64x1xf32> to vector<64x64xf32>
    %65 = arith.subf %61, %64 : vector<64x64xf32>
    %66 = math.exp %65 : vector<64x64xf32>
    %cst_20 = arith.constant dense<0.000000e+00> : vector<64xf32>
    %67 = vector.multi_reduction <add>, %66, %cst_20 [1] : vector<64x64xf32> to vector<64xf32>
    %68 = vector.shape_cast %67 : vector<64xf32> to vector<64x1xf32>
    %69 = tpu.reciprocal %68 {approx = true} : vector<64x1xf32> -> vector<64x1xf32>
    %70 = vector.broadcast %69 : vector<64x1xf32> to vector<64x64xf32>
    %71 = arith.mulf %66, %70 : vector<64x64xf32>
    %72 = arith.truncf %71 : vector<64x64xf32> to vector<64x64xbf16>
    %cst_21 = arith.constant dense<0.000000e+00> : vector<64x8xf32>
    %73 = tpu.matmul %72, %59, %cst_21 {dimension_numbers = #tpu.dot_dimension_numbers<[1], [0], [0], [1], [0, 0, 1, 1], [], []>} : vector<64x64xbf16>, vector<64x8xbf16>, vector<64x8xf32> -> vector<64x8xf32>
    %74 = vector.extract_strided_slice %6 {offsets = [0, 24], sizes = [64, 8], strides = [1, 1]} : vector<64x96xf32> to vector<64x8xf32>
    %cst_22 = arith.constant 0.353553385 : f32
    %75 = vector.broadcast %cst_22 : f32 to vector<64x8xf32>
    %76 = arith.mulf %74, %75 : vector<64x8xf32>
    %77 = arith.truncf %76 : vector<64x8xf32> to vector<64x8xbf16>
    %78 = vector.extract_strided_slice %6 {offsets = [0, 56], sizes = [64, 8], strides = [1, 1]} : vector<64x96xf32> to vector<64x8xf32>
    %79 = arith.truncf %78 : vector<64x8xf32> to vector<64x8xbf16>
    %80 = vector.extract_strided_slice %6 {offsets = [0, 88], sizes = [64, 8], strides = [1, 1]} : vector<64x96xf32> to vector<64x8xf32>
    %81 = arith.truncf %80 : vector<64x8xf32> to vector<64x8xbf16>
    %cst_23 = arith.constant dense<0.000000e+00> : vector<64x64xf32>
    %82 = tpu.matmul %77, %79, %cst_23 {dimension_numbers = #tpu.dot_dimension_numbers<[1], [1], [0], [0], [0, 0, 1, 0], [], []>} : vector<64x8xbf16>, vector<64x8xbf16>, vector<64x64xf32> -> vector<64x64xf32>
    %83 = arith.addf %82, %7 : vector<64x64xf32>
    %cst_24 = arith.constant dense<0xFF800000> : vector<64xf32>
    %84 = vector.multi_reduction <maximumf>, %83, %cst_24 [1] : vector<64x64xf32> to vector<64xf32>
    %85 = vector.shape_cast %84 : vector<64xf32> to vector<64x1xf32>
    %86 = vector.broadcast %85 : vector<64x1xf32> to vector<64x64xf32>
    %87 = arith.subf %83, %86 : vector<64x64xf32>
    %88 = math.exp %87 : vector<64x64xf32>
    %cst_25 = arith.constant dense<0.000000e+00> : vector<64xf32>
    %89 = vector.multi_reduction <add>, %88, %cst_25 [1] : vector<64x64xf32> to vector<64xf32>
    %90 = vector.shape_cast %89 : vector<64xf32> to vector<64x1xf32>
    %91 = tpu.reciprocal %90 {approx = true} : vector<64x1xf32> -> vector<64x1xf32>
    %92 = vector.broadcast %91 : vector<64x1xf32> to vector<64x64xf32>
    %93 = arith.mulf %88, %92 : vector<64x64xf32>
    %94 = arith.truncf %93 : vector<64x64xf32> to vector<64x64xbf16>
    %cst_26 = arith.constant dense<0.000000e+00> : vector<64x8xf32>
    %95 = tpu.matmul %94, %81, %cst_26 {dimension_numbers = #tpu.dot_dimension_numbers<[1], [0], [0], [1], [0, 0, 1, 1], [], []>} : vector<64x64xbf16>, vector<64x8xbf16>, vector<64x8xf32> -> vector<64x8xf32>
    %96 = tpu.concatenate %29, %51, %73, %95 in 1 : vector<64x8xf32>, vector<64x8xf32>, vector<64x8xf32>, vector<64x8xf32> -> vector<64x32xf32>
    %97 = arith.truncf %96 : vector<64x32xf32> to vector<64x32xbf16>
    %c0_27 = arith.constant 0 : index
    %c0_28 = arith.constant 0 : index
    %98 = vector.load %arg4[%c0_27, %c0_28] : memref<32x32xbf16, #tpu.memory_space<vmem>>, vector<32x32xbf16>
    %cst_29 = arith.constant dense<0.000000e+00> : vector<64x32xf32>
    %99 = tpu.matmul %97, %98, %cst_29 {dimension_numbers = #tpu.dot_dimension_numbers<[1], [1], [0], [0], [0, 0, 1, 0], [], []>} : vector<64x32xbf16>, vector<32x32xbf16>, vector<64x32xf32> -> vector<64x32xf32>
    %c0_30 = arith.constant 0 : index
    %c0_31 = arith.constant 0 : index
    %100 = vector.load %arg5[%c0_30, %c0_31] : memref<1x32xf32, #tpu.memory_space<vmem>>, vector<1x32xf32>
    %101 = vector.broadcast %100 : vector<1x32xf32> to vector<64x32xf32>
    %102 = arith.addf %99, %101 : vector<64x32xf32>
    %c0_32 = arith.constant 0 : index
    %c0_33 = arith.constant 0 : index
    %103 = vector.load %arg7[%c0_32, %c0_33] : memref<64x32xf32, #tpu.memory_space<vmem>>, vector<64x32xf32>
    tpu.vector_store %arg7[%c0_32, %c0_33], %102 {strides = array<i32>} : memref<64x32xf32, #tpu.memory_space<vmem>>, vector<64x32xf32>,
    return
  }
  func.func @transform_0(%arg0: i32) -> (i32, i32) {
    %c0_i32 = arith.constant 0 : i32
    %c0_i32_0 = arith.constant 0 : i32
    return %arg0, %c0_i32 : i32, i32
  }
  func.func @transform_1(%arg0: i32) -> (i32, i32) {
    %c0_i32 = arith.constant 0 : i32
    %c0_i32_0 = arith.constant 0 : i32
    %c0_i32_1 = arith.constant 0 : i32
    return %c0_i32, %c0_i32_0 : i32, i32
  }
  func.func @transform_2(%arg0: i32) -> (i32, i32) {
    %c0_i32 = arith.constant 0 : i32
    %c0_i32_0 = arith.constant 0 : i32
    %c0_i32_1 = arith.constant 0 : i32
    return %c0_i32, %c0_i32_0 : i32, i32
  }
  func.func @transform_3(%arg0: i32) -> (i32, i32) {
    %c0_i32 = arith.constant 0 : i32
    %c0_i32_0 = arith.constant 0 : i32
    %c0_i32_1 = arith.constant 0 : i32
    return %c0_i32, %c0_i32_0 : i32, i32
  }
  func.func @transform_4(%arg0: i32) -> (i32, i32) {
    %c0_i32 = arith.constant 0 : i32
    %c0_i32_0 = arith.constant 0 : i32
    %c0_i32_1 = arith.constant 0 : i32
    return %c0_i32, %c0_i32_0 : i32, i32
  }
  func.func @transform_5(%arg0: i32) -> (i32, i32) {
    %c0_i32 = arith.constant 0 : i32
    %c0_i32_0 = arith.constant 0 : i32
    %c0_i32_1 = arith.constant 0 : i32
    return %c0_i32, %c0_i32_0 : i32, i32
  }
  func.func @transform_6(%arg0: i32) -> (i32, i32) {
    %c0_i32 = arith.constant 0 : i32
    %c0_i32_0 = arith.constant 0 : i32
    return %arg0, %c0_i32 : i32, i32
  }
}

module attributes {stable_mosaic.version = 11 : i64} {
  func.func @_merge_ln_kernel(%arg0: i32, %arg1: memref<64x32xf32, #tpu.memory_space<vmem>>, %arg2: memref<64x32xf32, #tpu.memory_space<vmem>>, %arg3: memref<64x32xf32, #tpu.memory_space<vmem>>, %arg4: memref<32x32xbf16, #tpu.memory_space<vmem>>, %arg5: memref<32x32xbf16, #tpu.memory_space<vmem>>, %arg6: memref<1x32xf32, #tpu.memory_space<vmem>>, %arg7: memref<1x32xf32, #tpu.memory_space<vmem>>, %arg8: memref<1x32xf32, #tpu.memory_space<vmem>>, %arg9: memref<64x32xf32, #tpu.memory_space<vmem>>) attributes {dimension_semantics = [#tpu.dimension_semantics<parallel>], iteration_bounds = array<i64: 1>, scalar_prefetch = 0 : i64, scratch_operands = 0 : i64, tpu.core_type = #tpu.core_type<tc>, window_params = [{transform_indices = @transform_0, window_bounds = array<i64: 64, 32>}, {transform_indices = @transform_1, window_bounds = array<i64: 64, 32>}, {transform_indices = @transform_2, window_bounds = array<i64: 64, 32>}, {pipeline_mode = #tpu.pipeline_mode<synchronous>, transform_indices = @transform_3, window_bounds = array<i64: 32, 32>}, {pipeline_mode = #tpu.pipeline_mode<synchronous>, transform_indices = @transform_4, window_bounds = array<i64: 32, 32>}, {pipeline_mode = #tpu.pipeline_mode<synchronous>, transform_indices = @transform_5, window_bounds = array<i64: 1, 32>}, {pipeline_mode = #tpu.pipeline_mode<synchronous>, transform_indices = @transform_6, window_bounds = array<i64: 1, 32>}, {pipeline_mode = #tpu.pipeline_mode<synchronous>, transform_indices = @transform_7, window_bounds = array<i64: 1, 32>}, {transform_indices = @transform_8, window_bounds = array<i64: 64, 32>}]} {
    %c0 = arith.constant 0 : index
    %c0_0 = arith.constant 0 : index
    %0 = vector.load %arg1[%c0, %c0_0] : memref<64x32xf32, #tpu.memory_space<vmem>>, vector<64x32xf32>
    %1 = arith.truncf %0 : vector<64x32xf32> to vector<64x32xbf16>
    %c0_1 = arith.constant 0 : index
    %c0_2 = arith.constant 0 : index
    %2 = vector.load %arg2[%c0_1, %c0_2] : memref<64x32xf32, #tpu.memory_space<vmem>>, vector<64x32xf32>
    %3 = arith.truncf %2 : vector<64x32xf32> to vector<64x32xbf16>
    %c0_3 = arith.constant 0 : index
    %c0_4 = arith.constant 0 : index
    %4 = vector.load %arg4[%c0_3, %c0_4] : memref<32x32xbf16, #tpu.memory_space<vmem>>, vector<32x32xbf16>
    %cst = arith.constant dense<0.000000e+00> : vector<64x32xf32>
    %5 = tpu.matmul %1, %4, %cst {dimension_numbers = #tpu.dot_dimension_numbers<[1], [1], [0], [0], [0, 0, 1, 0], [], []>} : vector<64x32xbf16>, vector<32x32xbf16>, vector<64x32xf32> -> vector<64x32xf32>
    %c0_5 = arith.constant 0 : index
    %c0_6 = arith.constant 0 : index
    %6 = vector.load %arg5[%c0_5, %c0_6] : memref<32x32xbf16, #tpu.memory_space<vmem>>, vector<32x32xbf16>
    %cst_7 = arith.constant dense<0.000000e+00> : vector<64x32xf32>
    %7 = tpu.matmul %3, %6, %cst_7 {dimension_numbers = #tpu.dot_dimension_numbers<[1], [1], [0], [0], [0, 0, 1, 0], [], []>} : vector<64x32xbf16>, vector<32x32xbf16>, vector<64x32xf32> -> vector<64x32xf32>
    %8 = arith.addf %5, %7 : vector<64x32xf32>
    %c0_8 = arith.constant 0 : index
    %c0_9 = arith.constant 0 : index
    %9 = vector.load %arg6[%c0_8, %c0_9] : memref<1x32xf32, #tpu.memory_space<vmem>>, vector<1x32xf32>
    %10 = vector.broadcast %9 : vector<1x32xf32> to vector<64x32xf32>
    %11 = arith.addf %8, %10 : vector<64x32xf32>
    %c0_10 = arith.constant 0 : index
    %c0_11 = arith.constant 0 : index
    %12 = vector.load %arg3[%c0_10, %c0_11] : memref<64x32xf32, #tpu.memory_space<vmem>>, vector<64x32xf32>
    %13 = arith.addf %12, %11 : vector<64x32xf32>
    %cst_12 = arith.constant dense<0.000000e+00> : vector<64xf32>
    %14 = vector.multi_reduction <add>, %13, %cst_12 [1] : vector<64x32xf32> to vector<64xf32>
    %15 = vector.shape_cast %14 : vector<64xf32> to vector<64x1xf32>
    %cst_13 = arith.constant 3.200000e+01 : f32
    %16 = vector.broadcast %cst_13 : f32 to vector<64x1xf32>
    %17 = arith.divf %15, %16 : vector<64x1xf32>
    %18 = vector.broadcast %17 : vector<64x1xf32> to vector<64x32xf32>
    %19 = arith.subf %13, %18 : vector<64x32xf32>
    %20 = arith.mulf %19, %19 : vector<64x32xf32>
    %cst_14 = arith.constant dense<0.000000e+00> : vector<64xf32>
    %21 = vector.multi_reduction <add>, %20, %cst_14 [1] : vector<64x32xf32> to vector<64xf32>
    %22 = vector.shape_cast %21 : vector<64xf32> to vector<64x1xf32>
    %cst_15 = arith.constant 3.200000e+01 : f32
    %23 = vector.broadcast %cst_15 : f32 to vector<64x1xf32>
    %24 = arith.divf %22, %23 : vector<64x1xf32>
    %cst_16 = arith.constant 9.99999974E-6 : f32
    %25 = vector.broadcast %cst_16 : f32 to vector<64x1xf32>
    %26 = arith.addf %24, %25 : vector<64x1xf32>
    %27 = math.rsqrt %26 : vector<64x1xf32>
    %28 = vector.broadcast %27 : vector<64x1xf32> to vector<64x32xf32>
    %29 = arith.mulf %19, %28 : vector<64x32xf32>
    %c0_17 = arith.constant 0 : index
    %c0_18 = arith.constant 0 : index
    %30 = vector.load %arg7[%c0_17, %c0_18] : memref<1x32xf32, #tpu.memory_space<vmem>>, vector<1x32xf32>
    %31 = vector.broadcast %30 : vector<1x32xf32> to vector<64x32xf32>
    %32 = arith.mulf %29, %31 : vector<64x32xf32>
    %c0_19 = arith.constant 0 : index
    %c0_20 = arith.constant 0 : index
    %33 = vector.load %arg8[%c0_19, %c0_20] : memref<1x32xf32, #tpu.memory_space<vmem>>, vector<1x32xf32>
    %34 = vector.broadcast %33 : vector<1x32xf32> to vector<64x32xf32>
    %35 = arith.addf %32, %34 : vector<64x32xf32>
    %c0_21 = arith.constant 0 : index
    %c0_22 = arith.constant 0 : index
    %36 = vector.load %arg9[%c0_21, %c0_22] : memref<64x32xf32, #tpu.memory_space<vmem>>, vector<64x32xf32>
    tpu.vector_store %arg9[%c0_21, %c0_22], %35 {strides = array<i32>} : memref<64x32xf32, #tpu.memory_space<vmem>>, vector<64x32xf32>,
    return
  }
  func.func @transform_0(%arg0: i32) -> (i32, i32) {
    %c0_i32 = arith.constant 0 : i32
    %c0_i32_0 = arith.constant 0 : i32
    return %arg0, %c0_i32 : i32, i32
  }
  func.func @transform_1(%arg0: i32) -> (i32, i32) {
    %c0_i32 = arith.constant 0 : i32
    %c0_i32_0 = arith.constant 0 : i32
    return %arg0, %c0_i32 : i32, i32
  }
  func.func @transform_2(%arg0: i32) -> (i32, i32) {
    %c0_i32 = arith.constant 0 : i32
    %c0_i32_0 = arith.constant 0 : i32
    return %arg0, %c0_i32 : i32, i32
  }
  func.func @transform_3(%arg0: i32) -> (i32, i32) {
    %c0_i32 = arith.constant 0 : i32
    %c0_i32_0 = arith.constant 0 : i32
    %c0_i32_1 = arith.constant 0 : i32
    return %c0_i32, %c0_i32_0 : i32, i32
  }
  func.func @transform_4(%arg0: i32) -> (i32, i32) {
    %c0_i32 = arith.constant 0 : i32
    %c0_i32_0 = arith.constant 0 : i32
    %c0_i32_1 = arith.constant 0 : i32
    return %c0_i32, %c0_i32_0 : i32, i32
  }
  func.func @transform_5(%arg0: i32) -> (i32, i32) {
    %c0_i32 = arith.constant 0 : i32
    %c0_i32_0 = arith.constant 0 : i32
    %c0_i32_1 = arith.constant 0 : i32
    return %c0_i32, %c0_i32_0 : i32, i32
  }
  func.func @transform_6(%arg0: i32) -> (i32, i32) {
    %c0_i32 = arith.constant 0 : i32
    %c0_i32_0 = arith.constant 0 : i32
    %c0_i32_1 = arith.constant 0 : i32
    return %c0_i32, %c0_i32_0 : i32, i32
  }
  func.func @transform_7(%arg0: i32) -> (i32, i32) {
    %c0_i32 = arith.constant 0 : i32
    %c0_i32_0 = arith.constant 0 : i32
    %c0_i32_1 = arith.constant 0 : i32
    return %c0_i32, %c0_i32_0 : i32, i32
  }
  func.func @transform_8(%arg0: i32) -> (i32, i32) {
    %c0_i32 = arith.constant 0 : i32
    %c0_i32_0 = arith.constant 0 : i32
    return %arg0, %c0_i32 : i32, i32
  }
}

module attributes {stable_mosaic.version = 11 : i64} {
  func.func @_ffn_ln_kernel(%arg0: i32, %arg1: memref<64x32xf32, #tpu.memory_space<vmem>>, %arg2: memref<128x32xbf16, #tpu.memory_space<vmem>>, %arg3: memref<1x128xf32, #tpu.memory_space<vmem>>, %arg4: memref<32x128xbf16, #tpu.memory_space<vmem>>, %arg5: memref<1x32xf32, #tpu.memory_space<vmem>>, %arg6: memref<1x32xf32, #tpu.memory_space<vmem>>, %arg7: memref<1x32xf32, #tpu.memory_space<vmem>>, %arg8: memref<64x32xf32, #tpu.memory_space<vmem>>) attributes {dimension_semantics = [#tpu.dimension_semantics<parallel>], iteration_bounds = array<i64: 1>, scalar_prefetch = 0 : i64, scratch_operands = 0 : i64, tpu.core_type = #tpu.core_type<tc>, window_params = [{transform_indices = @transform_0, window_bounds = array<i64: 64, 32>}, {pipeline_mode = #tpu.pipeline_mode<synchronous>, transform_indices = @transform_1, window_bounds = array<i64: 128, 32>}, {pipeline_mode = #tpu.pipeline_mode<synchronous>, transform_indices = @transform_2, window_bounds = array<i64: 1, 128>}, {pipeline_mode = #tpu.pipeline_mode<synchronous>, transform_indices = @transform_3, window_bounds = array<i64: 32, 128>}, {pipeline_mode = #tpu.pipeline_mode<synchronous>, transform_indices = @transform_4, window_bounds = array<i64: 1, 32>}, {pipeline_mode = #tpu.pipeline_mode<synchronous>, transform_indices = @transform_5, window_bounds = array<i64: 1, 32>}, {pipeline_mode = #tpu.pipeline_mode<synchronous>, transform_indices = @transform_6, window_bounds = array<i64: 1, 32>}, {transform_indices = @transform_7, window_bounds = array<i64: 64, 32>}]} {
    %c0 = arith.constant 0 : index
    %c0_0 = arith.constant 0 : index
    %0 = vector.load %arg1[%c0, %c0_0] : memref<64x32xf32, #tpu.memory_space<vmem>>, vector<64x32xf32>
    %1 = arith.truncf %0 : vector<64x32xf32> to vector<64x32xbf16>
    %c0_1 = arith.constant 0 : index
    %c0_2 = arith.constant 0 : index
    %2 = vector.load %arg2[%c0_1, %c0_2] : memref<128x32xbf16, #tpu.memory_space<vmem>>, vector<128x32xbf16>
    %cst = arith.constant dense<0.000000e+00> : vector<64x128xf32>
    %3 = tpu.matmul %1, %2, %cst {dimension_numbers = #tpu.dot_dimension_numbers<[1], [1], [0], [0], [0, 0, 1, 0], [], []>} : vector<64x32xbf16>, vector<128x32xbf16>, vector<64x128xf32> -> vector<64x128xf32>
    %c0_3 = arith.constant 0 : index
    %c0_4 = arith.constant 0 : index
    %4 = vector.load %arg3[%c0_3, %c0_4] : memref<1x128xf32, #tpu.memory_space<vmem>>, vector<1x128xf32>
    %5 = vector.broadcast %4 : vector<1x128xf32> to vector<64x128xf32>
    %6 = arith.addf %3, %5 : vector<64x128xf32>
    %cst_5 = arith.constant 0.000000e+00 : f32
    %7 = vector.broadcast %cst_5 : f32 to vector<64x128xf32>
    %8 = arith.maximumf %6, %7 : vector<64x128xf32>
    %9 = arith.truncf %8 : vector<64x128xf32> to vector<64x128xbf16>
    %c0_6 = arith.constant 0 : index
    %c0_7 = arith.constant 0 : index
    %10 = vector.load %arg4[%c0_6, %c0_7] : memref<32x128xbf16, #tpu.memory_space<vmem>>, vector<32x128xbf16>
    %cst_8 = arith.constant dense<0.000000e+00> : vector<64x32xf32>
    %11 = tpu.matmul %9, %10, %cst_8 {dimension_numbers = #tpu.dot_dimension_numbers<[1], [1], [0], [0], [0, 0, 1, 0], [], []>} : vector<64x128xbf16>, vector<32x128xbf16>, vector<64x32xf32> -> vector<64x32xf32>
    %c0_9 = arith.constant 0 : index
    %c0_10 = arith.constant 0 : index
    %12 = vector.load %arg5[%c0_9, %c0_10] : memref<1x32xf32, #tpu.memory_space<vmem>>, vector<1x32xf32>
    %13 = vector.broadcast %12 : vector<1x32xf32> to vector<64x32xf32>
    %14 = arith.addf %11, %13 : vector<64x32xf32>
    %15 = arith.addf %0, %14 : vector<64x32xf32>
    %cst_11 = arith.constant dense<0.000000e+00> : vector<64xf32>
    %16 = vector.multi_reduction <add>, %15, %cst_11 [1] : vector<64x32xf32> to vector<64xf32>
    %17 = vector.shape_cast %16 : vector<64xf32> to vector<64x1xf32>
    %cst_12 = arith.constant 3.200000e+01 : f32
    %18 = vector.broadcast %cst_12 : f32 to vector<64x1xf32>
    %19 = arith.divf %17, %18 : vector<64x1xf32>
    %20 = vector.broadcast %19 : vector<64x1xf32> to vector<64x32xf32>
    %21 = arith.subf %15, %20 : vector<64x32xf32>
    %22 = arith.mulf %21, %21 : vector<64x32xf32>
    %cst_13 = arith.constant dense<0.000000e+00> : vector<64xf32>
    %23 = vector.multi_reduction <add>, %22, %cst_13 [1] : vector<64x32xf32> to vector<64xf32>
    %24 = vector.shape_cast %23 : vector<64xf32> to vector<64x1xf32>
    %cst_14 = arith.constant 3.200000e+01 : f32
    %25 = vector.broadcast %cst_14 : f32 to vector<64x1xf32>
    %26 = arith.divf %24, %25 : vector<64x1xf32>
    %cst_15 = arith.constant 9.99999974E-6 : f32
    %27 = vector.broadcast %cst_15 : f32 to vector<64x1xf32>
    %28 = arith.addf %26, %27 : vector<64x1xf32>
    %29 = math.rsqrt %28 : vector<64x1xf32>
    %30 = vector.broadcast %29 : vector<64x1xf32> to vector<64x32xf32>
    %31 = arith.mulf %21, %30 : vector<64x32xf32>
    %c0_16 = arith.constant 0 : index
    %c0_17 = arith.constant 0 : index
    %32 = vector.load %arg6[%c0_16, %c0_17] : memref<1x32xf32, #tpu.memory_space<vmem>>, vector<1x32xf32>
    %33 = vector.broadcast %32 : vector<1x32xf32> to vector<64x32xf32>
    %34 = arith.mulf %31, %33 : vector<64x32xf32>
    %c0_18 = arith.constant 0 : index
    %c0_19 = arith.constant 0 : index
    %35 = vector.load %arg7[%c0_18, %c0_19] : memref<1x32xf32, #tpu.memory_space<vmem>>, vector<1x32xf32>
    %36 = vector.broadcast %35 : vector<1x32xf32> to vector<64x32xf32>
    %37 = arith.addf %34, %36 : vector<64x32xf32>
    %c0_20 = arith.constant 0 : index
    %c0_21 = arith.constant 0 : index
    %38 = vector.load %arg8[%c0_20, %c0_21] : memref<64x32xf32, #tpu.memory_space<vmem>>, vector<64x32xf32>
    tpu.vector_store %arg8[%c0_20, %c0_21], %37 {strides = array<i32>} : memref<64x32xf32, #tpu.memory_space<vmem>>, vector<64x32xf32>,
    return
  }
  func.func @transform_0(%arg0: i32) -> (i32, i32) {
    %c0_i32 = arith.constant 0 : i32
    %c0_i32_0 = arith.constant 0 : i32
    return %arg0, %c0_i32 : i32, i32
  }
  func.func @transform_1(%arg0: i32) -> (i32, i32) {
    %c0_i32 = arith.constant 0 : i32
    %c0_i32_0 = arith.constant 0 : i32
    %c0_i32_1 = arith.constant 0 : i32
    return %c0_i32, %c0_i32_0 : i32, i32
  }
  func.func @transform_2(%arg0: i32) -> (i32, i32) {
    %c0_i32 = arith.constant 0 : i32
    %c0_i32_0 = arith.constant 0 : i32
    %c0_i32_1 = arith.constant 0 : i32
    return %c0_i32, %c0_i32_0 : i32, i32
  }
  func.func @transform_3(%arg0: i32) -> (i32, i32) {
    %c0_i32 = arith.constant 0 : i32
    %c0_i32_0 = arith.constant 0 : i32
    %c0_i32_1 = arith.constant 0 : i32
    return %c0_i32, %c0_i32_0 : i32, i32
  }
  func.func @transform_4(%arg0: i32) -> (i32, i32) {
    %c0_i32 = arith.constant 0 : i32
    %c0_i32_0 = arith.constant 0 : i32
    %c0_i32_1 = arith.constant 0 : i32
    return %c0_i32, %c0_i32_0 : i32, i32
  }
  func.func @transform_5(%arg0: i32) -> (i32, i32) {
    %c0_i32 = arith.constant 0 : i32
    %c0_i32_0 = arith.constant 0 : i32
    %c0_i32_1 = arith.constant 0 : i32
    return %c0_i32, %c0_i32_0 : i32, i32
  }
  func.func @transform_6(%arg0: i32) -> (i32, i32) {
    %c0_i32 = arith.constant 0 : i32
    %c0_i32_0 = arith.constant 0 : i32
    %c0_i32_1 = arith.constant 0 : i32
    return %c0_i32, %c0_i32_0 : i32, i32
  }
  func.func @transform_7(%arg0: i32) -> (i32, i32) {
    %c0_i32 = arith.constant 0 : i32
    %c0_i32_0 = arith.constant 0 : i32
    return %arg0, %c0_i32 : i32, i32
  }
}

module attributes {stable_mosaic.version = 11 : i64} {
  func.func @_linear_kernel(%arg0: i32, %arg1: memref<64x32xf32, #tpu.memory_space<vmem>>, %arg2: memref<3x32xbf16, #tpu.memory_space<vmem>>, %arg3: memref<1x3xf32, #tpu.memory_space<vmem>>, %arg4: memref<64x3xf32, #tpu.memory_space<vmem>>) attributes {dimension_semantics = [#tpu.dimension_semantics<parallel>], iteration_bounds = array<i64: 1>, scalar_prefetch = 0 : i64, scratch_operands = 0 : i64, tpu.core_type = #tpu.core_type<tc>, window_params = [{transform_indices = @transform_0, window_bounds = array<i64: 64, 32>}, {pipeline_mode = #tpu.pipeline_mode<synchronous>, transform_indices = @transform_1, window_bounds = array<i64: 3, 32>}, {pipeline_mode = #tpu.pipeline_mode<synchronous>, transform_indices = @transform_2, window_bounds = array<i64: 1, 3>}, {transform_indices = @transform_3, window_bounds = array<i64: 64, 3>}]} {
    %c0 = arith.constant 0 : index
    %c0_0 = arith.constant 0 : index
    %0 = vector.load %arg1[%c0, %c0_0] : memref<64x32xf32, #tpu.memory_space<vmem>>, vector<64x32xf32>
    %1 = arith.truncf %0 : vector<64x32xf32> to vector<64x32xbf16>
    %c0_1 = arith.constant 0 : index
    %c0_2 = arith.constant 0 : index
    %2 = vector.load %arg2[%c0_1, %c0_2] : memref<3x32xbf16, #tpu.memory_space<vmem>>, vector<3x32xbf16>
    %cst = arith.constant dense<0.000000e+00> : vector<64x3xf32>
    %3 = tpu.matmul %1, %2, %cst {dimension_numbers = #tpu.dot_dimension_numbers<[1], [1], [0], [0], [0, 0, 1, 0], [], []>} : vector<64x32xbf16>, vector<3x32xbf16>, vector<64x3xf32> -> vector<64x3xf32>
    %c0_3 = arith.constant 0 : index
    %c0_4 = arith.constant 0 : index
    %4 = vector.load %arg3[%c0_3, %c0_4] : memref<1x3xf32, #tpu.memory_space<vmem>>, vector<1x3xf32>
    %5 = vector.broadcast %4 : vector<1x3xf32> to vector<64x3xf32>
    %6 = arith.addf %3, %5 : vector<64x3xf32>
    %c0_5 = arith.constant 0 : index
    %c0_6 = arith.constant 0 : index
    %7 = vector.load %arg4[%c0_5, %c0_6] : memref<64x3xf32, #tpu.memory_space<vmem>>, vector<64x3xf32>
    tpu.vector_store %arg4[%c0_5, %c0_6], %6 {strides = array<i32>} : memref<64x3xf32, #tpu.memory_space<vmem>>, vector<64x3xf32>,
    return
  }
  func.func @transform_0(%arg0: i32) -> (i32, i32) {
    %c0_i32 = arith.constant 0 : i32
    %c0_i32_0 = arith.constant 0 : i32
    return %arg0, %c0_i32 : i32, i32
  }
  func.func @transform_1(%arg0: i32) -> (i32, i32) {
    %c0_i32 = arith.constant 0 : i32
    %c0_i32_0 = arith.constant 0 : i32
    %c0_i32_1 = arith.constant 0 : i32
    return %c0_i32, %c0_i32_0 : i32, i32
  }
  func.func @transform_2(%arg0: i32) -> (i32, i32) {
    %c0_i32 = arith.constant 0 : i32
    %c0_i32_0 = arith.constant 0 : i32
    %c0_i32_1 = arith.constant 0 : i32
    return %c0_i32, %c0_i32_0 : i32, i32
  }
  func.func @transform_3(%arg0: i32) -> (i32, i32) {
    %c0_i32 = arith.constant 0 : i32
    %c0_i32_0 = arith.constant 0 : i32
    return %arg0, %c0_i32 : i32, i32
  }
}

</mosaic_0001>

<bundles_post_ra>
// kernel: tile.13
= control target key start
LH: loop header
LB: loop body
LE: loop exit
PB: predicated region body
PF: predicated region fallthrough
CT: control target
= control target key end

     0   :  { %s442_s0 = inlined_call_operand.vmem [shape: f32[8,8], index: 0, kind: input, shape index: {}]   ;;  %s443_s1 = inlined_call_operand.vmem [shape: f32[8,8,8,8], index: 1, kind: output, shape index: {}]  }
   0x1   :  { %v4_v0 = vld [vmem:[%s442_s0] ss:$0 sm:$0xff]  ;;  %v153_v1 = vld [vmem:[%s442_s0 + $0x1] ss:$0 sm:$0xff]  ;;  %v162_v2 = vld [vmem:[%s442_s0 + $0x2] ss:$0 sm:$0xff] }
   0x2   :  { %5 = vst [vmem:[%s443_s1] sm:$0xff] %v4_v0  ;;  %146 = vst [vmem:[%s443_s1 + $0x40] sm:$0xff] %v4_v0  ;;  %v171_v3 = vld [vmem:[%s442_s0 + $0x3] ss:$0 sm:$0xff]  ;;  %v180_v4 = vld [vmem:[%s442_s0 + $0x4] ss:$0 sm:$0xff] }
   0x3   :  { %147 = vst [vmem:[%s443_s1 + $0x80] sm:$0xff] %v4_v0  ;;  %148 = vst [vmem:[%s443_s1 + $0xc0] sm:$0xff] %v4_v0  ;;  %v189_v5 = vld [vmem:[%s442_s0 + $0x5] ss:$0 sm:$0xff]  ;;  %v198_v6 = vld [vmem:[%s442_s0 + $0x6] ss:$0 sm:$0xff] }
   0x4   :  { %149 = vst [vmem:[%s443_s1 + $0x100] sm:$0xff] %v4_v0  ;;  %150 = vst [vmem:[%s443_s1 + $0x140] sm:$0xff] %v4_v0  ;;  %v207_v7 = vld [vmem:[%s442_s0 + $0x7] ss:$0 sm:$0xff] }
   0x5   :  { %151 = vst [vmem:[%s443_s1 + $0x180] sm:$0xff] %v4_v0  ;;  %152 = vst [vmem:[%s443_s1 + $0x1c0] sm:$0xff] %v4_v0 }
   0x6   :  { %154 = vst [vmem:[%s443_s1 + $0x8] sm:$0xff] %v153_v1  ;;  %155 = vst [vmem:[%s443_s1 + $0x48] sm:$0xff] %v153_v1 }
   0x7   :  { %156 = vst [vmem:[%s443_s1 + $0x88] sm:$0xff] %v153_v1  ;;  %157 = vst [vmem:[%s443_s1 + $0xc8] sm:$0xff] %v153_v1 }
   0x8   :  { %158 = vst [vmem:[%s443_s1 + $0x108] sm:$0xff] %v153_v1  ;;  %159 = vst [vmem:[%s443_s1 + $0x148] sm:$0xff] %v153_v1 }
   0x9   :  { %160 = vst [vmem:[%s443_s1 + $0x188] sm:$0xff] %v153_v1  ;;  %161 = vst [vmem:[%s443_s1 + $0x1c8] sm:$0xff] %v153_v1 }
   0xa   :  { %163 = vst [vmem:[%s443_s1 + $0x10] sm:$0xff] %v162_v2  ;;  %164 = vst [vmem:[%s443_s1 + $0x50] sm:$0xff] %v162_v2 }
   0xb   :  { %165 = vst [vmem:[%s443_s1 + $0x90] sm:$0xff] %v162_v2  ;;  %166 = vst [vmem:[%s443_s1 + $0xd0] sm:$0xff] %v162_v2 }
   0xc   :  { %167 = vst [vmem:[%s443_s1 + $0x110] sm:$0xff] %v162_v2  ;;  %168 = vst [vmem:[%s443_s1 + $0x150] sm:$0xff] %v162_v2 }
   0xd   :  { %169 = vst [vmem:[%s443_s1 + $0x190] sm:$0xff] %v162_v2  ;;  %170 = vst [vmem:[%s443_s1 + $0x1d0] sm:$0xff] %v162_v2 }
   0xe   :  { %172 = vst [vmem:[%s443_s1 + $0x18] sm:$0xff] %v171_v3  ;;  %173 = vst [vmem:[%s443_s1 + $0x58] sm:$0xff] %v171_v3 }
   0xf   :  { %174 = vst [vmem:[%s443_s1 + $0x98] sm:$0xff] %v171_v3  ;;  %175 = vst [vmem:[%s443_s1 + $0xd8] sm:$0xff] %v171_v3 }
  0x10   :  { %176 = vst [vmem:[%s443_s1 + $0x118] sm:$0xff] %v171_v3  ;;  %177 = vst [vmem:[%s443_s1 + $0x158] sm:$0xff] %v171_v3 }
  0x11   :  { %178 = vst [vmem:[%s443_s1 + $0x198] sm:$0xff] %v171_v3  ;;  %179 = vst [vmem:[%s443_s1 + $0x1d8] sm:$0xff] %v171_v3 }
  0x12   :  { %181 = vst [vmem:[%s443_s1 + $0x20] sm:$0xff] %v180_v4  ;;  %182 = vst [vmem:[%s443_s1 + $0x60] sm:$0xff] %v180_v4 }
  0x13   :  { %183 = vst [vmem:[%s443_s1 + $0xa0] sm:$0xff] %v180_v4  ;;  %184 = vst [vmem:[%s443_s1 + $0xe0] sm:$0xff] %v180_v4 }
  0x14   :  { %185 = vst [vmem:[%s443_s1 + $0x120] sm:$0xff] %v180_v4  ;;  %186 = vst [vmem:[%s443_s1 + $0x160] sm:$0xff] %v180_v4 }
  0x15   :  { %187 = vst [vmem:[%s443_s1 + $0x1a0] sm:$0xff] %v180_v4  ;;  %188 = vst [vmem:[%s443_s1 + $0x1e0] sm:$0xff] %v180_v4 }
  0x16   :  { %190 = vst [vmem:[%s443_s1 + $0x28] sm:$0xff] %v189_v5  ;;  %191 = vst [vmem:[%s443_s1 + $0x68] sm:$0xff] %v189_v5 }
  0x17   :  { %192 = vst [vmem:[%s443_s1 + $0xa8] sm:$0xff] %v189_v5  ;;  %193 = vst [vmem:[%s443_s1 + $0xe8] sm:$0xff] %v189_v5 }
  0x18   :  { %194 = vst [vmem:[%s443_s1 + $0x128] sm:$0xff] %v189_v5  ;;  %195 = vst [vmem:[%s443_s1 + $0x168] sm:$0xff] %v189_v5 }
  0x19   :  { %196 = vst [vmem:[%s443_s1 + $0x1a8] sm:$0xff] %v189_v5  ;;  %197 = vst [vmem:[%s443_s1 + $0x1e8] sm:$0xff] %v189_v5 }
  0x1a   :  { %199 = vst [vmem:[%s443_s1 + $0x30] sm:$0xff] %v198_v6  ;;  %200 = vst [vmem:[%s443_s1 + $0x70] sm:$0xff] %v198_v6 }
  0x1b   :  { %201 = vst [vmem:[%s443_s1 + $0xb0] sm:$0xff] %v198_v6  ;;  %202 = vst [vmem:[%s443_s1 + $0xf0] sm:$0xff] %v198_v6 }
  0x1c   :  { %203 = vst [vmem:[%s443_s1 + $0x130] sm:$0xff] %v198_v6  ;;  %204 = vst [vmem:[%s443_s1 + $0x170] sm:$0xff] %v198_v6 }
  0x1d   :  { %205 = vst [vmem:[%s443_s1 + $0x1b0] sm:$0xff] %v198_v6  ;;  %206 = vst [vmem:[%s443_s1 + $0x1f0] sm:$0xff] %v198_v6 }
  0x1e   :  { %208 = vst [vmem:[%s443_s1 + $0x38] sm:$0xff] %v207_v7  ;;  %209 = vst [vmem:[%s443_s1 + $0x78] sm:$0xff] %v207_v7 }
  0x1f   :  { %210 = vst [vmem:[%s443_s1 + $0xb8] sm:$0xff] %v207_v7  ;;  %211 = vst [vmem:[%s443_s1 + $0xf8] sm:$0xff] %v207_v7 }
  0x20   :  { %212 = vst [vmem:[%s443_s1 + $0x138] sm:$0xff] %v207_v7  ;;  %213 = vst [vmem:[%s443_s1 + $0x178] sm:$0xff] %v207_v7 }
  0x21   :  { %214 = vst [vmem:[%s443_s1 + $0x1b8] sm:$0xff] %v207_v7  ;;  %215 = vst [vmem:[%s443_s1 + $0x1f8] sm:$0xff] %v207_v7 }

// kernel: tile.14
= control target key start
LH: loop header
LB: loop body
LE: loop exit
PB: predicated region body
PF: predicated region fallthrough
CT: control target
= control target key end

     0   :  { %vm4_vm0 = vcmask 1047556   ;;  %s869_s14 = smov 56   ;;  %s870_s26 = smov 48   ;;  %vm6_vm1 = vcmask 64512   ;;  %vm79_vm2 = vcmask 523712   ;;  %vm166_vm3 = vcmask 458112   ;;  %s1606_s0 = inlined_call_operand.vmem [shape: f32[8,8,8,8], index: 0, kind: input, shape index: {}]   ;;  %s1607_s1 = inlined_call_operand.vmem [shape: f32[64,64], index: 1, kind: output, shape index: {}]  }
   0x1   :  { %v706_v0 = vld [vmem:[%s1606_s0 + $0x47] ss:$8 sm:$0xf]   ;;  %v726_v24 = vld [vmem:[%s1606_s0 + $0x106] ss:$8 sm:$0xf]  }
   0x2   :  { %v707_v1 = vld [vmem:[%s1606_s0 + $0x47] ss:$8 sm:$0xf0]   ;;  %v727_v25 = vld [vmem:[%s1606_s0 + $0x106] ss:$8 sm:$0xf0]  }
   0x3   :  { %v97_v2 = vsel %vm4_vm0, %v707_v1, %v706_v0  ;;  %v701_v3 = vld [vmem:[%s1606_s0 + $0x7] ss:$8 sm:$0xf]   ;;  %v724_v26 = vld [vmem:[%s1606_s0 + $0x6] ss:$8 sm:$0xf]   ;;  %v173_v28 = vsel %vm4_vm0, %v727_v25, %v726_v24 }
   0x4   :  { %v702_v4 = vld [vmem:[%s1606_s0 + $0x7] ss:$8 sm:$0xf0]   ;;  %98 = vrot.lane.b32.xlu1 %v97_v2, %s869_s14  ;;  %v725_v27 = vld [vmem:[%s1606_s0 + $0x6] ss:$8 sm:$0xf0]  }
   0x5   :  { %v76_v5 = vsel %vm4_vm0, %v702_v4, %v701_v3  ;;  %v709_v6 = vld [vmem:[%s1606_s0 + $0x147] ss:$8 sm:$0xf]   ;;  %v163_v29 = vsel %vm4_vm0, %v725_v27, %v724_v26  ;;  %v732_v30 = vld [vmem:[%s1606_s0 + $0x146] ss:$8 sm:$0xf]  }
   0x6   :  { %v710_v7 = vld [vmem:[%s1606_s0 + $0x147] ss:$8 sm:$0xf0]   ;;  %77 = vrot.lane.b32.xlu0 %v76_v5, %s869_s14  ;;  %v733_v31 = vld [vmem:[%s1606_s0 + $0x146] ss:$8 sm:$0xf0]  }
   0x7   :  { %v108_v8 = vsel %vm4_vm0, %v710_v7, %v709_v6  ;;  %v703_v9 = vld [vmem:[%s1606_s0 + $0x107] ss:$8 sm:$0xf]   ;;  %v729_v32 = vld [vmem:[%s1606_s0 + $0x46] ss:$8 sm:$0xf]   ;;  %v195_v34 = vsel %vm4_vm0, %v733_v31, %v732_v30 }
   0x8   :  { %v704_v10 = vld [vmem:[%s1606_s0 + $0x107] ss:$8 sm:$0xf0]   ;;  %109 = vrot.lane.b32.xlu1 %v108_v8, %s869_s14  ;;  %v730_v33 = vld [vmem:[%s1606_s0 + $0x46] ss:$8 sm:$0xf0]  }
   0x9   :  { %v86_v11 = vsel %vm4_vm0, %v704_v10, %v703_v9  ;;  %v715_v12 = vld [vmem:[%s1606_s0 + $0x187] ss:$8 sm:$0xf]   ;;  %v184_v35 = vsel %vm4_vm0, %v730_v33, %v729_v32  ;;  %v738_v36 = vld [vmem:[%s1606_s0 + $0x186] ss:$8 sm:$0xf]  }
   0xa   :  { %v716_v13 = vld [vmem:[%s1606_s0 + $0x187] ss:$8 sm:$0xf0]   ;;  %87 = vrot.lane.b32.xlu0 %v86_v11, %s869_s14  ;;  %v739_v37 = vld [vmem:[%s1606_s0 + $0x186] ss:$8 sm:$0xf0]  }
   0xb   :  { %v712_v14 = vld [vmem:[%s1606_s0 + $0x87] ss:$8 sm:$0xf]   ;;  %v130_v16 = vsel %vm4_vm0, %v716_v13, %v715_v12  ;;  %v735_v38 = vld [vmem:[%s1606_s0 + $0x86] ss:$8 sm:$0xf]   ;;  %v217_v40 = vsel %vm4_vm0, %v739_v37, %v738_v36 }
   0xc   :  { %v713_v15 = vld [vmem:[%s1606_s0 + $0x87] ss:$8 sm:$0xf0]   ;;  %131 = vrot.lane.b32.xlu1 %v130_v16, %s869_s14  ;;  %v736_v39 = vld [vmem:[%s1606_s0 + $0x86] ss:$8 sm:$0xf0]  }
   0xd   :  { %v119_v17 = vsel %vm4_vm0, %v713_v15, %v712_v14  ;;  %v721_v18 = vld [vmem:[%s1606_s0 + $0x1c7] ss:$8 sm:$0xf]   ;;  %v206_v41 = vsel %vm4_vm0, %v736_v39, %v735_v38  ;;  %v744_v42 = vld [vmem:[%s1606_s0 + $0x1c6] ss:$8 sm:$0xf]  }
   0xe   :  { %v722_v19 = vld [vmem:[%s1606_s0 + $0x1c7] ss:$8 sm:$0xf0]   ;;  %120 = vrot.lane.b32.xlu0 %v119_v17, %s869_s14  ;;  %v745_v43 = vld [vmem:[%s1606_s0 + $0x1c6] ss:$8 sm:$0xf0]  }
   0xf   :  { %v718_v20 = vld [vmem:[%s1606_s0 + $0xc7] ss:$8 sm:$0xf]   ;;  %v152_v22 = vsel %vm4_vm0, %v722_v19, %v721_v18  ;;  %v741_v44 = vld [vmem:[%s1606_s0 + $0xc6] ss:$8 sm:$0xf]   ;;  %v239_v46 = vsel %vm4_vm0, %v745_v43, %v744_v42 }
  0x10   :  { %v719_v21 = vld [vmem:[%s1606_s0 + $0xc7] ss:$8 sm:$0xf0]   ;;  %153 = vrot.lane.b32.xlu1 %v152_v22, %s869_s14  ;;  %v742_v45 = vld [vmem:[%s1606_s0 + $0xc6] ss:$8 sm:$0xf0]  }
  0x11   :  { %v141_v23 = vsel %vm4_vm0, %v719_v21, %v718_v20  ;;  %v228_v47 = vsel %vm4_vm0, %v742_v45, %v741_v44  ;;  %v749_v48 = vld [vmem:[%s1606_s0 + $0x105] ss:$8 sm:$0xf]   ;;  %s871_s30 = smov 40   ;;  %s872_s5 = smov 32   ;;  %vm253_vm4 = vcmask 392512  }
  0x12   :  { %142 = vrot.lane.b32.xlu0 %v141_v23, %s869_s14  ;;  %v750_v49 = vld [vmem:[%s1606_s0 + $0x105] ss:$8 sm:$0xf0]   ;;  %v772_v8 = vld [vmem:[%s1606_s0 + $0x104] ss:$8 sm:$0xf]  }
  0x13   :  { %v747_v50 = vld [vmem:[%s1606_s0 + $0x5] ss:$8 sm:$0xf]   ;;  %v260_v52 = vsel %vm4_vm0, %v750_v49, %v749_v48  ;;  %v773_v9 = vld [vmem:[%s1606_s0 + $0x104] ss:$8 sm:$0xf0]  }
  0x14   :  { %174 = vrot.lane.b32.xlu1 %v173_v28, %s870_s26  ;;  %v748_v51 = vld [vmem:[%s1606_s0 + $0x5] ss:$8 sm:$0xf0]   ;;  %v770_v10 = vld [vmem:[%s1606_s0 + $0x4] ss:$8 sm:$0xf]   ;;  %v347_v12 = vsel %vm4_vm0, %v773_v9, %v772_v8 }
  0x15   :  { %v250_v53 = vsel %vm4_vm0, %v748_v51, %v747_v50  ;;  %v755_v54 = vld [vmem:[%s1606_s0 + $0x145] ss:$8 sm:$0xf]   ;;  %v771_v11 = vld [vmem:[%s1606_s0 + $0x4] ss:$8 sm:$0xf0]  }
  0x16   :  { %164 = vrot.lane.b32.xlu0 %v163_v29, %s870_s26  ;;  %v756_v55 = vld [vmem:[%s1606_s0 + $0x145] ss:$8 sm:$0xf0]   ;;  %v337_v13 = vsel %vm4_vm0, %v771_v11, %v770_v10  ;;  %v778_v14 = vld [vmem:[%s1606_s0 + $0x144] ss:$8 sm:$0xf]  }
  0x17   :  { %v752_v56 = vld [vmem:[%s1606_s0 + $0x45] ss:$8 sm:$0xf]   ;;  %v282_v58 = vsel %vm4_vm0, %v756_v55, %v755_v54  ;;  %v779_v15 = vld [vmem:[%s1606_s0 + $0x144] ss:$8 sm:$0xf0]  }
  0x18   :  { %196 = vrot.lane.b32.xlu1 %v195_v34, %s870_s26  ;;  %v753_v57 = vld [vmem:[%s1606_s0 + $0x45] ss:$8 sm:$0xf0]   ;;  %v775_v16 = vld [vmem:[%s1606_s0 + $0x44] ss:$8 sm:$0xf]   ;;  %v369_v18 = vsel %vm4_vm0, %v779_v15, %v778_v14 }
  0x19   :  { %v271_v59 = vsel %vm4_vm0, %v753_v57, %v752_v56  ;;  %v761_v60 = vld [vmem:[%s1606_s0 + $0x185] ss:$8 sm:$0xf]   ;;  %v776_v17 = vld [vmem:[%s1606_s0 + $0x44] ss:$8 sm:$0xf0]  }
  0x1a   :  { %185 = vrot.lane.b32.xlu0 %v184_v35, %s870_s26  ;;  %v762_v61 = vld [vmem:[%s1606_s0 + $0x185] ss:$8 sm:$0xf0]   ;;  %v358_v19 = vsel %vm4_vm0, %v776_v17, %v775_v16  ;;  %v784_v20 = vld [vmem:[%s1606_s0 + $0x184] ss:$8 sm:$0xf]  }
  0x1b   :  { %v758_v62 = vld [vmem:[%s1606_s0 + $0x85] ss:$8 sm:$0xf]   ;;  %v304_v0 = vsel %vm4_vm0, %v762_v61, %v761_v60  ;;  %v785_v21 = vld [vmem:[%s1606_s0 + $0x184] ss:$8 sm:$0xf0]  }
  0x1c   :  { %218 = vrot.lane.b32.xlu1 %v217_v40, %s870_s26  ;;  %v759_v63 = vld [vmem:[%s1606_s0 + $0x85] ss:$8 sm:$0xf0]   ;;  %v781_v22 = vld [vmem:[%s1606_s0 + $0x84] ss:$8 sm:$0xf]   ;;  %v391_v24 = vsel %vm4_vm0, %v785_v21, %v784_v20 }
  0x1d   :  { %v293_v1 = vsel %vm4_vm0, %v759_v63, %v758_v62  ;;  %v767_v2 = vld [vmem:[%s1606_s0 + $0x1c5] ss:$8 sm:$0xf]   ;;  %v782_v23 = vld [vmem:[%s1606_s0 + $0x84] ss:$8 sm:$0xf0]  }
  0x1e   :  { %207 = vrot.lane.b32.xlu0 %v206_v41, %s870_s26  ;;  %v768_v3 = vld [vmem:[%s1606_s0 + $0x1c5] ss:$8 sm:$0xf0]   ;;  %v790_v25 = vld [vmem:[%s1606_s0 + $0x1c4] ss:$8 sm:$0xf]   ;;  %v380_v27 = vsel %vm4_vm0, %v782_v23, %v781_v22 }
  0x1f   :  { %v764_v4 = vld [vmem:[%s1606_s0 + $0xc5] ss:$8 sm:$0xf]   ;;  %v326_v6 = vsel %vm4_vm0, %v768_v3, %v767_v2  ;;  %v791_v26 = vld [vmem:[%s1606_s0 + $0x1c4] ss:$8 sm:$0xf0]  }
  0x20   :  { %240 = vrot.lane.b32.xlu1 %v239_v46, %s870_s26  ;;  %v765_v5 = vld [vmem:[%s1606_s0 + $0xc5] ss:$8 sm:$0xf0]   ;;  %v787_v28 = vld [vmem:[%s1606_s0 + $0xc4] ss:$8 sm:$0xf]   ;;  %v413_v35 = vsel %vm4_vm0, %v791_v26, %v790_v25 }
  0x21   :  { %v315_v7 = vsel %vm4_vm0, %v765_v5, %v764_v4  ;;  %v788_v29 = vld [vmem:[%s1606_s0 + $0xc4] ss:$8 sm:$0xf0]   ;;  %v680_v30 = vld [vmem:[%s1606_s0 + $0x40] ss:$8 sm:$0xf]  }
  0x22   :  { %229 = vrot.lane.b32.xlu0 %v228_v47, %s870_s26  ;;  %v795_v31 = vld [vmem:[%s1606_s0 + $0x103] ss:$8 sm:$0xf]   ;;  %v681_v33 = vld [vmem:[%s1606_s0 + $0x40] ss:$8 sm:$0xf0]   ;;  %v402_v41 = vsel %vm4_vm0, %v788_v29, %v787_v28 }
  0x23   :  { %v796_v32 = vld [vmem:[%s1606_s0 + $0x103] ss:$8 sm:$0xf0]   ;;  %v2_v34 = vld [vmem:[%s1606_s0] ss:$8 sm:$0xf]   ;;  %v13_v38 = vsel %vm4_vm0, %v681_v33, %v680_v30 }
  0x24   :  { %261 = vrot.lane.b32.xlu1 %v260_v52, %s871_s30  ;;  %v793_v36 = vld [vmem:[%s1606_s0 + $0x3] ss:$8 sm:$0xf]   ;;  %v3_v39 = vld [vmem:[%s1606_s0] ss:$8 sm:$0xf0]  }
  0x25   :  { %v794_v37 = vld [vmem:[%s1606_s0 + $0x3] ss:$8 sm:$0xf0]   ;;  %v692_v40 = vld [vmem:[%s1606_s0 + $0x140] ss:$8 sm:$0xf]   ;;  %v5_v42 = vsel %vm4_vm0, %v3_v39, %v2_v34 }
  0x26   :  { %251 = vrot.lane.b32.xlu0 %v250_v53, %s871_s30  ;;  %682 = vst.msk [vmem:[%s1607_s1 + $0x8] sm:$0xff] %vm6_vm1, %v13_v38   ;;  %v693_v43 = vld [vmem:[%s1606_s0 + $0x140] ss:$8 sm:$0xf0]   ;;  %7 = vst.msk [vmem:[%s1607_s1] sm:$0xff] %vm6_vm1, %v5_v42   ;;  %v434_v53 = vsel %vm4_vm0, %v796_v32, %v795_v31  ;;  %s873_s25 = smov 24  }
  0x27   :  { %v689_v44 = vld [vmem:[%s1606_s0 + $0x100] ss:$8 sm:$0xf]   ;;  %v49_v45 = vsel %vm4_vm0, %v693_v43, %v692_v40  ;;  %v801_v48 = vld [vmem:[%s1606_s0 + $0x143] ss:$8 sm:$0xf]  }
  0x28   :  { %283 = vrot.lane.b32.xlu1 %v282_v58, %s871_s30  ;;  %v690_v46 = vld [vmem:[%s1606_s0 + $0x100] ss:$8 sm:$0xf0]   ;;  %v802_v49 = vld [vmem:[%s1606_s0 + $0x143] ss:$8 sm:$0xf0]   ;;  %v424_v58 = vsel %vm4_vm0, %v794_v37, %v793_v36 }
  0x29   :  { %v695_v47 = vld [vmem:[%s1606_s0 + $0x180] ss:$8 sm:$0xf]   ;;  %694 = vst.msk [vmem:[%s1607_s1 + $0x28] sm:$0xff] %vm6_vm1, %v49_v45   ;;  %v40_v50 = vsel %vm4_vm0, %v690_v46, %v689_v44  ;;  %v456_v2 = vsel %vm4_vm0, %v802_v49, %v801_v48  ;;  %s874_s4 = smov 16   ;;  %s875_s8 = smov 8  }
  0x2a   :  { %272 = vrot.lane.b32.xlu0 %v271_v59, %s871_s30  ;;  %v696_v51 = vld [vmem:[%s1606_s0 + $0x180] ss:$8 sm:$0xf0]   ;;  %v798_v54 = vld [vmem:[%s1606_s0 + $0x43] ss:$8 sm:$0xf]  }
  0x2b   :  { %v683_v52 = vld [vmem:[%s1606_s0 + $0x80] ss:$8 sm:$0xf]   ;;  %691 = vst.msk [vmem:[%s1607_s1 + $0x20] sm:$0xff] %vm6_vm1, %v40_v50   ;;  %v58_v55 = vsel %vm4_vm0, %v696_v51, %v695_v47  ;;  %vm340_vm5 = vcmask 326912   ;;  %vm427_vm6 = vcmask 261312  }
  0x2c   :  { %305 = vrot.lane.b32.xlu1 %v304_v0, %s871_s30  ;;  %v684_v56 = vld [vmem:[%s1606_s0 + $0x80] ss:$8 sm:$0xf0]   ;;  %697 = vst.msk [vmem:[%s1607_s1 + $0x30] sm:$0xff] %vm6_vm1, %v58_v55   ;;  %vm514_vm7 = vcmask 195712   ;;  %vm601_vm8 = vcmask 130112  }
  0x2d   :  { %v698_v57 = vld [vmem:[%s1606_s0 + $0x1c0] ss:$8 sm:$0xf]   ;;  %v22_v59 = vsel %vm4_vm0, %v684_v56, %v683_v52  ;;  %v799_v62 = vld [vmem:[%s1606_s0 + $0x43] ss:$8 sm:$0xf0]  }
  0x2e   :  { %294 = vrot.lane.b32.xlu0 %v293_v1, %s871_s30  ;;  %v699_v60 = vld [vmem:[%s1606_s0 + $0x1c0] ss:$8 sm:$0xf0]   ;;  %685 = vst.msk [vmem:[%s1607_s1 + $0x10] sm:$0xff] %vm6_vm1, %v22_v59   ;;  %v445_v3 = vsel %vm4_vm0, %v799_v62, %v798_v54 }
  0x2f   :  { %v686_v61 = vld [vmem:[%s1606_s0 + $0xc0] ss:$8 sm:$0xf]   ;;  %v67_v63 = vsel %vm4_vm0, %v699_v60, %v698_v57  ;;  %v807_v4 = vld [vmem:[%s1606_s0 + $0x183] ss:$8 sm:$0xf]  }
  0x30   :  { %327 = vrot.lane.b32.xlu1 %v326_v6, %s871_s30  ;;  %v687_v0 = vld [vmem:[%s1606_s0 + $0xc0] ss:$8 sm:$0xf0]   ;;  %700 = vst.msk [vmem:[%s1607_s1 + $0x38] sm:$0xff] %vm6_vm1, %v67_v63  }
  0x31   :  { %v31_v1 = vsel %vm4_vm0, %v687_v0, %v686_v61  ;;  %v808_v5 = vld [vmem:[%s1606_s0 + $0x183] ss:$8 sm:$0xf0]   ;;  %v818_v16 = vld [vmem:[%s1606_s0 + $0x102] ss:$8 sm:$0xf]  }
  0x32   :  { %316 = vrot.lane.b32.xlu0 %v315_v7, %s871_s30  ;;  %688 = vst.msk [vmem:[%s1607_s1 + $0x18] sm:$0xff] %vm6_vm1, %v31_v1   ;;  %v804_v6 = vld [vmem:[%s1606_s0 + $0x83] ss:$8 sm:$0xf]   ;;  %v478_v8 = vsel %vm4_vm0, %v808_v5, %v807_v4 }
  0x33   :  { %v805_v7 = vld [vmem:[%s1606_s0 + $0x83] ss:$8 sm:$0xf0]   ;;  %v819_v17 = vld [vmem:[%s1606_s0 + $0x102] ss:$8 sm:$0xf0]  }
  0x34   :  { %348 = vrot.lane.b32.xlu1 %v347_v12, %s872_s5  ;;  %v467_v9 = vsel %vm4_vm0, %v805_v7, %v804_v6  ;;  %v813_v10 = vld [vmem:[%s1606_s0 + $0x1c3] ss:$8 sm:$0xf]   ;;  %v521_v20 = vsel %vm4_vm0, %v819_v17, %v818_v16  ;;  %v824_v22 = vld [vmem:[%s1606_s0 + $0x142] ss:$8 sm:$0xf]  }
  0x35   :  { %v814_v11 = vld [vmem:[%s1606_s0 + $0x1c3] ss:$8 sm:$0xf0]   ;;  %v825_v23 = vld [vmem:[%s1606_s0 + $0x142] ss:$8 sm:$0xf0]  }
  0x36   :  { %338 = vrot.lane.b32.xlu0 %v337_v13, %s872_s5  ;;  %v810_v12 = vld [vmem:[%s1606_s0 + $0xc3] ss:$8 sm:$0xf]   ;;  %v500_v14 = vsel %vm4_vm0, %v814_v11, %v813_v10  ;;  %v822_v25 = vld [vmem:[%s1606_s0 + $0x42] ss:$8 sm:$0xf0]   ;;  %v543_v26 = vsel %vm4_vm0, %v825_v23, %v824_v22 }
  0x37   :  { %v811_v13 = vld [vmem:[%s1606_s0 + $0xc3] ss:$8 sm:$0xf0]   ;;  %v830_v28 = vld [vmem:[%s1606_s0 + $0x182] ss:$8 sm:$0xf]  }
  0x38   :  { %370 = vrot.lane.b32.xlu1 %v369_v18, %s872_s5  ;;  %v489_v15 = vsel %vm4_vm0, %v811_v13, %v810_v12  ;;  %v816_v18 = vld [vmem:[%s1606_s0 + $0x2] ss:$8 sm:$0xf]   ;;  %v841_v40 = vld [vmem:[%s1606_s0 + $0x101] ss:$8 sm:$0xf]  }
  0x39   :  { %v831_v29 = vld [vmem:[%s1606_s0 + $0x182] ss:$8 sm:$0xf0]   ;;  %v839_v42 = vld [vmem:[%s1606_s0 + $0x1] ss:$8 sm:$0xf]  }
  0x3a   :  { %359 = vrot.lane.b32.xlu0 %v358_v19, %s872_s5  ;;  %v817_v19 = vld [vmem:[%s1606_s0 + $0x2] ss:$8 sm:$0xf0]   ;;  %v565_v32 = vsel %vm4_vm0, %v831_v29, %v830_v28  ;;  %v840_v43 = vld [vmem:[%s1606_s0 + $0x1] ss:$8 sm:$0xf0]  }
  0x3b   :  { %v511_v21 = vsel %vm4_vm0, %v817_v19, %v816_v18  ;;  %v827_v30 = vld [vmem:[%s1606_s0 + $0x82] ss:$8 sm:$0xf]   ;;  %v598_v45 = vsel %vm4_vm0, %v840_v43, %v839_v42  ;;  %v847_v46 = vld [vmem:[%s1606_s0 + $0x141] ss:$8 sm:$0xf]  }
  0x3c   :  { %392 = vrot.lane.b32.xlu1 %v391_v24, %s872_s5  ;;  %v821_v24 = vld [vmem:[%s1606_s0 + $0x42] ss:$8 sm:$0xf]   ;;  %v848_v47 = vld [vmem:[%s1606_s0 + $0x141] ss:$8 sm:$0xf0]  }
  0x3d   :  { %v828_v31 = vld [vmem:[%s1606_s0 + $0x82] ss:$8 sm:$0xf0]   ;;  %v844_v48 = vld [vmem:[%s1606_s0 + $0x41] ss:$8 sm:$0xf]   ;;  %v630_v50 = vsel %vm4_vm0, %v848_v47, %v847_v46 }
  0x3e   :  { %381 = vrot.lane.b32.xlu0 %v380_v27, %s872_s5  ;;  %v532_v27 = vsel %vm4_vm0, %v822_v25, %v821_v24  ;;  %v554_v33 = vsel %vm4_vm0, %v828_v31, %v827_v30  ;;  %v836_v34 = vld [vmem:[%s1606_s0 + $0x1c2] ss:$8 sm:$0xf]   ;;  %v845_v49 = vld [vmem:[%s1606_s0 + $0x41] ss:$8 sm:$0xf0]  }
  0x3f   :  { %v833_v36 = vld [vmem:[%s1606_s0 + $0xc2] ss:$8 sm:$0xf]   ;;  %v619_v51 = vsel %vm4_vm0, %v845_v49, %v844_v48  ;;  %v853_v52 = vld [vmem:[%s1606_s0 + $0x181] ss:$8 sm:$0xf]  }
  0x40   :  { %414 = vrot.lane.b32.xlu1 %v413_v35, %s872_s5  ;;  %v837_v35 = vld [vmem:[%s1606_s0 + $0x1c2] ss:$8 sm:$0xf0]   ;;  %v850_v54 = vld [vmem:[%s1606_s0 + $0x81] ss:$8 sm:$0xf]  }
  0x41   :  { %v834_v37 = vld [vmem:[%s1606_s0 + $0xc2] ss:$8 sm:$0xf0]   ;;  %v587_v38 = vsel %vm4_vm0, %v837_v35, %v836_v34  ;;  %v851_v55 = vld [vmem:[%s1606_s0 + $0x81] ss:$8 sm:$0xf0]  }
  0x42   :  { %403 = vrot.lane.b32.xlu0 %v402_v41, %s872_s5  ;;  %v576_v39 = vsel %vm4_vm0, %v834_v37, %v833_v36  ;;  %v842_v41 = vld [vmem:[%s1606_s0 + $0x101] ss:$8 sm:$0xf0]   ;;  %v641_v57 = vsel %vm4_vm0, %v851_v55, %v850_v54 }
  0x43   :  { %v608_v44 = vsel %vm4_vm0, %v842_v41, %v841_v40  ;;  %v860_v59 = vld [vmem:[%s1606_s0 + $0x1c1] ss:$8 sm:$0xf0]  }
  0x44   :  { %435 = vrot.lane.b32.xlu1 %v434_v53, %s873_s25  ;;  %v854_v53 = vld [vmem:[%s1606_s0 + $0x181] ss:$8 sm:$0xf0]  }
  0x45   :  { %v652_v56 = vsel %vm4_vm0, %v854_v53, %v853_v52  ;;  %v856_v60 = vld [vmem:[%s1606_s0 + $0xc1] ss:$8 sm:$0xf]  }
  0x46   :  { %425 = vrot.lane.b32.xlu0 %v424_v58, %s873_s25  ;;  %v859_v58 = vld [vmem:[%s1606_s0 + $0x1c1] ss:$8 sm:$0xf]  }
  0x47   :  { %v857_v61 = vld [vmem:[%s1606_s0 + $0xc1] ss:$8 sm:$0xf0]   ;;  %v674_v62 = vsel %vm4_vm0, %v860_v59, %v859_v58 }
  0x48   :  { %457 = vrot.lane.b32.xlu1 %v456_v2, %s873_s25  ;;  %v663_v63 = vsel %vm4_vm0, %v857_v61, %v856_v60 }
  0x4a   :  { %446 = vrot.lane.b32.xlu0 %v445_v3, %s873_s25 }
  0x4c   :  { %479 = vrot.lane.b32.xlu1 %v478_v8, %s873_s25 }
  0x4e   :  { %468 = vrot.lane.b32.xlu0 %v467_v9, %s873_s25 }
  0x50   :  { %501 = vrot.lane.b32.xlu1 %v500_v14, %s873_s25 }
  0x52   :  { %490 = vrot.lane.b32.xlu0 %v489_v15, %s873_s25 }
  0x54   :  { %522 = vrot.lane.b32.xlu1 %v521_v20, %s874_s4 }
  0x56   :  { %512 = vrot.lane.b32.xlu0 %v511_v21, %s874_s4 }
  0x58   :  { %544 = vrot.lane.b32.xlu1 %v543_v26, %s874_s4 }
  0x5a   :  { %533 = vrot.lane.b32.xlu0 %v532_v27, %s874_s4 }
  0x5c   :  { %566 = vrot.lane.b32.xlu1 %v565_v32, %s874_s4 }
  0x5e   :  { %555 = vrot.lane.b32.xlu0 %v554_v33, %s874_s4 }
  0x60   :  { %588 = vrot.lane.b32.xlu1 %v587_v38, %s874_s4 }
  0x62   :  { %577 = vrot.lane.b32.xlu0 %v576_v39, %s874_s4 }
  0x64   :  { %609 = vrot.lane.b32.xlu1 %v608_v44, %s875_s8 }
  0x66   :  { %599 = vrot.lane.b32.xlu0 %v598_v45, %s875_s8 }
  0x68   :  { %631 = vrot.lane.b32.xlu1 %v630_v50, %s875_s8 }
  0x6a   :  { %620 = vrot.lane.b32.xlu0 %v619_v51, %s875_s8 }
  0x6c   :  { %653 = vrot.lane.b32.xlu1 %v652_v56, %s875_s8 }
  0x6e   :  { %642 = vrot.lane.b32.xlu0 %v641_v57, %s875_s8 }
  0x70   :  { %675 = vrot.lane.b32.xlu1 %v674_v62, %s875_s8 }
  0x72   :  { %664 = vrot.lane.b32.xlu0 %v663_v63, %s875_s8 }
  0x76   :  { %v99_v0 = vpop.permute.xlu1 %98  }
  0x77   :  { %708 = vst.msk [vmem:[%s1607_s1 + $0x8] sm:$0xff] %vm79_vm2, %v99_v0  }
  0x78   :  { %v78_v1 = vpop.permute.xlu0 %77  }
  0x79   :  { %80 = vst.msk [vmem:[%s1607_s1] sm:$0xff] %vm79_vm2, %v78_v1  }
  0x7a   :  { %v110_v2 = vpop.permute.xlu1 %109  }
  0x7b   :  { %711 = vst.msk [vmem:[%s1607_s1 + $0x28] sm:$0xff] %vm79_vm2, %v110_v2  }
  0x7c   :  { %v88_v3 = vpop.permute.xlu0 %87  }
  0x7d   :  { %705 = vst.msk [vmem:[%s1607_s1 + $0x20] sm:$0xff] %vm79_vm2, %v88_v3  }
  0x7e   :  { %v132_v4 = vpop.permute.xlu1 %131  }
  0x7f   :  { %717 = vst.msk [vmem:[%s1607_s1 + $0x30] sm:$0xff] %vm79_vm2, %v132_v4  }
  0x80   :  { %v121_v5 = vpop.permute.xlu0 %120  }
  0x81   :  { %714 = vst.msk [vmem:[%s1607_s1 + $0x10] sm:$0xff] %vm79_vm2, %v121_v5  }
  0x82   :  { %v154_v6 = vpop.permute.xlu1 %153  }
  0x83   :  { %723 = vst.msk [vmem:[%s1607_s1 + $0x38] sm:$0xff] %vm79_vm2, %v154_v6  }
  0x84   :  { %v143_v7 = vpop.permute.xlu0 %142  }
  0x85   :  { %720 = vst.msk [vmem:[%s1607_s1 + $0x18] sm:$0xff] %vm79_vm2, %v143_v7  }
  0x86   :  { %v175_v8 = vpop.permute.xlu1 %174  }
  0x87   :  { %728 = vst.msk [vmem:[%s1607_s1 + $0x20] sm:$0xff] %vm166_vm3, %v175_v8  }
  0x88   :  { %v165_v9 = vpop.permute.xlu0 %164  }
  0x89   :  { %167 = vst.msk [vmem:[%s1607_s1] sm:$0xff] %vm166_vm3, %v165_v9  }
  0x8a   :  { %v197_v10 = vpop.permute.xlu1 %196  }
  0x8b   :  { %734 = vst.msk [vmem:[%s1607_s1 + $0x28] sm:$0xff] %vm166_vm3, %v197_v10  }
  0x8c   :  { %v186_v11 = vpop.permute.xlu0 %185  }
  0x8d   :  { %731 = vst.msk [vmem:[%s1607_s1 + $0x8] sm:$0xff] %vm166_vm3, %v186_v11  }
  0x8e   :  { %v219_v12 = vpop.permute.xlu1 %218  }
  0x8f   :  { %740 = vst.msk [vmem:[%s1607_s1 + $0x30] sm:$0xff] %vm166_vm3, %v219_v12  }
  0x90   :  { %v208_v13 = vpop.permute.xlu0 %207  }
  0x91   :  { %737 = vst.msk [vmem:[%s1607_s1 + $0x10] sm:$0xff] %vm166_vm3, %v208_v13  }
  0x92   :  { %v241_v14 = vpop.permute.xlu1 %240  }
  0x93   :  { %746 = vst.msk [vmem:[%s1607_s1 + $0x38] sm:$0xff] %vm166_vm3, %v241_v14  }
  0x94   :  { %v230_v15 = vpop.permute.xlu0 %229  }
  0x95   :  { %743 = vst.msk [vmem:[%s1607_s1 + $0x18] sm:$0xff] %vm166_vm3, %v230_v15  }
  0x96   :  { %v262_v16 = vpop.permute.xlu1 %261  }
  0x97   :  { %751 = vst.msk [vmem:[%s1607_s1 + $0x20] sm:$0xff] %vm253_vm4, %v262_v16  }
  0x98   :  { %v252_v17 = vpop.permute.xlu0 %251  }
  0x99   :  { %254 = vst.msk [vmem:[%s1607_s1] sm:$0xff] %vm253_vm4, %v252_v17  }
  0x9a   :  { %v284_v18 = vpop.permute.xlu1 %283  }
  0x9b   :  { %757 = vst.msk [vmem:[%s1607_s1 + $0x28] sm:$0xff] %vm253_vm4, %v284_v18  }
  0x9c   :  { %v273_v19 = vpop.permute.xlu0 %272  }
  0x9d   :  { %754 = vst.msk [vmem:[%s1607_s1 + $0x8] sm:$0xff] %vm253_vm4, %v273_v19  }
  0x9e   :  { %v306_v20 = vpop.permute.xlu1 %305  }
  0x9f   :  { %763 = vst.msk [vmem:[%s1607_s1 + $0x30] sm:$0xff] %vm253_vm4, %v306_v20  }
  0xa0   :  { %v295_v21 = vpop.permute.xlu0 %294  }
  0xa1   :  { %760 = vst.msk [vmem:[%s1607_s1 + $0x10] sm:$0xff] %vm253_vm4, %v295_v21  }
  0xa2   :  { %v328_v22 = vpop.permute.xlu1 %327  }
  0xa3   :  { %769 = vst.msk [vmem:[%s1607_s1 + $0x38] sm:$0xff] %vm253_vm4, %v328_v22  }
  0xa4   :  { %v317_v23 = vpop.permute.xlu0 %316  }
  0xa5   :  { %766 = vst.msk [vmem:[%s1607_s1 + $0x18] sm:$0xff] %vm253_vm4, %v317_v23  }
  0xa6   :  { %v349_v24 = vpop.permute.xlu1 %348  }
  0xa7   :  { %774 = vst.msk [vmem:[%s1607_s1 + $0x20] sm:$0xff] %vm340_vm5, %v349_v24  }
  0xa8   :  { %v339_v25 = vpop.permute.xlu0 %338  }
  0xa9   :  { %341 = vst.msk [vmem:[%s1607_s1] sm:$0xff] %vm340_vm5, %v339_v25  }
  0xaa   :  { %v371_v26 = vpop.permute.xlu1 %370  }
  0xab   :  { %780 = vst.msk [vmem:[%s1607_s1 + $0x28] sm:$0xff] %vm340_vm5, %v371_v26  }
  0xac   :  { %v360_v27 = vpop.permute.xlu0 %359  }
  0xad   :  { %777 = vst.msk [vmem:[%s1607_s1 + $0x8] sm:$0xff] %vm340_vm5, %v360_v27  }
  0xae   :  { %v393_v28 = vpop.permute.xlu1 %392  }
  0xaf   :  { %786 = vst.msk [vmem:[%s1607_s1 + $0x30] sm:$0xff] %vm340_vm5, %v393_v28  }
  0xb0   :  { %v382_v29 = vpop.permute.xlu0 %381  }
  0xb1   :  { %783 = vst.msk [vmem:[%s1607_s1 + $0x10] sm:$0xff] %vm340_vm5, %v382_v29  }
  0xb2   :  { %v415_v30 = vpop.permute.xlu1 %414  }
  0xb3   :  { %792 = vst.msk [vmem:[%s1607_s1 + $0x38] sm:$0xff] %vm340_vm5, %v415_v30  }
  0xb4   :  { %v404_v31 = vpop.permute.xlu0 %403  }
  0xb5   :  { %789 = vst.msk [vmem:[%s1607_s1 + $0x18] sm:$0xff] %vm340_vm5, %v404_v31  }
  0xb6   :  { %v436_v32 = vpop.permute.xlu1 %435  }
  0xb7   :  { %797 = vst.msk [vmem:[%s1607_s1 + $0x20] sm:$0xff] %vm427_vm6, %v436_v32  }
  0xb8   :  { %v426_v33 = vpop.permute.xlu0 %425  }
  0xb9   :  { %428 = vst.msk [vmem:[%s1607_s1] sm:$0xff] %vm427_vm6, %v426_v33  }
  0xba   :  { %v458_v34 = vpop.permute.xlu1 %457  }
  0xbb   :  { %803 = vst.msk [vmem:[%s1607_s1 + $0x28] sm:$0xff] %vm427_vm6, %v458_v34  }
  0xbc   :  { %v447_v35 = vpop.permute.xlu0 %446  }
  0xbd   :  { %800 = vst.msk [vmem:[%s1607_s1 + $0x8] sm:$0xff] %vm427_vm6, %v447_v35  }
  0xbe   :  { %v480_v36 = vpop.permute.xlu1 %479  }
  0xbf   :  { %809 = vst.msk [vmem:[%s1607_s1 + $0x30] sm:$0xff] %vm427_vm6, %v480_v36  }
  0xc0   :  { %v469_v37 = vpop.permute.xlu0 %468  }
  0xc1   :  { %806 = vst.msk [vmem:[%s1607_s1 + $0x10] sm:$0xff] %vm427_vm6, %v469_v37  }
  0xc2   :  { %v502_v38 = vpop.permute.xlu1 %501  }
  0xc3   :  { %815 = vst.msk [vmem:[%s1607_s1 + $0x38] sm:$0xff] %vm427_vm6, %v502_v38  }
  0xc4   :  { %v491_v39 = vpop.permute.xlu0 %490  }
  0xc5   :  { %812 = vst.msk [vmem:[%s1607_s1 + $0x18] sm:$0xff] %vm427_vm6, %v491_v39  }
  0xc6   :  { %v523_v40 = vpop.permute.xlu1 %522  }
  0xc7   :  { %820 = vst.msk [vmem:[%s1607_s1 + $0x20] sm:$0xff] %vm514_vm7, %v523_v40  }
  0xc8   :  { %v513_v41 = vpop.permute.xlu0 %512  }
  0xc9   :  { %515 = vst.msk [vmem:[%s1607_s1] sm:$0xff] %vm514_vm7, %v513_v41  }
  0xca   :  { %v545_v42 = vpop.permute.xlu1 %544  }
  0xcb   :  { %826 = vst.msk [vmem:[%s1607_s1 + $0x28] sm:$0xff] %vm514_vm7, %v545_v42  }
  0xcc   :  { %v534_v43 = vpop.permute.xlu0 %533  }
  0xcd   :  { %823 = vst.msk [vmem:[%s1607_s1 + $0x8] sm:$0xff] %vm514_vm7, %v534_v43  }
  0xce   :  { %v567_v44 = vpop.permute.xlu1 %566  }
  0xcf   :  { %832 = vst.msk [vmem:[%s1607_s1 + $0x30] sm:$0xff] %vm514_vm7, %v567_v44  }
  0xd0   :  { %v556_v45 = vpop.permute.xlu0 %555  }
  0xd1   :  { %829 = vst.msk [vmem:[%s1607_s1 + $0x10] sm:$0xff] %vm514_vm7, %v556_v45  }
  0xd2   :  { %v589_v46 = vpop.permute.xlu1 %588  }
  0xd3   :  { %838 = vst.msk [vmem:[%s1607_s1 + $0x38] sm:$0xff] %vm514_vm7, %v589_v46  }
  0xd4   :  { %v578_v47 = vpop.permute.xlu0 %577  }
  0xd5   :  { %835 = vst.msk [vmem:[%s1607_s1 + $0x18] sm:$0xff] %vm514_vm7, %v578_v47  }
  0xd6   :  { %v610_v48 = vpop.permute.xlu1 %609  }
  0xd7   :  { %843 = vst.msk [vmem:[%s1607_s1 + $0x20] sm:$0xff] %vm601_vm8, %v610_v48  }
  0xd8   :  { %v600_v49 = vpop.permute.xlu0 %599  }
  0xd9   :  { %602 = vst.msk [vmem:[%s1607_s1] sm:$0xff] %vm601_vm8, %v600_v49  }
  0xda   :  { %v632_v50 = vpop.permute.xlu1 %631  }
  0xdb   :  { %849 = vst.msk [vmem:[%s1607_s1 + $0x28] sm:$0xff] %vm601_vm8, %v632_v50  }
  0xdc   :  { %v621_v51 = vpop.permute.xlu0 %620  }
  0xdd   :  { %846 = vst.msk [vmem:[%s1607_s1 + $0x8] sm:$0xff] %vm601_vm8, %v621_v51  }
  0xde   :  { %v654_v52 = vpop.permute.xlu1 %653  }
  0xdf   :  { %855 = vst.msk [vmem:[%s1607_s1 + $0x30] sm:$0xff] %vm601_vm8, %v654_v52  }
  0xe0   :  { %v643_v53 = vpop.permute.xlu0 %642  }
  0xe1   :  { %852 = vst.msk [vmem:[%s1607_s1 + $0x10] sm:$0xff] %vm601_vm8, %v643_v53  }
  0xe2   :  { %v676_v54 = vpop.permute.xlu1 %675  }
  0xe3   :  { %861 = vst.msk [vmem:[%s1607_s1 + $0x38] sm:$0xff] %vm601_vm8, %v676_v54  }
  0xe4   :  { %v665_v55 = vpop.permute.xlu0 %664  }
  0xe5   :  { %858 = vst.msk [vmem:[%s1607_s1 + $0x18] sm:$0xff] %vm601_vm8, %v665_v55  }

// kernel: _lambda_.10
= control target key start
LH: loop header
LB: loop body
LE: loop exit
PB: predicated region body
PF: predicated region fallthrough
CT: control target
= control target key end

     0   :  { %vm48_vm0 = vcmask 48128   ;;  %vm132_vm1 = vcmask 261120   ;;  %s275_s1 = inlined_call_operand.vmem [shape: bf16[32,6], index: 1, kind: input, shape index: {}]   ;;  %s276_s0 = inlined_call_operand.vmem [shape: f32[64,6], index: 0, kind: input, shape index: {}]   ;;  %s277_s2 = inlined_call_operand.vmem [shape: f32[1,32], index: 2, kind: input, shape index: {}]   ;;  %s278_s3 = inlined_call_operand.vmem [shape: f32[64,32], index: 3, kind: output, shape index: {}]  }
   0x1   :  { %v178_v0 = vld [vmem:[%s275_s1 + $0x8] sm:$0xff]   ;;  %v179_v1 = vld [vmem:[%s275_s1] sm:$0xff]   ;;  %v17_v10 = vld [vmem:[%s276_s0 + $0x10] sm:$0xff] }
   0x2   :  { %174 = vmatprep.subr.msk.bf16.mxu0 %vm48_vm0, %v178_v0  ;;  %175 = vmatprep.subr.msk.bf16.mxu1 %vm48_vm0, %v178_v0  ;;  %v65_v2 = vsel %vm48_vm0, %v178_v0, 0  ;;  %v15_v3 = vld [vmem:[%s276_s0] sm:$0xff]  ;;  %v16_v4 = vld [vmem:[%s276_s0 + $0x8] sm:$0xff]  ;;  %v62_v9 = vsel %vm48_vm0, %v179_v1, 0  ;;  %v18_v11 = vld [vmem:[%s276_s0 + $0x18] sm:$0xff] }
   0x3   :  { %v19_v5 = vld [vmem:[%s276_s0 + $0x20] sm:$0xff]  ;;  %159 = vmatpush3.bf16.xpose.msra.mxu0 %v65_v2  ;;  %172 = vmatpush3.bf16.xpose.msra.mxu1 %v65_v2  ;;  %v23_v6 = vpack.c.bf16 %v16_v4, %v15_v3  ;;  %v20_v7 = vld [vmem:[%s276_s0 + $0x28] sm:$0xff]  ;;  %v21_v12 = vld [vmem:[%s276_s0 + $0x30] sm:$0xff]  ;;  %v24_v14 = vpack.c.bf16 %v18_v11, %v17_v10 }
   0x4   :  { %176 = vmatprep.subr.msk.bf16.mxu0 %vm48_vm0, %v179_v1  ;;  %177 = vmatprep.subr.msk.bf16.mxu1 %vm48_vm0, %v179_v1  ;;  %v25_v8 = vpack.c.bf16 %v20_v7, %v19_v5  ;;  %v22_v13 = vld [vmem:[%s276_s0 + $0x38] sm:$0xff]  ;;  %v145_v16 = vld [vmem:[%s277_s2] ss:$0 sm:$0xff] }
   0x5   :  { %162 = vmatprep.mubr.msk.bf16.mxu0 %vm48_vm0, %v23_v6  ;;  %v26_v15 = vpack.c.bf16 %v22_v13, %v21_v12 }
   0x6   :  { %166 = vmatprep.mubr.msk.bf16.mxu1 %vm48_vm0, %v25_v8 }
   0xb   :  { %161 = vmatpush3.bf16.xpose.msra.mxu0 %v62_v9  ;;  %173 = vmatpush3.bf16.xpose.msra.mxu1 %v62_v9 }
  0x12   :  { %163 = vmatmul.mubr.msk.bf16.vlgmr.msra.gmra.mxu0 %vm48_vm0, %v24_v14  ;;  %167 = vmatmul.mubr.msk.bf16.vlgmr.msra.gmra.mxu1 %vm48_vm0, %v26_v15 }
  0xd2   :  { %v164_v17 = vpop.f32.mrf.mxu0  ;;  %v168_v18 = vpop.f32.mrf.mxu1 }
  0xd3   :  { %v110_v19 = vadd.f32 %v164_v17, %v145_v16  ;;  %v126_v20 = vadd.f32 %v168_v18, %v145_v16 }
  0xd4   :  { %v101_v21 = vpop.f32.mrf.mxu0  ;;  %v117_v22 = vpop.f32.mrf.mxu1 }
  0xd5   :  { %135 = vst.msk [vmem:[%s278_s3 + $0x10] sm:$0xff] %vm132_vm1, %v110_v19  ;;  %139 = vst.msk [vmem:[%s278_s3 + $0x30] sm:$0xff] %vm132_vm1, %v126_v20  ;;  %v102_v23 = vadd.f32 %v145_v16, %v101_v21  ;;  %v118_v24 = vadd.f32 %v145_v16, %v117_v22 }
  0xd6   :  { %v165_v25 = vpop.f32.mrf.mxu0  ;;  %v169_v26 = vpop.f32.mrf.mxu1 }
  0xd7   :  { %133 = vst.msk [vmem:[%s278_s3] sm:$0xff] %vm132_vm1, %v102_v23  ;;  %137 = vst.msk [vmem:[%s278_s3 + $0x20] sm:$0xff] %vm132_vm1, %v118_v24  ;;  %v113_v27 = vadd.f32 %v165_v25, %v145_v16  ;;  %v129_v28 = vadd.f32 %v169_v26, %v145_v16 }
  0xd8   :  { %v104_v29 = vpop.f32.mrf.mxu0  ;;  %v120_v30 = vpop.f32.mrf.mxu1 }
  0xd9   :  { %136 = vst.msk [vmem:[%s278_s3 + $0x18] sm:$0xff] %vm132_vm1, %v113_v27  ;;  %140 = vst.msk [vmem:[%s278_s3 + $0x38] sm:$0xff] %vm132_vm1, %v129_v28  ;;  %v105_v31 = vadd.f32 %v145_v16, %v104_v29  ;;  %v121_v32 = vadd.f32 %v145_v16, %v120_v30 }
  0xdb   :  { %134 = vst.msk [vmem:[%s278_s3 + $0x8] sm:$0xff] %vm132_vm1, %v105_v31  ;;  %138 = vst.msk [vmem:[%s278_s3 + $0x28] sm:$0xff] %vm132_vm1, %v121_v32 }

// kernel: _lambda_.13
= control target key start
LH: loop header
LB: loop body
LE: loop exit
PB: predicated region body
PF: predicated region fallthrough
CT: control target
= control target key end

     0   :  { %vm72_vm0 = vcmask 261120   ;;  %s744_s4 = inlined_call_operand.vmem [shape: bf16[32,32], index: 4, kind: input, shape index: {}]   ;;  %s745_s3 = inlined_call_operand.vmem [shape: bf16[32,32], index: 3, kind: input, shape index: {}]   ;;  %s746_s1 = inlined_call_operand.vmem [shape: f32[64,32], index: 1, kind: input, shape index: {}]   ;;  %s747_s0 = inlined_call_operand.vmem [shape: f32[64,32], index: 0, kind: input, shape index: {}]   ;;  %s748_s5 = inlined_call_operand.vmem [shape: f32[1,32], index: 5, kind: input, shape index: {}]   ;;  %s749_s2 = inlined_call_operand.vmem [shape: f32[64,32], index: 2, kind: input, shape index: {}]   ;;  %s750_s6 = inlined_call_operand.vmem [shape: f32[1,32], index: 6, kind: input, shape index: {}]   ;;  %s751_s7 = inlined_call_operand.vmem [shape: f32[1,32], index: 7, kind: input, shape index: {}]   ;;  %s752_s8 = inlined_call_operand.vmem [shape: f32[64,32], index: 8, kind: output, shape index: {}]  }
   0x1   :  { %v482_v0 = vld [vmem:[%s744_s4 + $0x8] sm:$0xff]   ;;  %v484_v3 = vld [vmem:[%s744_s4] sm:$0xff]   ;;  %v44_v14 = vld [vmem:[%s746_s1 + $0x10] sm:$0xff] }
   0x2   :  { %v483_v1 = vld [vmem:[%s745_s3 + $0x8] sm:$0xff]   ;;  %478 = vmatprep.subr.msk.bf16.mxu0 %vm72_vm0, %v482_v0  ;;  %v89_v2 = vsel %vm72_vm0, %v482_v0, 0  ;;  %v485_v5 = vld [vmem:[%s745_s3] sm:$0xff]   ;;  %v86_v12 = vsel %vm72_vm0, %v484_v3, 0  ;;  %v45_v15 = vld [vmem:[%s746_s1 + $0x18] sm:$0xff] }
   0x3   :  { %480 = vmatprep.subr.msk.bf16.mxu1 %vm72_vm0, %v483_v1  ;;  %455 = vmatpush3.bf16.xpose.msra.mxu0 %v89_v2  ;;  %v182_v4 = vsel %vm72_vm0, %v483_v1, 0  ;;  %v42_v6 = vld [vmem:[%s746_s1] sm:$0xff]  ;;  %v43_v7 = vld [vmem:[%s746_s1 + $0x8] sm:$0xff]  ;;  %v179_v13 = vsel %vm72_vm0, %v485_v5, 0  ;;  %v32_v16 = vld [vmem:[%s747_s0 + $0x10] sm:$0xff]  ;;  %v51_v22 = vpack.c.bf16 %v45_v15, %v44_v14 }
   0x4   :  { %467 = vmatpush3.bf16.xpose.msra.mxu1 %v182_v4  ;;  %479 = vmatprep.subr.msk.bf16.mxu0 %vm72_vm0, %v484_v3  ;;  %v30_v8 = vld [vmem:[%s747_s0] sm:$0xff]  ;;  %v50_v9 = vpack.c.bf16 %v43_v7, %v42_v6  ;;  %v31_v10 = vld [vmem:[%s747_s0 + $0x8] sm:$0xff]  ;;  %v33_v17 = vld [vmem:[%s747_s0 + $0x18] sm:$0xff] }
   0x5   :  { %481 = vmatprep.subr.msk.bf16.mxu1 %vm72_vm0, %v485_v5  ;;  %v38_v11 = vpack.c.bf16 %v31_v10, %v30_v8  ;;  %v46_v18 = vld [vmem:[%s746_s1 + $0x20] sm:$0xff]  ;;  %v47_v19 = vld [vmem:[%s746_s1 + $0x28] sm:$0xff]  ;;  %v39_v23 = vpack.c.bf16 %v33_v17, %v32_v16  ;;  %v48_v26 = vld [vmem:[%s746_s1 + $0x30] sm:$0xff] }
   0x6   :  { %458 = vmatprep.mubr.msk.bf16.mxu0 %vm72_vm0, %v50_v9  ;;  %v34_v20 = vld [vmem:[%s747_s0 + $0x20] sm:$0xff]  ;;  %v35_v21 = vld [vmem:[%s747_s0 + $0x28] sm:$0xff]  ;;  %v52_v24 = vpack.c.bf16 %v47_v19, %v46_v18  ;;  %v49_v27 = vld [vmem:[%s746_s1 + $0x38] sm:$0xff] }
   0x7   :  { %470 = vmatprep.mubr.msk.bf16.mxu1 %vm72_vm0, %v38_v11  ;;  %v40_v25 = vpack.c.bf16 %v35_v21, %v34_v20  ;;  %v36_v28 = vld [vmem:[%s747_s0 + $0x30] sm:$0xff]  ;;  %v37_v29 = vld [vmem:[%s747_s0 + $0x38] sm:$0xff]  ;;  %v53_v30 = vpack.c.bf16 %v49_v27, %v48_v26  ;;  %v439_v34 = vld [vmem:[%s748_s5] ss:$0 sm:$0xff] }
   0x8   :  { %v41_v31 = vpack.c.bf16 %v37_v29, %v36_v28  ;;  %v266_v38 = vld [vmem:[%s749_s2 + $0x10] sm:$0xff]  ;;  %v264_v43 = vld [vmem:[%s749_s2] sm:$0xff]  ;;  %v267_v49 = vld [vmem:[%s749_s2 + $0x18] sm:$0xff] }
   0x9   :  { %v265_v56 = vld [vmem:[%s749_s2 + $0x8] sm:$0xff]  ;;  %v268_v4 = vld [vmem:[%s749_s2 + $0x20] sm:$0xff]  ;;  %v270_v11 = vld [vmem:[%s749_s2 + $0x30] sm:$0xff] }
   0xa   :  { %v269_v14 = vld [vmem:[%s749_s2 + $0x28] sm:$0xff]  ;;  %v271_v19 = vld [vmem:[%s749_s2 + $0x38] sm:$0xff] }
   0xb   :  { %457 = vmatpush3.bf16.xpose.msra.mxu0 %v86_v12 }
   0xc   :  { %469 = vmatpush3.bf16.xpose.msra.mxu1 %v179_v13 }
  0x12   :  { %459 = vmatmul.mubr.msk.bf16.vlgmr.msra.gmra.mxu0 %vm72_vm0, %v51_v22 }
  0x13   :  { %471 = vmatmul.mubr.msk.bf16.vlgmr.msra.gmra.mxu1 %vm72_vm0, %v39_v23  ;;  %462 = vmatprep.mubr.msk.bf16.mxu0 %vm72_vm0, %v52_v24 }
  0x14   :  { %474 = vmatprep.mubr.msk.bf16.mxu1 %vm72_vm0, %v40_v25 }
  0x1a   :  { %463 = vmatmul.mubr.msk.bf16.gmra.mxu0 %vm72_vm0, %v53_v30 }
  0x1b   :  { %475 = vmatmul.mubr.msk.bf16.gmra.mxu1 %vm72_vm0, %v41_v31 }
  0xd2   :  { %v460_v32 = vpop.f32.mrf.mxu0 }
  0xd3   :  { %v472_v33 = vpop.f32.mrf.mxu1 }
  0xd4   :  { %v227_v35 = vadd.f32 %v472_v33, %v460_v32  ;;  %v125_v36 = vpop.f32.mrf.mxu0 }
  0xd5   :  { %v218_v37 = vpop.f32.mrf.mxu1 }
  0xd6   :  { %v258_v39 = vadd.f32 %v439_v34, %v227_v35  ;;  %v219_v40 = vadd.f32 %v218_v37, %v125_v36  ;;  %v461_v41 = vpop.f32.mrf.mxu0 }
  0xd7   :  { %v473_v42 = vpop.f32.mrf.mxu1 }
  0xd8   :  { %v256_v44 = vadd.f32 %v439_v34, %v219_v40  ;;  %v230_v45 = vadd.f32 %v473_v42, %v461_v41  ;;  %v128_v46 = vpop.f32.mrf.mxu0  ;;  %v274_v47 = vadd.f32 %v266_v38, %v258_v39 }
  0xd9   :  { %v221_v48 = vpop.f32.mrf.mxu1 }
  0xda   :  { %v259_v50 = vadd.f32 %v439_v34, %v230_v45  ;;  %v222_v51 = vadd.f32 %v221_v48, %v128_v46  ;;  %v464_v52 = vpop.f32.mrf.mxu0  ;;  %v286_v53 = vsel %vm72_vm0, %v274_v47, 0.0  ;;  %v272_v54 = vadd.f32 %v264_v43, %v256_v44 }
  0xdb   :  { %287 = vadd.xlane.f32.xlu1 %v286_v53  ;;  %v476_v55 = vpop.f32.mrf.mxu1 }
  0xdc   :  { %v257_v57 = vadd.f32 %v439_v34, %v222_v51  ;;  %v243_v58 = vadd.f32 %v476_v55, %v464_v52  ;;  %v141_v59 = vpop.f32.mrf.mxu0  ;;  %v280_v60 = vsel %vm72_vm0, %v272_v54, 0.0  ;;  %v275_v61 = vadd.f32 %v267_v49, %v259_v50 }
  0xdd   :  { %v234_v62 = vpop.f32.mrf.mxu1  ;;  %281 = vadd.xlane.f32.xlu0 %v280_v60 }
  0xde   :  { %v235_v63 = vadd.f32 %v234_v62, %v141_v59  ;;  %v465_v0 = vpop.f32.mrf.mxu0  ;;  %v289_v1 = vsel %vm72_vm0, %v275_v61, 0.0  ;;  %v273_v2 = vadd.f32 %v265_v56, %v257_v57  ;;  %v262_v5 = vadd.f32 %v439_v34, %v243_v58 }
  0xdf   :  { %290 = vadd.xlane.f32.xlu1 %v289_v1  ;;  %v477_v3 = vpop.f32.mrf.mxu1 }
  0xe0   :  { %v260_v6 = vadd.f32 %v439_v34, %v235_v63  ;;  %v246_v7 = vadd.f32 %v477_v3, %v465_v0  ;;  %v144_v8 = vpop.f32.mrf.mxu0  ;;  %v283_v9 = vsel %vm72_vm0, %v273_v2, 0.0  ;;  %v278_v18 = vadd.f32 %v270_v11, %v262_v5 }
  0xe1   :  { %v237_v10 = vpop.f32.mrf.mxu1  ;;  %284 = vadd.xlane.f32.xlu0 %v283_v9 }
  0xe2   :  { %v238_v12 = vadd.f32 %v237_v10, %v144_v8  ;;  %v276_v13 = vadd.f32 %v268_v4, %v260_v6  ;;  %v263_v15 = vadd.f32 %v439_v34, %v246_v7  ;;  %v298_v22 = vsel %vm72_vm0, %v278_v18, 0.0 }
  0xe4   :  { %v261_v16 = vadd.f32 %v439_v34, %v238_v12  ;;  %v292_v17 = vsel %vm72_vm0, %v276_v13, 0.0  ;;  %v279_v23 = vadd.f32 %v271_v19, %v263_v15 }
  0xe5   :  { %293 = vadd.xlane.f32.xlu0 %v292_v17 }
  0xe6   :  { %v277_v20 = vadd.f32 %v269_v14, %v261_v16  ;;  %v301_v24 = vsel %vm72_vm0, %v279_v23, 0.0 }
  0xe8   :  { %v295_v21 = vsel %vm72_vm0, %v277_v20, 0.0 }
  0xe9   :  { %296 = vadd.xlane.f32.xlu1 %v295_v21  ;;  %299 = vadd.xlane.f32.xlu0 %v298_v22 }
  0xed   :  { %302 = vadd.xlane.f32.xlu1 %v301_v24 }
 0x164   :  { %v288_v25 = vpop.xlane.xlu1 %287 }
 0x165   :  { %v307_v26 = vmul.f32 0.03125, %v288_v25 }
 0x166   :  { %v282_v27 = vpop.xlane.xlu0 %281 }
 0x167   :  { %v658_v28 = vsub.f32 %v274_v47, %v307_v26  ;;  %v305_v29 = vmul.f32 0.03125, %v282_v27  ;;  %v441_v27 = vld [vmem:[%s751_s7] ss:$0 sm:$0xff] }
 0x168   :  { %v291_v30 = vpop.xlane.xlu1 %290 }
 0x169   :  { %v660_v31 = vsub.f32 %v272_v54, %v305_v29  ;;  %v308_v32 = vmul.f32 0.03125, %v291_v30  ;;  %v323_v33 = vmul.f32 %v658_v28, %v658_v28 }
 0x16a   :  { %v285_v34 = vpop.xlane.xlu0 %284 }
 0x16b   :  { %v664_v35 = vsub.f32 %v275_v61, %v308_v32  ;;  %v306_v36 = vmul.f32 0.03125, %v285_v34  ;;  %v335_v37 = vsel %vm72_vm0, %v323_v33, 0.0  ;;  %v321_v38 = vmul.f32 %v660_v31, %v660_v31 }
 0x16c   :  { %336 = vadd.xlane.f32.xlu0 %v335_v37 }
 0x16d   :  { %v669_v39 = vsub.f32 %v273_v2, %v306_v36  ;;  %v324_v40 = vmul.f32 %v664_v35, %v664_v35  ;;  %v329_v44 = vsel %vm72_vm0, %v321_v38, 0.0 }
 0x16e   :  { %v294_v41 = vpop.xlane.xlu0 %293 }
 0x16f   :  { %v309_v42 = vmul.f32 0.03125, %v294_v41  ;;  %v338_v43 = vsel %vm72_vm0, %v324_v40, 0.0  ;;  %v322_v45 = vmul.f32 %v669_v39, %v669_v39 }
 0x170   :  { %339 = vadd.xlane.f32.xlu1 %v338_v43  ;;  %330 = vadd.xlane.f32.xlu0 %v329_v44 }
 0x171   :  { %v677_v46 = vsub.f32 %v276_v13, %v309_v42  ;;  %v332_v51 = vsel %vm72_vm0, %v322_v45, 0.0 }
 0x172   :  { %v297_v47 = vpop.xlane.xlu1 %296  ;;  %v300_v48 = vpop.xlane.xlu0 %299 }
 0x173   :  { %v310_v49 = vmul.f32 0.03125, %v297_v47  ;;  %v311_v50 = vmul.f32 0.03125, %v300_v48  ;;  %v325_v52 = vmul.f32 %v677_v46, %v677_v46 }
 0x174   :  { %333 = vadd.xlane.f32.xlu1 %v332_v51 }
 0x175   :  { %v682_v53 = vsub.f32 %v277_v20, %v310_v49  ;;  %v684_v54 = vsub.f32 %v278_v18, %v311_v50  ;;  %v341_v55 = vsel %vm72_vm0, %v325_v52, 0.0 }
 0x176   :  { %v303_v56 = vpop.xlane.xlu1 %302  ;;  %342 = vadd.xlane.f32.xlu0 %v341_v55 }
 0x177   :  { %v312_v57 = vmul.f32 0.03125, %v303_v56  ;;  %v326_v58 = vmul.f32 %v682_v53, %v682_v53  ;;  %v327_v59 = vmul.f32 %v684_v54, %v684_v54 }
 0x179   :  { %v691_v60 = vsub.f32 %v279_v23, %v312_v57  ;;  %v344_v61 = vsel %vm72_vm0, %v326_v58, 0.0  ;;  %v347_v62 = vsel %vm72_vm0, %v327_v59, 0.0  ;;  %v440_v23 = vld [vmem:[%s750_s6] ss:$0 sm:$0xff] }
 0x17a   :  { %345 = vadd.xlane.f32.xlu1 %v344_v61  ;;  %348 = vadd.xlane.f32.xlu0 %v347_v62 }
 0x17b   :  { %v328_v63 = vmul.f32 %v691_v60, %v691_v60 }
 0x17d   :  { %v350_v0 = vsel %vm72_vm0, %v328_v63, 0.0 }
 0x17e   :  { %351 = vadd.xlane.f32.xlu1 %v350_v0 }
 0x1f5   :  { %v337_v1 = vpop.xlane.xlu0 %336 }
 0x1f6   :  { %v355_v2 = vmul.f32 0.03125, %v337_v1 }
 0x1f8   :  { %v363_v3 = vadd.f32 1e-05, %v355_v2 }
 0x1f9   :  { %v340_v4 = vpop.xlane.xlu1 %339  ;;  %v331_v5 = vpop.xlane.xlu0 %330 }
 0x1fa   :  { %486 = vrsqrt.f32 %v363_v3  ;;  %v356_v6 = vmul.f32 0.03125, %v340_v4  ;;  %v353_v7 = vmul.f32 0.03125, %v331_v5 }
 0x1fc   :  { %v364_v8 = vadd.f32 1e-05, %v356_v6  ;;  %v361_v9 = vadd.f32 1e-05, %v353_v7 }
 0x1fd   :  { %v334_v10 = vpop.xlane.xlu1 %333 }
 0x1fe   :  { %488 = vrsqrt.f32 %v364_v8  ;;  %v354_v11 = vmul.f32 0.03125, %v334_v10 }
 0x1ff   :  { %490 = vrsqrt.f32 %v361_v9  ;;  %v343_v12 = vpop.xlane.xlu0 %342 }
 0x200   :  { %v362_v13 = vadd.f32 1e-05, %v354_v11  ;;  %v357_v14 = vmul.f32 0.03125, %v343_v12 }
 0x202   :  { %492 = vrsqrt.f32 %v362_v13  ;;  %v365_v15 = vadd.f32 1e-05, %v357_v14 }
 0x203   :  { %v346_v16 = vpop.xlane.xlu1 %345  ;;  %v349_v17 = vpop.xlane.xlu0 %348 }
 0x204   :  { %494 = vrsqrt.f32 %v365_v15  ;;  %v358_v18 = vmul.f32 0.03125, %v346_v16  ;;  %v359_v19 = vmul.f32 0.03125, %v349_v17 }
 0x206   :  { %v366_v20 = vadd.f32 1e-05, %v358_v18  ;;  %v367_v21 = vadd.f32 1e-05, %v359_v19 }
 0x207   :  { %v487_v22 = vpop.eup %486  ;;  %v352_v24 = vpop.xlane.xlu1 %351 }
 0x208   :  { %v379_v25 = vmul.f32 %v487_v22, %v658_v28  ;;  %496 = vrsqrt.f32 %v366_v20  ;;  %v360_v26 = vmul.f32 0.03125, %v352_v24 }
 0x209   :  { %498 = vrsqrt.f32 %v367_v21 }
 0x20a   :  { %v394_v29 = vmul.f32 %v440_v23, %v379_v25  ;;  %v368_v30 = vadd.f32 1e-05, %v360_v26 }
 0x20b   :  { %v489_v32 = vpop.eup %488 }
 0x20c   :  { %v491_v33 = vpop.eup %490  ;;  %v409_v34 = vadd.f32 %v441_v27, %v394_v29  ;;  %v380_v36 = vmul.f32 %v489_v32, %v664_v35  ;;  %500 = vrsqrt.f32 %v368_v30 }
 0x20d   :  { %v377_v37 = vmul.f32 %v491_v33, %v660_v31 }
 0x20e   :  { %417 = vst.msk [vmem:[%s752_s8 + $0x10] sm:$0xff] %vm72_vm0, %v409_v34  ;;  %v395_v28 = vmul.f32 %v440_v23, %v380_v36 }
 0x20f   :  { %v493_v38 = vpop.eup %492  ;;  %v392_v40 = vmul.f32 %v440_v23, %v377_v37 }
 0x210   :  { %v410_v41 = vadd.f32 %v441_v27, %v395_v28  ;;  %v378_v42 = vmul.f32 %v493_v38, %v669_v39 }
 0x211   :  { %v495_v43 = vpop.eup %494  ;;  %v407_v44 = vadd.f32 %v441_v27, %v392_v40 }
 0x212   :  { %418 = vst.msk [vmem:[%s752_s8 + $0x18] sm:$0xff] %vm72_vm0, %v410_v41  ;;  %v393_v35 = vmul.f32 %v440_v23, %v378_v42  ;;  %v381_v31 = vmul.f32 %v495_v43, %v677_v46 }
 0x213   :  { %415 = vst.msk [vmem:[%s752_s8] sm:$0xff] %vm72_vm0, %v407_v44 }
 0x214   :  { %v408_v45 = vadd.f32 %v441_v27, %v393_v35  ;;  %v396_v47 = vmul.f32 %v440_v23, %v381_v31 }
 0x215   :  { %v497_v48 = vpop.eup %496 }
 0x216   :  { %v499_v49 = vpop.eup %498  ;;  %416 = vst.msk [vmem:[%s752_s8 + $0x8] sm:$0xff] %vm72_vm0, %v408_v45  ;;  %v411_v39 = vadd.f32 %v441_v27, %v396_v47  ;;  %v382_v50 = vmul.f32 %v497_v48, %v682_v53 }
 0x217   :  { %v383_v51 = vmul.f32 %v499_v49, %v684_v54 }
 0x218   :  { %419 = vst.msk [vmem:[%s752_s8 + $0x20] sm:$0xff] %vm72_vm0, %v411_v39  ;;  %v397_v46 = vmul.f32 %v440_v23, %v382_v50 }
 0x219   :  { %v501_v52 = vpop.eup %500  ;;  %v398_v55 = vmul.f32 %v440_v23, %v383_v51 }
 0x21a   :  { %v412_v56 = vadd.f32 %v441_v27, %v397_v46  ;;  %v384_v57 = vmul.f32 %v501_v52, %v691_v60 }
 0x21b   :  { %v413_v58 = vadd.f32 %v441_v27, %v398_v55 }
 0x21c   :  { %420 = vst.msk [vmem:[%s752_s8 + $0x28] sm:$0xff] %vm72_vm0, %v412_v56  ;;  %v399_v53 = vmul.f32 %v440_v23, %v384_v57 }
 0x21d   :  { %421 = vst.msk [vmem:[%s752_s8 + $0x30] sm:$0xff] %vm72_vm0, %v413_v58 }
 0x21e   :  { %v414_v54 = vadd.f32 %v441_v27, %v399_v53 }
 0x220   :  { %422 = vst.msk [vmem:[%s752_s8 + $0x38] sm:$0xff] %vm72_vm0, %v414_v54 }

// kernel: _lambda_.11
= control target key start
LH: loop header
LB: loop body
LE: loop exit
PB: predicated region body
PF: predicated region fallthrough
CT: control target
= control target key end

     0   :  { %vm85_vm0 = vcmask 261120   ;;  %vm217_vm1 = vcmask 64512   ;;  %s2126_s26 = smov 120   ;;  %s2127_s27 = smov 64   ;;  %vm307_vm2 = vcmask 523264   ;;  %vm1455_vm3 = vcmask 130048   ;;  %s2880_s1 = inlined_call_operand.vmem [shape: bf16[96,32], index: 1, kind: input, shape index: {}]   ;;  %s2881_s0 = inlined_call_operand.vmem [shape: f32[64,32], index: 0, kind: input, shape index: {}]   ;;  %s2882_s2 = inlined_call_operand.vmem [shape: f32[1,96], index: 2, kind: input, shape index: {}]   ;;  %s2883_s5 = inlined_call_operand.vmem [shape: f32[64,64], index: 5, kind: input, shape index: {}]   ;;  %s2884_s3 = inlined_call_operand.vmem [shape: bf16[32,32], index: 3, kind: input, shape index: {}]   ;;  %s2885_s4 = inlined_call_operand.vmem [shape: f32[1,32], index: 4, kind: input, shape index: {}]   ;;  %s2886_s6 = inlined_call_operand.vmem [shape: f32[64,32], index: 6, kind: output, shape index: {}]  }
   0x1   :  { %v1981_v0 = vld [vmem:[%s2880_s1 + $0x28] sm:$0xff]   ;;  %v1982_v1 = vld [vmem:[%s2880_s1 + $0x20] sm:$0xff]   ;;  %v1983_v7 = vld [vmem:[%s2880_s1 + $0x18] sm:$0xff]   ;;  %s2129_s20 = smov 80   ;;  %s2130_s21 = smov 112   ;;  %vm1464_vm4 = vcmask 195584  }
   0x2   :  { %1883 = vmatprep.subr.msk.bf16.mxu0 %vm85_vm0, %v1981_v0  ;;  %v114_v2 = vsel %vm85_vm0, %v1981_v0, 0  ;;  %v24_v3 = vld [vmem:[%s2881_s0] sm:$0xff]  ;;  %v25_v4 = vld [vmem:[%s2881_s0 + $0x8] sm:$0xff]  ;;  %v111_v6 = vsel %vm85_vm0, %v1982_v1, 0  ;;  %v108_v8 = vsel %vm85_vm0, %v1983_v7, 0  ;;  %v1984_v9 = vld [vmem:[%s2880_s1 + $0x10] sm:$0xff]  }
   0x3   :  { %1724 = vmatpush3.bf16.xpose.msra.mxu0 %v114_v2  ;;  %v32_v5 = vpack.c.bf16 %v25_v4, %v24_v3  ;;  %v105_v10 = vsel %vm85_vm0, %v1984_v9, 0  ;;  %v1985_v11 = vld [vmem:[%s2880_s1 + $0x8] sm:$0xff]   ;;  %v1986_v13 = vld [vmem:[%s2880_s1] sm:$0xff]   ;;  %v26_v15 = vld [vmem:[%s2881_s0 + $0x10] sm:$0xff]  ;;  %s2128_s1 = smov 56   ;;  %s2131_s22 = smov 48  }
   0x4   :  { %1884 = vmatprep.subr.msk.bf16.mxu0 %vm85_vm0, %v1982_v1  ;;  %v102_v12 = vsel %vm85_vm0, %v1985_v11, 0  ;;  %v99_v14 = vsel %vm85_vm0, %v1986_v13, 0  ;;  %v27_v16 = vld [vmem:[%s2881_s0 + $0x18] sm:$0xff]  ;;  %v28_v17 = vld [vmem:[%s2881_s0 + $0x20] sm:$0xff]  ;;  %v29_v18 = vld [vmem:[%s2881_s0 + $0x28] sm:$0xff]  ;;  %s2132_s23 = smov 72  }
   0x5   :  { %1735 = vmatprep.mubr.msk.bf16.mxu0 %vm85_vm0, %v32_v5  ;;  %v33_v19 = vpack.c.bf16 %v27_v16, %v26_v15  ;;  %v34_v20 = vpack.c.bf16 %v29_v18, %v28_v17  ;;  %v30_v21 = vld [vmem:[%s2881_s0 + $0x30] sm:$0xff]  ;;  %v31_v22 = vld [vmem:[%s2881_s0 + $0x38] sm:$0xff]  ;;  %v1593_v25 = vld [vmem:[%s2882_s2] ss:$0 sm:$0xff]  ;;  %s2124_s0 = smov 96   ;;  %s2125_s2 = smov 88  }
   0x6   :  { %v35_v23 = vpack.c.bf16 %v31_v22, %v30_v21  ;;  %v2300_v17 = vld [vmem:[%s2883_s5] sm:$0xff]  ;;  %s2133_s24 = smov 104   ;;  %s2134_s13 = smov 40  }
   0x7   :  { %s2136_s14 = smov 16   ;;  %s2137_s19 = smov 24  }
   0xb   :  { %1726 = vmatpush3.bf16.xpose.msra.mxu0 %v111_v6 }
   0xc   :  { %1885 = vmatprep.subr.msk.bf16.mxu0 %vm85_vm0, %v1983_v7 }
  0x13   :  { %1728 = vmatpush3.bf16.xpose.msra.mxu0 %v108_v8 }
  0x14   :  { %1886 = vmatprep.subr.msk.bf16.mxu0 %vm85_vm0, %v1984_v9 }
  0x1b   :  { %1730 = vmatpush3.bf16.xpose.msra.mxu0 %v105_v10 }
  0x1c   :  { %1887 = vmatprep.subr.msk.bf16.mxu0 %vm85_vm0, %v1985_v11 }
  0x23   :  { %1732 = vmatpush3.bf16.xpose.msra.mxu0 %v102_v12 }
  0x24   :  { %1888 = vmatprep.subr.msk.bf16.mxu0 %vm85_vm0, %v1986_v13 }
  0x2b   :  { %1734 = vmatpush3.bf16.xpose.msra.mxu0 %v99_v14  ;;  %v2295_v14 = vld [vmem:[%s2883_s5 + $0x10] sm:$0xff] }
  0x32   :  { %1736 = vmatmul.mubr.msk.bf16.vlgmr.msra.gmra.mxu0 %vm85_vm0, %v33_v19 }
  0x33   :  { %1739 = vmatprep.mubr.msk.bf16.mxu0 %vm85_vm0, %v34_v20 }
  0x3a   :  { %1740 = vmatmul.mubr.msk.bf16.gmra.mxu0 %vm85_vm0, %v35_v23 }
  0xf2   :  { %v1737_v24 = vpop.f32.mrf.mxu0 }
  0xf3   :  { %v159_v28 = vadd.f32 %v1737_v24, %v1593_v25 }
  0xf4   :  { %v150_v26 = vpop.f32.mrf.mxu0 }
  0xf5   :  { %v151_v29 = vadd.f32 %v1593_v25, %v150_v26  ;;  %v191_v49 = vmul.f32 0.35355338, %v159_v28  ;;  %v2321_v26 = vld [vmem:[%s2883_s5 + $0x18] sm:$0xff] }
  0xf6   :  { %v1738_v27 = vpop.f32.mrf.mxu0 }
  0xf7   :  { %v162_v30 = vadd.f32 %v1738_v27, %v1593_v25  ;;  %v189_v35 = vmul.f32 0.35355338, %v151_v29 }
  0xf8   :  { %v153_v31 = vpop.f32.mrf.mxu0 }
  0xf9   :  { %v2234_v32 = vpack.c.bf16 %v162_v30, %v159_v28  ;;  %v154_v33 = vadd.f32 %v1593_v25, %v153_v31  ;;  %v192_v47 = vmul.f32 0.35355338, %v162_v30 }
  0xfa   :  { %v1741_v34 = vpop.f32.mrf.mxu0 }
  0xfb   :  { %v190_v36 = vmul.f32 0.35355338, %v154_v33  ;;  %211 = vrot.lane.b32.xlu1 %v2234_v32, %s2124_s0  ;;  %v175_v40 = vadd.f32 %v1741_v34, %v1593_v25  ;;  %v2249_v48 = vpack.c.bf16 %v154_v33, %v151_v29  ;;  %v2253_v50 = vpack.c.bf16 %v192_v47, %v191_v49  ;;  %v2326_v29 = vld [vmem:[%s2883_s5 + $0x8] sm:$0xff] }
  0xfc   :  { %v166_v37 = vpop.f32.mrf.mxu0 }
  0xfd   :  { %v2237_v38 = vpack.c.bf16 %v190_v36, %v189_v35  ;;  %v167_v45 = vadd.f32 %v1593_v25, %v166_v37  ;;  %v195_v52 = vmul.f32 0.35355338, %v175_v40  ;;  %v2341_v37 = vld [vmem:[%s2883_s5 + $0x30] sm:$0xff] }
  0xfe   :  { %v1742_v39 = vpop.f32.mrf.mxu0 }
  0xff   :  { %v178_v41 = vadd.f32 %v1742_v39, %v1593_v25  ;;  %1751 = vmatprep.mubr.msk.bf16.mxu1 %vm217_vm1, %v2237_v38  ;;  %v193_v55 = vmul.f32 0.35355338, %v167_v45 }
 0x100   :  { %v169_v42 = vpop.f32.mrf.mxu0 }
 0x101   :  { %v2241_v43 = vpack.c.bf16 %v178_v41, %v175_v40  ;;  %v170_v44 = vadd.f32 %v1593_v25, %v169_v42  ;;  %v196_v51 = vmul.f32 0.35355338, %v178_v41 }
 0x103   :  { %507 = vrot.lane.b32.xlu1 %v2241_v43, %s2125_s2  ;;  %215 = vrot.lane.b32.xlu0 %v2241_v43, %s2124_s0  ;;  %v2245_v46 = vpack.c.bf16 %v170_v44, %v167_v45  ;;  %v2257_v53 = vpack.c.bf16 %v196_v51, %v195_v52  ;;  %v194_v54 = vmul.f32 0.35355338, %v170_v44 }
 0x105   :  { %v2261_v56 = vpack.c.bf16 %v194_v54, %v193_v55  ;;  %v2366_v55 = vld [vmem:[%s2883_s5 + $0x20] sm:$0xff] }
 0x107   :  { %505 = vrot.lane.b32.xlu1 %v2245_v46, %s2125_s2  ;;  %213 = vrot.lane.b32.xlu0 %v2245_v46, %s2124_s0 }
 0x10b   :  { %501 = vrot.lane.b32.xlu1 %v2249_v48, %s2125_s2  ;;  %209 = vrot.lane.b32.xlu0 %v2249_v48, %s2124_s0 }
 0x10f   :  { %495 = vrot.lane.b32.xlu1 %v2253_v50, %s2126_s26  ;;  %503 = vrot.lane.b32.xlu0 %v2234_v32, %s2125_s2 }
 0x113   :  { %499 = vrot.lane.b32.xlu1 %v2257_v53, %s2126_s26  ;;  %493 = vrot.lane.b32.xlu0 %v2237_v38, %s2126_s26 }
 0x117   :  { %406 = vrot.lane.b32.xlu1 %v2241_v43, %s2127_s27  ;;  %497 = vrot.lane.b32.xlu0 %v2261_v56, %s2126_s26 }
 0x16d   :  { %v212_v57 = vpop.permute.xlu1 %211 }
 0x16e   :  { %v234_v7 = vsel %vm217_vm1, %v212_v57, 0 }
 0x175   :  { %v508_v58 = vpop.permute.xlu1 %507  ;;  %v216_v59 = vpop.permute.xlu0 %215 }
 0x176   :  { %1889 = vmatprep.subr.msk.bf16.mxu1 %vm217_vm1, %v216_v59  ;;  %1893 = vmatprep.subr.msk.bf16.mxu0 %vm217_vm1, %v508_v58  ;;  %v240_v60 = vsel %vm217_vm1, %v216_v59, 0  ;;  %v531_v61 = vsel %vm217_vm1, %v508_v58, 0  ;;  %v2371_v58 = vld [vmem:[%s2883_s5 + $0x38] sm:$0xff] }
 0x177   :  { %1744 = vmatpush3.bf16.xpose.msra.mxu1 %v240_v60  ;;  %1776 = vmatpush3.bf16.xpose.msra.mxu0 %v531_v61 }
 0x179   :  { %v506_v62 = vpop.permute.xlu1 %505  ;;  %v214_v63 = vpop.permute.xlu0 %213 }
 0x17a   :  { %1890 = vmatprep.subr.msk.bf16.mxu1 %vm217_vm1, %v214_v63  ;;  %1894 = vmatprep.subr.msk.bf16.mxu0 %vm217_vm1, %v506_v62  ;;  %v237_v2 = vsel %vm217_vm1, %v214_v63, 0  ;;  %v528_v3 = vsel %vm217_vm1, %v506_v62, 0 }
 0x17d   :  { %v502_v0 = vpop.permute.xlu1 %501  ;;  %v210_v1 = vpop.permute.xlu0 %209 }
 0x17e   :  { %v231_v10 = vsel %vm217_vm1, %v210_v1, 0  ;;  %v522_v11 = vsel %vm217_vm1, %v502_v0, 0 }
 0x17f   :  { %1746 = vmatpush3.bf16.xpose.msra.mxu1 %v237_v2  ;;  %1778 = vmatpush3.bf16.xpose.msra.mxu0 %v528_v3 }
 0x180   :  { %1891 = vmatprep.subr.msk.bf16.mxu1 %vm217_vm1, %v212_v57 }
 0x181   :  { %v504_v4 = vpop.permute.xlu0 %503  ;;  %v496_v5 = vpop.permute.xlu1 %495 }
 0x182   :  { %1895 = vmatprep.subr.msk.bf16.mxu0 %vm217_vm1, %v504_v4  ;;  %v525_v8 = vsel %vm217_vm1, %v504_v4, 0 }
 0x185   :  { %v494_v6 = vpop.permute.xlu0 %493  ;;  %v500_v9 = vpop.permute.xlu1 %499 }
 0x186   :  { %1783 = vmatprep.mubr.msk.bf16.mxu0 %vm217_vm1, %v494_v6 }
 0x187   :  { %1748 = vmatpush3.bf16.xpose.msra.mxu1 %v234_v7  ;;  %1780 = vmatpush3.bf16.xpose.msra.mxu0 %v525_v8 }
 0x188   :  { %1892 = vmatprep.subr.msk.bf16.mxu1 %vm217_vm1, %v210_v1  ;;  %1896 = vmatprep.subr.msk.bf16.mxu0 %vm217_vm1, %v502_v0 }
 0x189   :  { %v407_v12 = vpop.permute.xlu1 %406  ;;  %v498_v13 = vpop.permute.xlu0 %497 }
 0x18f   :  { %1750 = vmatpush3.bf16.xpose.msra.mxu1 %v231_v10  ;;  %1782 = vmatpush3.bf16.xpose.msra.mxu0 %v522_v11 }
 0x190   :  { %1759 = vmatprep.subr.bf16.mxu1 %v407_v12 }
 0x196   :  { %1752 = vmatmul.mubr.msk.bf16.vlgmr.msra.gmra.mxu1 %vm217_vm1, %v2253_v50  ;;  %1784 = vmatmul.mubr.msk.bf16.vlgmr.msra.gmra.mxu0 %vm217_vm1, %v496_v5  ;;  %v2393_v5 = vld [vmem:[%s2883_s5 + $0x28] sm:$0xff] }
 0x197   :  { %1755 = vmatprep.mubr.msk.bf16.mxu1 %vm217_vm1, %v2261_v56  ;;  %1760 = vmatpush3.bf16.msra.mxu1 %v407_v12 }
 0x198   :  { %1787 = vmatprep.mubr.msk.bf16.mxu0 %vm217_vm1, %v498_v13 }
 0x19e   :  { %1756 = vmatmul.mubr.msk.bf16.gmra.mxu1 %vm217_vm1, %v2257_v53  ;;  %1788 = vmatmul.mubr.msk.bf16.gmra.mxu0 %vm217_vm1, %v500_v9 }
 0x256   :  { %v1753_v15 = vpop.f32.mrf.mxu1  ;;  %v1785_v16 = vpop.f32.mrf.mxu0 }
 0x257   :  { %v2303_v18 = vadd.f32 %v1753_v15, %v2295_v14  ;;  %v2306_v19 = vadd.f32 %v1785_v16, %v2295_v14 }
 0x258   :  { %v276_v20 = vpop.f32.mrf.mxu1  ;;  %v567_v21 = vpop.f32.mrf.mxu0 }
 0x259   :  { %v2309_v22 = vadd.f32 %v276_v20, %v2300_v17  ;;  %v2312_v23 = vadd.f32 %v567_v21, %v2300_v17  ;;  %v604_v24 = vsel %vm307_vm2, %v2306_v19, -inf  ;;  %v314_v25 = vsel %vm307_vm2, %v2303_v18, -inf }
 0x25a   :  { %605 = vmax.xlane.f32.xlu1 %v604_v24  ;;  %v1786_v27 = vpop.f32.mrf.mxu0  ;;  %315 = vmax.xlane.f32.xlu0 %v314_v25  ;;  %v1754_v28 = vpop.f32.mrf.mxu1 }
 0x25b   :  { %v2329_v31 = vadd.f32 %v1754_v28, %v2321_v26  ;;  %v598_v34 = vsel %vm307_vm2, %v2312_v23, -inf  ;;  %v308_v35 = vsel %vm307_vm2, %v2309_v22, -inf  ;;  %v2344_v40 = vadd.f32 %v1786_v27, %v2321_v26 }
 0x25c   :  { %v279_v30 = vpop.f32.mrf.mxu1  ;;  %v570_v36 = vpop.f32.mrf.mxu0 }
 0x25d   :  { %v2332_v33 = vadd.f32 %v279_v30, %v2326_v29  ;;  %v317_v44 = vsel %vm307_vm2, %v2329_v31, -inf  ;;  %v2354_v49 = vadd.f32 %v570_v36, %v2326_v29  ;;  %v607_v54 = vsel %vm307_vm2, %v2344_v40, -inf }
 0x25e   :  { %599 = vmax.xlane.f32.xlu1 %v598_v34  ;;  %v1757_v39 = vpop.f32.mrf.mxu1  ;;  %309 = vmax.xlane.f32.xlu0 %v308_v35  ;;  %v1789_v45 = vpop.f32.mrf.mxu0 }
 0x25f   :  { %v2347_v41 = vadd.f32 %v1757_v39, %v2341_v37  ;;  %v311_v42 = vsel %vm307_vm2, %v2332_v33, -inf  ;;  %v2357_v51 = vadd.f32 %v1789_v45, %v2341_v37  ;;  %v601_v63 = vsel %vm307_vm2, %v2354_v49, -inf }
 0x260   :  { %v292_v47 = vpop.f32.mrf.mxu1  ;;  %v583_v57 = vpop.f32.mrf.mxu0 }
 0x261   :  { %v326_v52 = vsel %vm307_vm2, %v2347_v41, -inf  ;;  %v2374_v60 = vadd.f32 %v292_v47, %v2366_v55  ;;  %v616_v62 = vsel %vm307_vm2, %v2357_v51, -inf  ;;  %v2407_v9 = vadd.f32 %v583_v57, %v2366_v55 }
 0x262   :  { %312 = vmax.xlane.f32.xlu1 %v311_v42  ;;  %318 = vmax.xlane.f32.xlu0 %v317_v44  ;;  %v1758_v59 = vpop.f32.mrf.mxu1  ;;  %v1790_v0 = vpop.f32.mrf.mxu0 }
 0x263   :  { %v2377_v61 = vadd.f32 %v1758_v59, %v2371_v58  ;;  %v2384_v1 = vadd.f32 %v1790_v0, %v2371_v58  ;;  %v320_v2 = vsel %vm307_vm2, %v2374_v60, -inf  ;;  %v610_v10 = vsel %vm307_vm2, %v2407_v9, -inf }
 0x264   :  { %v295_v4 = vpop.f32.mrf.mxu1  ;;  %v586_v11 = vpop.f32.mrf.mxu0 }
 0x265   :  { %v329_v3 = vsel %vm307_vm2, %v2377_v61, -inf  ;;  %v2396_v6 = vadd.f32 %v295_v4, %v2393_v5  ;;  %v619_v7 = vsel %vm307_vm2, %v2384_v1, -inf  ;;  %v2412_v12 = vadd.f32 %v586_v11, %v2393_v5 }
 0x266   :  { %327 = vmax.xlane.f32.xlu1 %v326_v52  ;;  %608 = vmax.xlane.f32.xlu0 %v607_v54 }
 0x267   :  { %v323_v8 = vsel %vm307_vm2, %v2396_v6, -inf  ;;  %v613_v13 = vsel %vm307_vm2, %v2412_v12, -inf }
 0x26a   :  { %617 = vmax.xlane.f32.xlu1 %v616_v62  ;;  %602 = vmax.xlane.f32.xlu0 %v601_v63 }
 0x26e   :  { %321 = vmax.xlane.f32.xlu1 %v320_v2  ;;  %330 = vmax.xlane.f32.xlu0 %v329_v3 }
 0x272   :  { %620 = vmax.xlane.f32.xlu0 %v619_v7 }
 0x276   :  { %324 = vmax.xlane.f32.xlu0 %v323_v8 }
 0x27f   :  { %404 = vrot.lane.b32.xlu1 %v2245_v46, %s2127_s27 }
 0x28c   :  { %402 = vrot.lane.b32.xlu0 %v2234_v32, %s2127_s27 }
 0x2a3   :  { %611 = vmax.xlane.f32.xlu1 %v610_v10 }
 0x2ab   :  { %614 = vmax.xlane.f32.xlu0 %v613_v13 }
 0x2b4   :  { %400 = vrot.lane.b32.xlu1 %v2249_v48, %s2127_s27 }
 0x2b8   :  { %696 = vrot.lane.b32.xlu1 %v2241_v43, %s2128_s1 }
 0x2bc   :  { %694 = vrot.lane.b32.xlu1 %v2245_v46, %s2128_s1 }
 0x2c0   :  { %692 = vrot.lane.b32.xlu1 %v2234_v32, %s2128_s1 }
 0x2e3   :  { %v606_v15 = vpop.xlane.xlu1 %605  ;;  %v316_v16 = vpop.xlane.xlu0 %315 }
 0x2e4   :  { %v624_v20 = vsub.f32 %v2306_v19, %v606_v15  ;;  %v334_v21 = vsub.f32 %v2303_v18, %v316_v16 }
 0x2e6   :  { %v634_v24 = vmul.f32 1.442695, %v624_v20  ;;  %v344_v25 = vmul.f32 1.442695, %v334_v21 }
 0x2e7   :  { %v600_v27 = vpop.xlane.xlu1 %599  ;;  %v310_v28 = vpop.xlane.xlu0 %309 }
 0x2e8   :  { %1989 = vpow2.f32 %v634_v24  ;;  %v622_v30 = vsub.f32 %v2312_v23, %v600_v27  ;;  %v332_v34 = vsub.f32 %v2309_v22, %v310_v28 }
 0x2e9   :  { %1991 = vpow2.f32 %v344_v25 }
 0x2ea   :  { %v630_v35 = vmul.f32 1.442695, %v622_v30  ;;  %v340_v36 = vmul.f32 1.442695, %v332_v34 }
 0x2eb   :  { %v313_v39 = vpop.xlane.xlu1 %312  ;;  %v319_v42 = vpop.xlane.xlu0 %318 }
 0x2ec   :  { %1993 = vpow2.f32 %v630_v35  ;;  %v335_v44 = vsub.f32 %v2329_v31, %v319_v42  ;;  %v333_v18 = vsub.f32 %v2332_v33, %v313_v39 }
 0x2ed   :  { %1995 = vpow2.f32 %v340_v36 }
 0x2ee   :  { %v346_v19 = vmul.f32 1.442695, %v335_v44  ;;  %v342_v57 = vmul.f32 1.442695, %v333_v18 }
 0x2ef   :  { %v328_v45 = vpop.xlane.xlu1 %327  ;;  %v609_v47 = vpop.xlane.xlu0 %608 }
 0x2f0   :  { %v338_v52 = vsub.f32 %v2347_v41, %v328_v45  ;;  %v625_v23 = vsub.f32 %v2344_v40, %v609_v47  ;;  %1997 = vpow2.f32 %v346_v19 }
 0x2f2   :  { %v352_v22 = vmul.f32 1.442695, %v338_v52  ;;  %v636_v54 = vmul.f32 1.442695, %v625_v23 }
 0x2f3   :  { %v618_v59 = vpop.xlane.xlu1 %617  ;;  %v603_v62 = vpop.xlane.xlu0 %602 }
 0x2f4   :  { %1999 = vpow2.f32 %v352_v22  ;;  %v623_v63 = vsub.f32 %v2354_v49, %v603_v62  ;;  %v628_v40 = vsub.f32 %v2357_v51, %v618_v59 }
 0x2f5   :  { %v2433_v31 = vpop.eup %1989  ;;  %2001 = vpow2.f32 %v636_v54 }
 0x2f6   :  { %v2435_v0 = vpop.eup %1991  ;;  %v652_v33 = vsel %vm307_vm2, %v2433_v31, 0.0  ;;  %2003 = vpow2.f32 %v342_v57  ;;  %v632_v41 = vmul.f32 1.442695, %v623_v63  ;;  %v642_v13 = vmul.f32 1.442695, %v628_v40 }
 0x2f7   :  { %v362_v2 = vsel %vm307_vm2, %v2435_v0, 0.0  ;;  %v322_v3 = vpop.xlane.xlu1 %321  ;;  %653 = vadd.xlane.f32.xlu0 %v652_v33  ;;  %v331_v4 = vpop.xlane.xlu0 %330 }
 0x2f8   :  { %363 = vadd.xlane.f32.xlu1 %v362_v2  ;;  %v336_v49 = vsub.f32 %v2374_v60, %v322_v3  ;;  %2005 = vpow2.f32 %v632_v41  ;;  %v339_v51 = vsub.f32 %v2377_v61, %v331_v4 }
 0x2f9   :  { %v2443_v7 = vpop.eup %1993 }
 0x2fa   :  { %v2445_v8 = vpop.eup %1995  ;;  %v348_v10 = vmul.f32 1.442695, %v336_v49  ;;  %v646_v11 = vsel %vm307_vm2, %v2443_v7, 0.0  ;;  %v354_v21 = vmul.f32 1.442695, %v339_v51 }
 0x2fb   :  { %v405_v15 = vpop.permute.xlu1 %404  ;;  %647 = vadd.xlane.f32.xlu0 %v646_v11  ;;  %v356_v16 = vsel %vm307_vm2, %v2445_v8, 0.0  ;;  %v621_v20 = vpop.xlane.xlu0 %620 }
 0x2fc   :  { %2007 = vpow2.f32 %v348_v10  ;;  %357 = vadd.xlane.f32.xlu1 %v356_v16  ;;  %1761 = vmatprep.subr.bf16.mxu1 %v405_v15  ;;  %v629_v57 = vsub.f32 %v2384_v1, %v621_v20 }
 0x2fd   :  { %1762 = vmatpush3.bf16.msra.mxu1 %v405_v15  ;;  %v2452_v60 = vpop.eup %1997  ;;  %2009 = vpow2.f32 %v642_v13 }
 0x2fe   :  { %v365_v24 = vsel %vm307_vm2, %v2452_v60, 0.0  ;;  %2011 = vpow2.f32 %v354_v21  ;;  %v644_v63 = vmul.f32 1.442695, %v629_v57 }
 0x2ff   :  { %v325_v25 = vpop.xlane.xlu0 %324  ;;  %366 = vadd.xlane.f32.xlu0 %v365_v24 }
 0x300   :  { %v337_v61 = vsub.f32 %v2396_v6, %v325_v25 }
 0x301   :  { %v2457_v27 = vpop.eup %1999 }
 0x302   :  { %v2459_v28 = vpop.eup %2001  ;;  %v374_v30 = vsel %vm307_vm2, %v2457_v27, 0.0  ;;  %v350_v34 = vmul.f32 1.442695, %v337_v61 }
 0x303   :  { %375 = vadd.xlane.f32.xlu1 %v374_v30  ;;  %v655_v35 = vsel %vm307_vm2, %v2459_v28, 0.0  ;;  %v403_v36 = vpop.permute.xlu0 %402  ;;  %v2465_v39 = vpop.eup %2003 }
 0x304   :  { %656 = vadd.xlane.f32.xlu0 %v655_v35  ;;  %1763 = vmatprep.subr.bf16.mxu1 %v403_v36  ;;  %2013 = vpow2.f32 %v350_v34  ;;  %v359_v6 = vsel %vm307_vm2, %v2465_v39, 0.0 }
 0x305   :  { %1764 = vmatpush3.bf16.msra.mxu1 %v403_v36  ;;  %v2469_v42 = vpop.eup %2005 }
 0x306   :  { %v649_v18 = vsel %vm307_vm2, %v2469_v42, 0.0 }
 0x308   :  { %360 = vadd.xlane.f32.xlu0 %v359_v6 }
 0x309   :  { %v2471_v44 = vpop.eup %2007 }
 0x30a   :  { %v368_v19 = vsel %vm307_vm2, %v2471_v44, 0.0  ;;  %v2477_v45 = vpop.eup %2009 }
 0x30b   :  { %369 = vadd.xlane.f32.xlu1 %v368_v19  ;;  %v664_v47 = vsel %vm307_vm2, %v2477_v45, 0.0  ;;  %v2481_v52 = vpop.eup %2011 }
 0x30c   :  { %650 = vadd.xlane.f32.xlu0 %v649_v18  ;;  %v377_v23 = vsel %vm307_vm2, %v2481_v52, 0.0 }
 0x310   :  { %665 = vadd.xlane.f32.xlu0 %v664_v47 }
 0x311   :  { %v2485_v22 = vpop.eup %2013 }
 0x312   :  { %v371_v54 = vsel %vm307_vm2, %v2485_v22, 0.0 }
 0x314   :  { %378 = vadd.xlane.f32.xlu0 %v377_v23 }
 0x318   :  { %372 = vadd.xlane.f32.xlu0 %v371_v54 }
 0x32c   :  { %v612_v59 = vpop.xlane.xlu1 %611 }
 0x32d   :  { %v626_v62 = vsub.f32 %v2407_v9, %v612_v59 }
 0x32e   :  { %690 = vrot.lane.b32.xlu0 %v2249_v48, %s2128_s1 }
 0x32f   :  { %v638_v33 = vmul.f32 1.442695, %v626_v62 }
 0x330   :  { %v401_v40 = vpop.permute.xlu1 %400 }
 0x331   :  { %2015 = vpow2.f32 %v638_v33  ;;  %1765 = vmatprep.subr.bf16.mxu1 %v401_v40 }
 0x332   :  { %1766 = vmatpush3.bf16.msra.mxu1 %v401_v40  ;;  %2017 = vpow2.f32 %v644_v63 }
 0x334   :  { %v2493_v41 = vpop.permute.xlu1 %696  ;;  %v615_v2 = vpop.xlane.xlu0 %614 }
 0x335   :  { %v627_v3 = vsub.f32 %v2412_v12, %v615_v2  ;;  %1791 = vmatprep.subr.bf16.mxu1 %v2493_v41 }
 0x337   :  { %v640_v1 = vmul.f32 1.442695, %v627_v3 }
 0x338   :  { %v695_v13 = vpop.permute.xlu1 %694 }
 0x339   :  { %2019 = vpow2.f32 %v640_v1 }
 0x33c   :  { %v693_v15 = vpop.permute.xlu1 %692 }
 0x33e   :  { %v2497_v9 = vpop.eup %2015 }
 0x33f   :  { %v658_v4 = vsel %vm307_vm2, %v2497_v9, 0.0  ;;  %v2501_v49 = vpop.eup %2017 }
 0x340   :  { %659 = vadd.xlane.f32.xlu1 %v658_v4  ;;  %v667_v10 = vsel %vm307_vm2, %v2501_v49, 0.0 }
 0x344   :  { %668 = vadd.xlane.f32.xlu1 %v667_v10 }
 0x346   :  { %v2505_v11 = vpop.eup %2019 }
 0x347   :  { %v661_v12 = vsel %vm307_vm2, %v2505_v11, 0.0 }
 0x34d   :  { %662 = vadd.xlane.f32.xlu0 %v661_v12 }
 0x355   :  { %793 = vrot.lane.b32.xlu1 %v2241_v43, %s2129_s20 }
 0x359   :  { %791 = vrot.lane.b32.xlu1 %v2245_v46, %s2129_s20 }
 0x35d   :  { %787 = vrot.lane.b32.xlu1 %v2249_v48, %s2129_s20 }
 0x361   :  { %781 = vrot.lane.b32.xlu1 %v2253_v50, %s2130_s21 }
 0x363   :  { %789 = vrot.lane.b32.xlu0 %v2234_v32, %s2129_s20 }
 0x365   :  { %785 = vrot.lane.b32.xlu1 %v2257_v53, %s2130_s21 }
 0x367   :  { %779 = vrot.lane.b32.xlu0 %v2237_v38, %s2130_s21 }
 0x369   :  { %982 = vrot.lane.b32.xlu1 %v2241_v43, %s2131_s22 }
 0x36b   :  { %783 = vrot.lane.b32.xlu0 %v2261_v56, %s2130_s21 }
 0x380   :  { %v654_v51 = vpop.xlane.xlu0 %653 }
 0x381   :  { %v364_v20 = vpop.xlane.xlu1 %363 }
 0x384   :  { %v648_v16 = vpop.xlane.xlu0 %647 }
 0x385   :  { %v358_v24 = vpop.xlane.xlu1 %357 }
 0x388   :  { %v367_v21 = vpop.xlane.xlu0 %366 }
 0x389   :  { %2021 = vrcp.f32 %v367_v21 }
 0x38a   :  { %2023 = vrcp.f32 %v358_v24 }
 0x38b   :  { %2025 = vrcp.f32 %v364_v20 }
 0x38c   :  { %v376_v34 = vpop.xlane.xlu1 %375 }
 0x38d   :  { %v657_v25 = vpop.xlane.xlu0 %656 }
 0x391   :  { %v361_v61 = vpop.xlane.xlu0 %360 }
 0x392   :  { %2027 = vrcp.f32 %v361_v61 }
 0x393   :  { %2029 = vrcp.f32 %v648_v16 }
 0x394   :  { %v370_v36 = vpop.xlane.xlu1 %369 }
 0x395   :  { %v651_v30 = vpop.xlane.xlu0 %650  ;;  %2031 = vrcp.f32 %v370_v36 }
 0x396   :  { %v2022_v6 = vpop.eup %2021 }
 0x397   :  { %v2024_v19 = vpop.eup %2023  ;;  %v391_v54 = vmul.f32 %v2022_v6, %v2452_v60 }
 0x398   :  { %v2026_v47 = vpop.eup %2025  ;;  %v388_v57 = vmul.f32 %v2024_v19, %v2445_v8 }
 0x399   :  { %v2519_v35 = vpop.xlane.xlu0 %665  ;;  %v390_v62 = vmul.f32 %v2026_v47, %v2435_v0 }
 0x39b   :  { %v397_v40 = vpack.c.bf16 %v391_v54, %v390_v62 }
 0x39d   :  { %v379_v18 = vpop.xlane.xlu0 %378 }
 0x39e   :  { %2033 = vrcp.f32 %v379_v18 }
 0x39f   :  { %v2028_v23 = vpop.eup %2027  ;;  %2035 = vrcp.f32 %v651_v30 }
 0x3a0   :  { %v389_v59 = vmul.f32 %v2028_v23, %v2465_v39  ;;  %2037 = vrcp.f32 %v376_v34  ;;  %v2030_v60 = vpop.eup %2029 }
 0x3a1   :  { %v373_v63 = vpop.xlane.xlu0 %372  ;;  %v678_v16 = vmul.f32 %v2030_v60, %v2443_v7 }
 0x3a2   :  { %2039 = vrcp.f32 %v373_v63  ;;  %v396_v33 = vpack.c.bf16 %v389_v59, %v388_v57  ;;  %v2032_v8 = vpop.eup %2031 }
 0x3a3   :  { %2041 = vrcp.f32 %v657_v25  ;;  %v392_v10 = vmul.f32 %v2032_v8, %v2471_v44 }
 0x3a4   :  { %1767 = vmatprep.mubr.msk.bf16.mxu1 %vm307_vm2, %v396_v33  ;;  %2043 = vrcp.f32 %v654_v51 }
 0x3a5   :  { %1768 = vmatmul.mubr.msk.bf16.vlgmr.msra.gmra.mxu1 %vm307_vm2, %v397_v40  ;;  %v691_v3 = vpop.permute.xlu0 %690 }
 0x3a6   :  { %1792 = vmatpush3.bf16.msra.mxu1 %v2493_v41 }
 0x3a7   :  { %1793 = vmatprep.subr.bf16.mxu1 %v695_v13 }
 0x3aa   :  { %1794 = vmatpush3.bf16.msra.mxu1 %v695_v13 }
 0x3ab   :  { %1795 = vmatprep.subr.bf16.mxu1 %v693_v15  ;;  %v2034_v39 = vpop.eup %2033 }
 0x3ac   :  { %v2036_v0 = vpop.eup %2035  ;;  %v395_v4 = vmul.f32 %v2034_v39, %v2481_v52 }
 0x3ad   :  { %v2038_v2 = vpop.eup %2037  ;;  %v679_v12 = vmul.f32 %v2036_v0, %v2469_v42 }
 0x3ae   :  { %1796 = vmatpush3.bf16.msra.mxu1 %v693_v15  ;;  %v394_v51 = vmul.f32 %v2038_v2, %v2457_v27 }
 0x3af   :  { %v2040_v1 = vpop.eup %2039  ;;  %1797 = vmatprep.subr.bf16.mxu1 %v691_v3  ;;  %v686_v15 = vpack.c.bf16 %v679_v12, %v678_v16 }
 0x3b0   :  { %v393_v41 = vmul.f32 %v2040_v1, %v2485_v22  ;;  %v399_v20 = vpack.c.bf16 %v395_v4, %v394_v51  ;;  %v2042_v21 = vpop.eup %2041 }
 0x3b1   :  { %v2044_v52 = vpop.eup %2043  ;;  %v681_v44 = vmul.f32 %v2042_v21, %v2459_v28 }
 0x3b2   :  { %1798 = vmatpush3.bf16.msra.mxu1 %v691_v3  ;;  %v398_v13 = vpack.c.bf16 %v393_v41, %v392_v10  ;;  %v680_v42 = vmul.f32 %v2044_v52, %v2433_v31 }
 0x3b4   :  { %1771 = vmatprep.mubr.msk.bf16.mxu1 %vm307_vm2, %v398_v13  ;;  %v687_v22 = vpack.c.bf16 %v681_v44, %v680_v42 }
 0x3b5   :  { %1772 = vmatmul.mubr.msk.bf16.gmra.mxu1 %vm307_vm2, %v399_v20 }
 0x3b6   :  { %1799 = vmatprep.mubr.msk.bf16.mxu1 %vm307_vm2, %v686_v15 }
 0x3bd   :  { %1800 = vmatmul.mubr.msk.bf16.vlgmr.msra.gmra.mxu1 %vm307_vm2, %v687_v22 }
 0x3c9   :  { %v660_v27 = vpop.xlane.xlu1 %659 }
 0x3cd   :  { %v669_v24 = vpop.xlane.xlu1 %668 }
 0x3ce   :  { %2045 = vrcp.f32 %v669_v24 }
 0x3cf   :  { %2047 = vrcp.f32 %v660_v27 }
 0x3d0   :  { %2049 = vrcp.f32 %v2519_v35 }
 0x3d1   :  { %v794_v7 = vpop.permute.xlu1 %793 }
 0x3d2   :  { %v817_v25 = vsel %vm217_vm1, %v794_v7, 0  ;;  %1897 = vmatprep.subr.msk.bf16.mxu1 %vm217_vm1, %v794_v7 }
 0x3d3   :  { %1808 = vmatpush3.bf16.xpose.msra.mxu1 %v817_v25 }
 0x3d5   :  { %v792_v61 = vpop.permute.xlu1 %791 }
 0x3d6   :  { %v663_v30 = vpop.xlane.xlu0 %662  ;;  %1898 = vmatprep.subr.msk.bf16.mxu1 %vm217_vm1, %v792_v61  ;;  %v814_v28 = vsel %vm217_vm1, %v792_v61, 0 }
 0x3d7   :  { %2051 = vrcp.f32 %v663_v30 }
 0x3d9   :  { %v788_v31 = vpop.permute.xlu1 %787 }
 0x3da   :  { %v790_v34 = vpop.permute.xlu0 %789  ;;  %v808_v60 = vsel %vm217_vm1, %v788_v31, 0 }
 0x3db   :  { %1810 = vmatpush3.bf16.xpose.msra.mxu1 %v814_v28  ;;  %v2046_v6 = vpop.eup %2045  ;;  %v811_v47 = vsel %vm217_vm1, %v790_v34, 0 }
 0x3dc   :  { %1899 = vmatprep.subr.msk.bf16.mxu1 %vm217_vm1, %v790_v34  ;;  %v2048_v18 = vpop.eup %2047  ;;  %v685_v54 = vmul.f32 %v2046_v6, %v2501_v49 }
 0x3dd   :  { %v782_v36 = vpop.permute.xlu1 %781  ;;  %v2050_v23 = vpop.eup %2049  ;;  %v682_v59 = vmul.f32 %v2048_v18, %v2497_v9 }
 0x3de   :  { %v684_v63 = vmul.f32 %v2050_v23, %v2477_v45  ;;  %v780_v8 = vpop.permute.xlu0 %779 }
 0x3e0   :  { %v689_v40 = vpack.c.bf16 %v685_v54, %v684_v63 }
 0x3e1   :  { %v786_v19 = vpop.permute.xlu1 %785 }
 0x3e2   :  { %v784_v49 = vpop.permute.xlu0 %783 }
 0x3e3   :  { %1812 = vmatpush3.bf16.xpose.msra.mxu1 %v811_v47 }
 0x3e4   :  { %v2052_v35 = vpop.eup %2051  ;;  %1900 = vmatprep.subr.msk.bf16.mxu1 %vm217_vm1, %v788_v31 }
 0x3e5   :  { %v983_v57 = vpop.permute.xlu1 %982  ;;  %v683_v62 = vmul.f32 %v2052_v35, %v2505_v11 }
 0x3e6   :  { %1823 = vmatprep.subr.bf16.mxu0 %v983_v57 }
 0x3e7   :  { %1824 = vmatpush3.bf16.msra.mxu0 %v983_v57  ;;  %v688_v33 = vpack.c.bf16 %v683_v62, %v682_v59 }
 0x3e9   :  { %1803 = vmatprep.mubr.msk.bf16.mxu1 %vm307_vm2, %v688_v33 }
 0x3ea   :  { %1804 = vmatmul.mubr.msk.bf16.gmra.mxu1 %vm307_vm2, %v689_v40 }
 0x3eb   :  { %1815 = vmatprep.mubr.msk.bf16.mxu1 %vm217_vm1, %v780_v8  ;;  %1814 = vmatpush3.bf16.xpose.msra.mxu1 %v808_v60 }
 0x3f2   :  { %1816 = vmatmul.mubr.msk.bf16.vlgmr.msra.gmra.mxu1 %vm217_vm1, %v782_v36 }
 0x3f3   :  { %1819 = vmatprep.mubr.msk.bf16.mxu1 %vm217_vm1, %v784_v49 }
 0x3fa   :  { %1820 = vmatmul.mubr.msk.bf16.gmra.mxu1 %vm217_vm1, %v786_v19 }
 0x465   :  { %v2559_v45 = vpop.f32.mrf.mxu1 }
 0x467   :  { %v2561_v9 = vpop.f32.mrf.mxu1 }
 0x469   :  { %v2563_v11 = vpop.f32.mrf.mxu1 }
 0x46b   :  { %v2565_v39 = vpop.f32.mrf.mxu1 }
 0x475   :  { %v2567_v0 = vpop.f32.mrf.mxu1 }
 0x477   :  { %v2569_v2 = vpop.f32.mrf.mxu1 }
 0x479   :  { %v2571_v3 = vpop.f32.mrf.mxu1 }
 0x47b   :  { %v2573_v1 = vpop.f32.mrf.mxu1 }
 0x47d   :  { %v2575_v4 = vpop.f32.mrf.mxu1 }
 0x47f   :  { %v2577_v10 = vpop.f32.mrf.mxu1 }
 0x481   :  { %v2579_v41 = vpop.f32.mrf.mxu1 }
 0x482   :  { %v1926_v12 = vpack.i.bf16 %v2579_v41, %v2575_v4 }
 0x483   :  { %v2583_v51 = vpop.f32.mrf.mxu1 }
 0x484   :  { %v1921_v13 = vpack.i.bf16 %v2583_v51, %v2577_v10 }
 0x4aa   :  { %v2587_v16 = vpop.f32.mrf.mxu1 }
 0x4ac   :  { %v2589_v20 = vpop.f32.mrf.mxu1 }
 0x4ae   :  { %v2591_v21 = vpop.f32.mrf.mxu1 }
 0x4af   :  { %v1946_v15 = vpack.i.bf16 %v2591_v21, %v2587_v16 }
 0x4b0   :  { %v2595_v52 = vpop.f32.mrf.mxu1 }
 0x4b1   :  { %v1941_v44 = vpack.i.bf16 %v2595_v52, %v2589_v20 }
 0x4b2   :  { %v1817_v42 = vpop.f32.mrf.mxu1 }
 0x4b3   :  { %v862_v22 = vadd.f32 %v1817_v42, %v2295_v14 }
 0x4b4   :  { %v853_v27 = vpop.f32.mrf.mxu1 }
 0x4b5   :  { %v854_v24 = vadd.f32 %v853_v27, %v2300_v17  ;;  %v890_v7 = vsel %vm307_vm2, %v862_v22, -inf }
 0x4b6   :  { %891 = vmax.xlane.f32.xlu0 %v890_v7  ;;  %v1818_v25 = vpop.f32.mrf.mxu1 }
 0x4b7   :  { %v865_v30 = vadd.f32 %v1818_v25, %v2321_v26  ;;  %v884_v28 = vsel %vm307_vm2, %v854_v24, -inf }
 0x4b8   :  { %v856_v61 = vpop.f32.mrf.mxu1 }
 0x4b9   :  { %v857_v31 = vadd.f32 %v856_v61, %v2326_v29  ;;  %v893_v6 = vsel %vm307_vm2, %v865_v30, -inf }
 0x4ba   :  { %885 = vmax.xlane.f32.xlu0 %v884_v28  ;;  %v1821_v34 = vpop.f32.mrf.mxu1 }
 0x4bb   :  { %v2606_v36 = vadd.f32 %v1821_v34, %v2341_v37  ;;  %v887_v14 = vsel %vm307_vm2, %v857_v31, -inf }
 0x4bc   :  { %888 = vmax.xlane.f32.xlu1 %v887_v14  ;;  %v869_v17 = vpop.f32.mrf.mxu1 }
 0x4bd   :  { %v870_v18 = vadd.f32 %v869_v17, %v2366_v55  ;;  %v902_v29 = vsel %vm307_vm2, %v2606_v36, -inf }
 0x4be   :  { %894 = vmax.xlane.f32.xlu0 %v893_v6  ;;  %v1822_v19 = vpop.f32.mrf.mxu1 }
 0x4bf   :  { %v881_v26 = vadd.f32 %v1822_v19, %v2371_v58  ;;  %v896_v35 = vsel %vm307_vm2, %v870_v18, -inf }
 0x4c0   :  { %903 = vmax.xlane.f32.xlu1 %v902_v29  ;;  %v872_v47 = vpop.f32.mrf.mxu1 }
 0x4c1   :  { %v873_v37 = vadd.f32 %v872_v47, %v2393_v5  ;;  %v905_v23 = vsel %vm307_vm2, %v881_v26, -inf }
 0x4c2   :  { %906 = vmax.xlane.f32.xlu0 %v905_v23 }
 0x4c3   :  { %v899_v54 = vsel %vm307_vm2, %v873_v37, -inf }
 0x4c4   :  { %897 = vmax.xlane.f32.xlu1 %v896_v35 }
 0x4c6   :  { %900 = vmax.xlane.f32.xlu0 %v899_v54 }
 0x4d5   :  { %978 = vrot.lane.b32.xlu1 %v2234_v32, %s2131_s22 }
 0x4dc   :  { %980 = vrot.lane.b32.xlu0 %v2245_v46, %s2131_s22 }
 0x53f   :  { %v892_v55 = vpop.xlane.xlu0 %891 }
 0x540   :  { %v910_v58 = vsub.f32 %v862_v22, %v892_v55 }
 0x542   :  { %v920_v57 = vmul.f32 1.442695, %v910_v58 }
 0x543   :  { %v886_v59 = vpop.xlane.xlu0 %885 }
 0x544   :  { %2053 = vpow2.f32 %v920_v57  ;;  %v908_v62 = vsub.f32 %v854_v24, %v886_v59 }
 0x545   :  { %v889_v63 = vpop.xlane.xlu1 %888 }
 0x546   :  { %v916_v33 = vmul.f32 1.442695, %v908_v62  ;;  %v909_v40 = vsub.f32 %v857_v31, %v889_v63 }
 0x547   :  { %v895_v60 = vpop.xlane.xlu0 %894 }
 0x548   :  { %2055 = vpow2.f32 %v916_v33  ;;  %v911_v8 = vsub.f32 %v865_v30, %v895_v60  ;;  %v918_v42 = vmul.f32 1.442695, %v909_v40 }
 0x549   :  { %v904_v49 = vpop.xlane.xlu1 %903 }
 0x54a   :  { %v922_v27 = vmul.f32 1.442695, %v911_v8  ;;  %v914_v47 = vsub.f32 %v2606_v36, %v904_v49 }
 0x54b   :  { %v907_v7 = vpop.xlane.xlu0 %906 }
 0x54c   :  { %2057 = vpow2.f32 %v922_v27  ;;  %v915_v23 = vsub.f32 %v881_v26, %v907_v7  ;;  %v928_v54 = vmul.f32 1.442695, %v914_v47 }
 0x54d   :  { %2059 = vpow2.f32 %v918_v42  ;;  %v898_v25 = vpop.xlane.xlu1 %897 }
 0x54e   :  { %v912_v29 = vsub.f32 %v870_v18, %v898_v25  ;;  %v930_v55 = vmul.f32 1.442695, %v915_v23 }
 0x54f   :  { %v901_v61 = vpop.xlane.xlu0 %900 }
 0x550   :  { %v924_v35 = vmul.f32 1.442695, %v912_v29  ;;  %v913_v58 = vsub.f32 %v873_v37, %v901_v61 }
 0x551   :  { %v2622_v28 = vpop.eup %2053  ;;  %v979_v34 = vpop.permute.xlu1 %978 }
 0x552   :  { %v938_v22 = vsel %vm307_vm2, %v2622_v28, 0.0  ;;  %2061 = vpow2.f32 %v924_v35  ;;  %v926_v57 = vmul.f32 1.442695, %v913_v58 }
 0x553   :  { %939 = vadd.xlane.f32.xlu1 %v938_v22  ;;  %v981_v24 = vpop.permute.xlu0 %980  ;;  %2063 = vpow2.f32 %v928_v54 }
 0x554   :  { %1825 = vmatprep.subr.bf16.mxu0 %v981_v24  ;;  %2065 = vpow2.f32 %v930_v55 }
 0x555   :  { %v2626_v31 = vpop.eup %2055  ;;  %1826 = vmatpush3.bf16.msra.mxu0 %v981_v24  ;;  %2067 = vpow2.f32 %v926_v57 }
 0x556   :  { %1827 = vmatprep.subr.bf16.mxu0 %v979_v34  ;;  %v932_v30 = vsel %vm307_vm2, %v2626_v31, 0.0 }
 0x557   :  { %933 = vadd.xlane.f32.xlu1 %v932_v30 }
 0x559   :  { %v2058_v14 = vpop.eup %2057  ;;  %1828 = vmatpush3.bf16.msra.mxu0 %v979_v34 }
 0x55a   :  { %v941_v17 = vsel %vm307_vm2, %v2058_v14, 0.0  ;;  %v2060_v6 = vpop.eup %2059 }
 0x55b   :  { %942 = vadd.xlane.f32.xlu0 %v941_v17  ;;  %v935_v19 = vsel %vm307_vm2, %v2060_v6, 0.0 }
 0x55f   :  { %936 = vadd.xlane.f32.xlu0 %v935_v19  ;;  %v2639_v59 = vpop.eup %2061 }
 0x560   :  { %v2641_v62 = vpop.eup %2063  ;;  %v944_v63 = vsel %vm307_vm2, %v2639_v59, 0.0 }
 0x561   :  { %v2645_v18 = vpop.eup %2065  ;;  %v950_v36 = vsel %vm307_vm2, %v2641_v62, 0.0 }
 0x562   :  { %v953_v26 = vsel %vm307_vm2, %v2645_v18, 0.0  ;;  %v2651_v37 = vpop.eup %2067 }
 0x563   :  { %v947_v33 = vsel %vm307_vm2, %v2651_v37, 0.0 }
 0x568   :  { %1079 = vrot.lane.b32.xlu1 %v2241_v43, %s2132_s23 }
 0x56c   :  { %1077 = vrot.lane.b32.xlu1 %v2245_v46, %s2132_s23 }
 0x575   :  { %976 = vrot.lane.b32.xlu0 %v2249_v48, %s2131_s22 }
 0x590   :  { %945 = vadd.xlane.f32.xlu1 %v944_v63 }
 0x594   :  { %951 = vadd.xlane.f32.xlu0 %v950_v36  ;;  %954 = vadd.xlane.f32.xlu1 %v953_v26 }
 0x598   :  { %948 = vadd.xlane.f32.xlu0 %v947_v33 }
 0x5a5   :  { %1073 = vrot.lane.b32.xlu1 %v2249_v48, %s2132_s23 }
 0x5a9   :  { %1067 = vrot.lane.b32.xlu1 %v2253_v50, %s2133_s24 }
 0x5ad   :  { %1071 = vrot.lane.b32.xlu1 %v2257_v53, %s2133_s24 }
 0x5ae   :  { %1075 = vrot.lane.b32.xlu0 %v2234_v32, %s2132_s23 }
 0x5b2   :  { %1065 = vrot.lane.b32.xlu0 %v2237_v38, %s2133_s24 }
 0x5b6   :  { %1069 = vrot.lane.b32.xlu0 %v2261_v56, %s2133_s24 }
 0x5dc   :  { %v940_v40 = vpop.xlane.xlu1 %939 }
 0x5e0   :  { %v934_v60 = vpop.xlane.xlu1 %933 }
 0x5e4   :  { %v943_v8 = vpop.xlane.xlu0 %942  ;;  %v1080_v50 = vpop.permute.xlu1 %1079 }
 0x5e5   :  { %2069 = vrcp.f32 %v943_v8  ;;  %v1103_v30 = vsel %vm217_vm1, %v1080_v50, 0 }
 0x5e6   :  { %2071 = vrcp.f32 %v934_v60 }
 0x5e7   :  { %2073 = vrcp.f32 %v940_v40 }
 0x5e8   :  { %v937_v49 = vpop.xlane.xlu0 %936  ;;  %v1078_v17 = vpop.permute.xlu1 %1077 }
 0x5e9   :  { %2075 = vrcp.f32 %v937_v49  ;;  %v1100_v19 = vsel %vm217_vm1, %v1078_v17, 0 }
 0x5ec   :  { %v977_v42 = vpop.permute.xlu0 %976 }
 0x5ed   :  { %1829 = vmatprep.subr.bf16.mxu0 %v977_v42 }
 0x5ee   :  { %1830 = vmatpush3.bf16.msra.mxu0 %v977_v42 }
 0x5ef   :  { %1901 = vmatprep.subr.msk.bf16.mxu0 %vm217_vm1, %v1080_v50 }
 0x5f2   :  { %v2070_v53 = vpop.eup %2069 }
 0x5f3   :  { %v2072_v27 = vpop.eup %2071  ;;  %v967_v25 = vmul.f32 %v2070_v53, %v2058_v14 }
 0x5f4   :  { %v2074_v7 = vpop.eup %2073  ;;  %v964_v56 = vmul.f32 %v2072_v27, %v2626_v31 }
 0x5f5   :  { %v966_v22 = vmul.f32 %v2074_v7, %v2622_v28 }
 0x5f6   :  { %v2076_v38 = vpop.eup %2075 }
 0x5f7   :  { %v965_v61 = vmul.f32 %v2076_v38, %v2060_v6  ;;  %v973_v34 = vpack.c.bf16 %v967_v25, %v966_v22 }
 0x5f9   :  { %v972_v24 = vpack.c.bf16 %v965_v61, %v964_v56 }
 0x5fb   :  { %1831 = vmatprep.mubr.msk.bf16.mxu0 %vm307_vm2, %v972_v24 }
 0x5fc   :  { %1832 = vmatmul.mubr.msk.bf16.vlgmr.msra.gmra.mxu0 %vm307_vm2, %v973_v34 }
 0x5fd   :  { %1840 = vmatpush3.bf16.xpose.msra.mxu0 %v1103_v30  ;;  %v2117_v30 = vld [vmem:[%s2883_s5] sm:$0xff] }
 0x5fe   :  { %1902 = vmatprep.subr.msk.bf16.mxu0 %vm217_vm1, %v1078_v17 }
 0x605   :  { %1842 = vmatpush3.bf16.xpose.msra.mxu0 %v1100_v19 }
 0x619   :  { %v946_v14 = vpop.xlane.xlu1 %945 }
 0x61d   :  { %v955_v31 = vpop.xlane.xlu1 %954  ;;  %v952_v6 = vpop.xlane.xlu0 %951 }
 0x61e   :  { %2077 = vrcp.f32 %v955_v31 }
 0x61f   :  { %2079 = vrcp.f32 %v952_v6 }
 0x620   :  { %2081 = vrcp.f32 %v946_v14  ;;  %v2118_v14 = vld [vmem:[%s2883_s5 + $0x10] sm:$0xff] }
 0x621   :  { %v949_v28 = vpop.xlane.xlu0 %948  ;;  %v1074_v23 = vpop.permute.xlu1 %1073 }
 0x622   :  { %2083 = vrcp.f32 %v949_v28  ;;  %v1094_v58 = vsel %vm217_vm1, %v1074_v23, 0 }
 0x625   :  { %v1076_v29 = vpop.permute.xlu0 %1075  ;;  %v1068_v49 = vpop.permute.xlu1 %1067 }
 0x626   :  { %v1097_v47 = vsel %vm217_vm1, %v1076_v29, 0  ;;  %1903 = vmatprep.subr.msk.bf16.mxu0 %vm217_vm1, %v1076_v29  ;;  %v2119_v29 = vld [vmem:[%s2883_s5 + $0x8] sm:$0xff] }
 0x627   :  { %1844 = vmatpush3.bf16.xpose.msra.mxu0 %v1097_v47 }
 0x628   :  { %1904 = vmatprep.subr.msk.bf16.mxu0 %vm217_vm1, %v1074_v23 }
 0x629   :  { %v1066_v8 = vpop.permute.xlu0 %1065 }
 0x62b   :  { %v2078_v35 = vpop.eup %2077 }
 0x62c   :  { %v2080_v54 = vpop.eup %2079  ;;  %v971_v36 = vmul.f32 %v2078_v35, %v2645_v18  ;;  %v2120_v35 = vld [vmem:[%s2883_s5 + $0x18] sm:$0xff] }
 0x62d   :  { %v2082_v55 = vpop.eup %2081  ;;  %v970_v63 = vmul.f32 %v2080_v54, %v2641_v62  ;;  %v1070_v42 = vpop.permute.xlu0 %1069 }
 0x62e   :  { %v968_v26 = vmul.f32 %v2082_v55, %v2639_v59  ;;  %v1072_v62 = vpop.permute.xlu1 %1071 }
 0x62f   :  { %v2084_v57 = vpop.eup %2083  ;;  %1846 = vmatpush3.bf16.xpose.msra.mxu0 %v1094_v58  ;;  %v975_v60 = vpack.c.bf16 %v971_v36, %v970_v63  ;;  %v2121_v63 = vld [vmem:[%s2883_s5 + $0x20] sm:$0xff] }
 0x630   :  { %v969_v33 = vmul.f32 %v2084_v57, %v2651_v37 }
 0x632   :  { %v974_v40 = vpack.c.bf16 %v969_v33, %v968_v26  ;;  %v2122_v33 = vld [vmem:[%s2883_s5 + $0x30] sm:$0xff] }
 0x634   :  { %1835 = vmatprep.mubr.msk.bf16.mxu0 %vm307_vm2, %v974_v40 }
 0x635   :  { %1836 = vmatmul.mubr.msk.bf16.gmra.mxu0 %vm307_vm2, %v975_v60 }
 0x636   :  { %1847 = vmatprep.mubr.msk.bf16.mxu0 %vm217_vm1, %v1066_v8 }
 0x63d   :  { %1848 = vmatmul.mubr.msk.bf16.vlgmr.msra.gmra.mxu0 %vm217_vm1, %v1068_v49 }
 0x63e   :  { %1851 = vmatprep.mubr.msk.bf16.mxu0 %vm217_vm1, %v1070_v42 }
 0x645   :  { %1852 = vmatmul.mubr.msk.bf16.gmra.mxu0 %vm217_vm1, %v1072_v62  ;;  %v2123_v62 = vld [vmem:[%s2883_s5 + $0x38] sm:$0xff]  ;;  %s2135_s5 = smov 8  }
 0x6bc   :  { %v2685_v59 = vpop.f32.mrf.mxu0 }
 0x6be   :  { %v2687_v18 = vpop.f32.mrf.mxu0 }
 0x6c0   :  { %v2689_v37 = vpop.f32.mrf.mxu0 }
 0x6c1   :  { %v1936_v50 = vpack.i.bf16 %v2689_v37, %v2685_v59 }
 0x6c2   :  { %v2693_v53 = vpop.f32.mrf.mxu0 }
 0x6c3   :  { %v1931_v27 = vpack.i.bf16 %v2693_v53, %v2687_v18 }
 0x6f5   :  { %v2697_v7 = vpop.f32.mrf.mxu0 }
 0x6f7   :  { %v2699_v38 = vpop.f32.mrf.mxu0 }
 0x6f9   :  { %v2701_v25 = vpop.f32.mrf.mxu0 }
 0x6fa   :  { %v1966_v56 = vpack.i.bf16 %v2701_v25, %v2697_v7 }
 0x6fb   :  { %v2705_v61 = vpop.f32.mrf.mxu0 }
 0x6fc   :  { %v1961_v22 = vpack.i.bf16 %v2705_v61, %v2699_v38 }
 0x6fd   :  { %v1849_v24 = vpop.f32.mrf.mxu0 }
 0x6fe   :  { %v1148_v31 = vadd.f32 %v2118_v14, %v1849_v24 }
 0x6ff   :  { %v1139_v34 = vpop.f32.mrf.mxu0 }
 0x700   :  { %v1140_v17 = vadd.f32 %v2117_v30, %v1139_v34  ;;  %v1176_v58 = vsel %vm307_vm2, %v1148_v31, -inf }
 0x701   :  { %v1850_v19 = vpop.f32.mrf.mxu0 }
 0x702   :  { %v1170_v6 = vsel %vm307_vm2, %v1140_v17, -inf  ;;  %v1151_v54 = vadd.f32 %v2120_v35, %v1850_v19 }
 0x703   :  { %v1142_v28 = vpop.f32.mrf.mxu0  ;;  %1171 = vmax.xlane.f32.xlu0 %v1170_v6 }
 0x704   :  { %v1143_v47 = vadd.f32 %v2119_v29, %v1142_v28  ;;  %v1179_v60 = vsel %vm307_vm2, %v1151_v54, -inf }
 0x705   :  { %v1853_v23 = vpop.f32.mrf.mxu0 }
 0x706   :  { %v1173_v55 = vsel %vm307_vm2, %v1143_v47, -inf  ;;  %v1164_v40 = vadd.f32 %v2122_v33, %v1853_v23 }
 0x707   :  { %1174 = vmax.xlane.f32.xlu1 %v1173_v55  ;;  %1177 = vmax.xlane.f32.xlu0 %v1176_v58  ;;  %v1155_v57 = vpop.f32.mrf.mxu0 }
 0x708   :  { %v1156_v36 = vadd.f32 %v2121_v63, %v1155_v57  ;;  %v1188_v30 = vsel %vm307_vm2, %v1164_v40, -inf }
 0x709   :  { %v1854_v26 = vpop.f32.mrf.mxu0 }
 0x70a   :  { %v1182_v8 = vsel %vm307_vm2, %v1156_v36, -inf  ;;  %v1167_v24 = vadd.f32 %v2123_v62, %v1854_v26 }
 0x70b   :  { %1180 = vmax.xlane.f32.xlu0 %v1179_v60  ;;  %v1158_v49 = vpop.f32.mrf.mxu0  ;;  %1183 = vmax.xlane.f32.xlu1 %v1182_v8 }
 0x70c   :  { %v1159_v42 = vadd.f32 %v1158_v49, %v2393_v5  ;;  %v1191_v19 = vsel %vm307_vm2, %v1167_v24, -inf }
 0x70e   :  { %v1185_v34 = vsel %vm307_vm2, %v1159_v42, -inf }
 0x70f   :  { %1186 = vmax.xlane.f32.xlu0 %v1185_v34  ;;  %1189 = vmax.xlane.f32.xlu1 %v1188_v30 }
 0x713   :  { %1192 = vmax.xlane.f32.xlu0 %v1191_v19 }
 0x720   :  { %1268 = vrot.lane.b32.xlu1 %v2241_v43, %s2134_s13 }
 0x78c   :  { %v1172_v14 = vpop.xlane.xlu0 %1171 }
 0x78d   :  { %v1194_v5 = vsub.f32 %v1140_v17, %v1172_v14 }
 0x78f   :  { %v1202_v35 = vmul.f32 1.442695, %v1194_v5 }
 0x790   :  { %v1175_v6 = vpop.xlane.xlu1 %1174  ;;  %v1178_v28 = vpop.xlane.xlu0 %1177 }
 0x791   :  { %v1196_v29 = vsub.f32 %v1148_v31, %v1178_v28  ;;  %v1195_v55 = vsub.f32 %v1143_v47, %v1175_v6 }
 0x793   :  { %v1206_v23 = vmul.f32 1.442695, %v1196_v29  ;;  %v1204_v33 = vmul.f32 1.442695, %v1195_v55 }
 0x794   :  { %v1184_v58 = vpop.xlane.xlu1 %1183  ;;  %v1181_v57 = vpop.xlane.xlu0 %1180 }
 0x795   :  { %v1197_v63 = vsub.f32 %v1151_v54, %v1181_v57  ;;  %2085 = vpow2.f32 %v1206_v23  ;;  %v1198_v60 = vsub.f32 %v1156_v36, %v1184_v58 }
 0x796   :  { %2087 = vpow2.f32 %v1202_v35 }
 0x797   :  { %v1208_v26 = vmul.f32 1.442695, %v1197_v63  ;;  %v1210_v17 = vmul.f32 1.442695, %v1198_v60 }
 0x798   :  { %v1190_v8 = vpop.xlane.xlu1 %1189  ;;  %v1187_v49 = vpop.xlane.xlu0 %1186 }
 0x799   :  { %v1200_v62 = vsub.f32 %v1164_v40, %v1190_v8  ;;  %2089 = vpow2.f32 %v1208_v26  ;;  %v1199_v34 = vsub.f32 %v1159_v42, %v1187_v49 }
 0x79a   :  { %2091 = vpow2.f32 %v1204_v33 }
 0x79b   :  { %v1214_v43 = vmul.f32 1.442695, %v1200_v62  ;;  %v1212_v19 = vmul.f32 1.442695, %v1199_v34 }
 0x79c   :  { %v1269_v31 = vpop.permute.xlu1 %1268  ;;  %v1193_v30 = vpop.xlane.xlu0 %1192 }
 0x79d   :  { %2093 = vpow2.f32 %v1214_v43  ;;  %v1201_v47 = vsub.f32 %v1167_v24, %v1193_v30  ;;  %1855 = vmatprep.subr.bf16.mxu1 %v1269_v31 }
 0x79e   :  { %1856 = vmatpush3.bf16.msra.mxu1 %v1269_v31  ;;  %2095 = vpow2.f32 %v1210_v17 }
 0x79f   :  { %v1216_v54 = vmul.f32 1.442695, %v1201_v47  ;;  %v1987_v47 = vld [vmem:[%s2884_s3 + $0x8] sm:$0xff]  }
 0x7a1   :  { %2097 = vpow2.f32 %v1216_v54  ;;  %v1514_v54 = vsel %vm85_vm0, %v1987_v47, 0 }
 0x7a2   :  { %v2741_v14 = vpop.eup %2085  ;;  %2099 = vpow2.f32 %v1212_v19  ;;  %v1988_v19 = vld [vmem:[%s2884_s3] sm:$0xff]  }
 0x7a3   :  { %v1224_v36 = vsel %vm307_vm2, %v2741_v14, 0.0  ;;  %v2088_v40 = vpop.eup %2087 }
 0x7a4   :  { %1225 = vadd.xlane.f32.xlu1 %v1224_v36  ;;  %v1218_v42 = vsel %vm307_vm2, %v2088_v40, 0.0 }
 0x7a6   :  { %v2090_v5 = vpop.eup %2089 }
 0x7a7   :  { %v1227_v6 = vsel %vm307_vm2, %v2090_v5, 0.0  ;;  %v2092_v24 = vpop.eup %2091 }
 0x7a8   :  { %1219 = vadd.xlane.f32.xlu1 %v1218_v42  ;;  %1228 = vadd.xlane.f32.xlu0 %v1227_v6  ;;  %v1221_v23 = vsel %vm307_vm2, %v2092_v24, 0.0 }
 0x7aa   :  { %v2747_v28 = vpop.eup %2093 }
 0x7ab   :  { %v1236_v29 = vsel %vm307_vm2, %v2747_v28, 0.0  ;;  %v2096_v35 = vpop.eup %2095 }
 0x7ac   :  { %1237 = vadd.xlane.f32.xlu1 %v1236_v29  ;;  %1222 = vadd.xlane.f32.xlu0 %v1221_v23  ;;  %v1230_v57 = vsel %vm307_vm2, %v2096_v35, 0.0 }
 0x7ae   :  { %v2752_v55 = vpop.eup %2097 }
 0x7af   :  { %v1239_v58 = vsel %vm307_vm2, %v2752_v55, 0.0  ;;  %v2100_v63 = vpop.eup %2099 }
 0x7b0   :  { %1231 = vadd.xlane.f32.xlu1 %v1230_v57  ;;  %1240 = vadd.xlane.f32.xlu0 %v1239_v58  ;;  %v1233_v26 = vsel %vm307_vm2, %v2100_v63, 0.0 }
 0x7b4   :  { %1234 = vadd.xlane.f32.xlu0 %v1233_v26 }
 0x7c1   :  { %1264 = vrot.lane.b32.xlu1 %v2234_v32, %s2134_s13 }
 0x7c5   :  { %1262 = vrot.lane.b32.xlu1 %v2249_v48, %s2134_s13 }
 0x7c9   :  { %1927 = vrot.lane.b32.xlu1 %v1926_v12, %s2135_s5 }
 0x7ca   :  { %1266 = vrot.lane.b32.xlu0 %v2245_v46, %s2134_s13 }
 0x7cd   :  { %1937 = vrot.lane.b32.xlu1 %v1936_v50, %s2136_s14 }
 0x7ce   :  { %1922 = vrot.lane.b32.xlu0 %v1921_v13, %s2135_s5 }
 0x7d1   :  { %1947 = vrot.lane.b32.xlu1 %v1946_v15, %s2135_s5 }
 0x7d2   :  { %1932 = vrot.lane.b32.xlu0 %v1931_v27, %s2136_s14 }
 0x7d6   :  { %1942 = vrot.lane.b32.xlu0 %v1941_v44, %s2135_s5 }
 0x82d   :  { %v1226_v32 = vpop.xlane.xlu1 %1225 }
 0x831   :  { %v1220_v46 = vpop.xlane.xlu1 %1219  ;;  %v1229_v48 = vpop.xlane.xlu0 %1228 }
 0x832   :  { %2101 = vrcp.f32 %v1220_v46 }
 0x835   :  { %v1238_v4 = vpop.xlane.xlu1 %1237  ;;  %v1223_v10 = vpop.xlane.xlu0 %1222 }
 0x836   :  { %2103 = vrcp.f32 %v1223_v10 }
 0x837   :  { %2105 = vrcp.f32 %v1229_v48 }
 0x838   :  { %2107 = vrcp.f32 %v1226_v32 }
 0x839   :  { %v1241_v41 = vpop.xlane.xlu0 %1240  ;;  %v1232_v12 = vpop.xlane.xlu1 %1231 }
 0x83a   :  { %2109 = vrcp.f32 %v1232_v12 }
 0x83d   :  { %v1235_v51 = vpop.xlane.xlu0 %1234  ;;  %v1265_v13 = vpop.permute.xlu1 %1264 }
 0x83e   :  { %2111 = vrcp.f32 %v1235_v51 }
 0x83f   :  { %2113 = vrcp.f32 %v1241_v41  ;;  %v2102_v21 = vpop.eup %2101 }
 0x840   :  { %2115 = vrcp.f32 %v1238_v4  ;;  %v1250_v52 = vmul.f32 %v2102_v21, %v2088_v40 }
 0x841   :  { %v1267_v16 = vpop.permute.xlu0 %1266  ;;  %v1263_v18 = vpop.permute.xlu1 %1262 }
 0x842   :  { %1857 = vmatprep.subr.bf16.mxu1 %v1267_v16 }
 0x843   :  { %1858 = vmatpush3.bf16.msra.mxu1 %v1267_v16  ;;  %v2104_v20 = vpop.eup %2103 }
 0x844   :  { %1859 = vmatprep.subr.bf16.mxu1 %v1265_v13  ;;  %v2106_v15 = vpop.eup %2105  ;;  %v1251_v44 = vmul.f32 %v2104_v20, %v2092_v24 }
 0x845   :  { %v2108_v59 = vpop.eup %2107  ;;  %v1253_v50 = vmul.f32 %v2106_v15, %v2090_v5  ;;  %v1928_v57 = vpop.permute.xlu1 %1927 }
 0x846   :  { %v1258_v37 = vpack.c.bf16 %v1251_v44, %v1250_v52  ;;  %v1252_v27 = vmul.f32 %v2108_v59, %v2741_v14  ;;  %v1511_v14 = vsel %vm85_vm0, %v1988_v19, 0  ;;  %v1930_v48 = vunpack.i.h.bf16 %v1928_v57 }
 0x847   :  { %1860 = vmatpush3.bf16.msra.mxu1 %v1265_v13  ;;  %v2110_v53 = vpop.eup %2109  ;;  %v1929_v4 = vunpack.i.l.bf16 %v1928_v57  ;;  %v1636_v57 = vld [vmem:[%s2885_s4] ss:$0 sm:$0xff] }
 0x848   :  { %1861 = vmatprep.subr.bf16.mxu1 %v1263_v18  ;;  %1863 = vmatprep.mubr.msk.bf16.mxu1 %vm307_vm2, %v1258_v37  ;;  %v1259_v60 = vpack.c.bf16 %v1253_v50, %v1252_v27  ;;  %v1254_v49 = vmul.f32 %v2110_v53, %v2096_v35  ;;  %v1450_v13 = vsel %vm217_vm1, %v2563_v11, %v1930_v48 }
 0x849   :  { %v1938_v26 = vpop.permute.xlu1 %1937  ;;  %v1449_v16 = vsel %vm217_vm1, %v2559_v45, %v1929_v4 }
 0x84a   :  { %v1940_v10 = vunpack.i.h.bf16 %v1938_v26  ;;  %v1939_v41 = vunpack.i.l.bf16 %v1938_v26 }
 0x84b   :  { %v2112_v33 = vpop.eup %2111  ;;  %1862 = vmatpush3.bf16.msra.mxu1 %v1263_v18 }
 0x84c   :  { %v2114_v8 = vpop.eup %2113  ;;  %v1255_v62 = vmul.f32 %v2112_v33, %v2100_v63  ;;  %1905 = vmatprep.subr.msk.bf16.mxu1 %vm85_vm0, %v1987_v47  ;;  %v1923_v63 = vpop.permute.xlu0 %1922  ;;  %v1458_v52 = vsel %vm1455_vm3, %v1449_v16, %v1939_v41  ;;  %v1459_v44 = vsel %vm1455_vm3, %v1450_v13, %v1940_v10 }
 0x84d   :  { %v2116_v43 = vpop.eup %2115  ;;  %v1257_v34 = vmul.f32 %v2114_v8, %v2752_v55  ;;  %v1948_v46 = vpop.permute.xlu1 %1947  ;;  %v1925_v7 = vunpack.i.h.bf16 %v1923_v63  ;;  %v1924_v25 = vunpack.i.l.bf16 %v1923_v63 }
 0x84e   :  { %1864 = vmatmul.mubr.msk.bf16.vlgmr.msra.gmra.mxu1 %vm307_vm2, %v1259_v60  ;;  %v1260_v17 = vpack.c.bf16 %v1255_v62, %v1254_v49  ;;  %v1256_v31 = vmul.f32 %v2116_v43, %v2747_v28  ;;  %v1949_v33 = vunpack.i.l.bf16 %v1948_v46 }
 0x84f   :  { %1872 = vmatpush3.bf16.xpose.msra.mxu1 %v1514_v54  ;;  %v1448_v21 = vsel %vm217_vm1, %v2565_v39, %v1925_v7  ;;  %v1447_v20 = vsel %vm217_vm1, %v2561_v9, %v1924_v25  ;;  %v1950_v39 = vunpack.i.h.bf16 %v1948_v46 }
 0x850   :  { %1867 = vmatprep.mubr.msk.bf16.mxu1 %vm307_vm2, %v1260_v17  ;;  %v1261_v30 = vpack.c.bf16 %v1257_v34, %v1256_v31  ;;  %1906 = vmatprep.subr.msk.bf16.mxu1 %vm85_vm0, %v1988_v19  ;;  %v1933_v32 = vpop.permute.xlu0 %1932 }
 0x851   :  { %v1935_v12 = vunpack.i.h.bf16 %v1933_v32  ;;  %v1934_v38 = vunpack.i.l.bf16 %v1933_v32 }
 0x853   :  { %v1456_v37 = vsel %vm1455_vm3, %v1447_v20, %v1934_v38  ;;  %v1457_v11 = vsel %vm1455_vm3, %v1448_v21, %v1935_v12 }
 0x856   :  { %1868 = vmatmul.mubr.msk.bf16.gmra.mxu1 %vm307_vm2, %v1261_v30 }
 0x857   :  { %1874 = vmatpush3.bf16.xpose.msra.mxu1 %v1511_v14  ;;  %v1454_v14 = vsel %vm217_vm1, %v2571_v3, %v1950_v39 }
 0x90e   :  { %v1865_v36 = vpop.f32.mrf.mxu1 }
 0x910   :  { %v1320_v40 = vpop.f32.mrf.mxu1 }
 0x912   :  { %v1866_v5 = vpop.f32.mrf.mxu1 }
 0x913   :  { %v1951_v42 = vpack.i.bf16 %v1866_v5, %v1865_v36  ;;  %v1453_v36 = vsel %vm217_vm1, %v2567_v0, %v1949_v33 }
 0x914   :  { %v1323_v6 = vpop.f32.mrf.mxu1 }
 0x915   :  { %v1956_v24 = vpack.i.bf16 %v1323_v6, %v1320_v40  ;;  %1952 = vrot.lane.b32.xlu1 %v1951_v42, %s2137_s19 }
 0x916   :  { %v1869_v28 = vpop.f32.mrf.mxu1 }
 0x917   :  { %1957 = vrot.lane.b32.xlu0 %v1956_v24, %s2137_s19 }
 0x918   :  { %v1336_v29 = vpop.f32.mrf.mxu1 }
 0x919   :  { %1967 = vrot.lane.b32.xlu1 %v1966_v56, %s2136_s14  ;;  %v1943_v56 = vpop.permute.xlu0 %1942 }
 0x91a   :  { %v1870_v23 = vpop.f32.mrf.mxu1  ;;  %v1945_v60 = vunpack.i.h.bf16 %v1943_v56  ;;  %v1944_v8 = vunpack.i.l.bf16 %v1943_v56 }
 0x91b   :  { %v1976_v35 = vpack.i.bf16 %v1870_v23, %v1869_v28  ;;  %1962 = vrot.lane.b32.xlu0 %v1961_v22, %s2136_s14 }
 0x91c   :  { %v1339_v55 = vpop.f32.mrf.mxu1  ;;  %v1452_v40 = vsel %vm217_vm1, %v2573_v1, %v1945_v60  ;;  %v1451_v5 = vsel %vm217_vm1, %v2569_v2, %v1944_v8 }
 0x91d   :  { %v1971_v58 = vpack.i.bf16 %v1339_v55, %v1336_v29  ;;  %1977 = vrot.lane.b32.xlu1 %v1976_v35, %s2137_s19 }
 0x91f   :  { %1972 = vrot.lane.b32.xlu0 %v1971_v58, %s2137_s19 }
 0x987   :  { %v1953_v61 = vpop.permute.xlu1 %1952 }
 0x988   :  { %v1955_v22 = vunpack.i.h.bf16 %v1953_v61  ;;  %v1954_v51 = vunpack.i.l.bf16 %v1953_v61 }
 0x989   :  { %v1958_v15 = vpop.permute.xlu0 %1957 }
 0x98a   :  { %v1960_v59 = vunpack.i.h.bf16 %v1958_v15  ;;  %v1959_v18 = vunpack.i.l.bf16 %v1958_v15  ;;  %v1468_v50 = vsel %vm1464_vm4, %v1459_v44, %v1955_v22  ;;  %v1467_v45 = vsel %vm1464_vm4, %v1458_v52, %v1954_v51 }
 0x98b   :  { %v1968_v53 = vpop.permute.xlu1 %1967  ;;  %v1474_v43 = vpack.c.bf16 %v1468_v50, %v1467_v45 }
 0x98c   :  { %v1465_v27 = vsel %vm1464_vm4, %v1456_v37, %v1959_v18  ;;  %v1466_v9 = vsel %vm1464_vm4, %v1457_v11, %v1960_v59  ;;  %v1970_v17 = vunpack.i.h.bf16 %v1968_v53  ;;  %v1969_v34 = vunpack.i.l.bf16 %v1968_v53 }
 0x98d   :  { %v1473_v49 = vpack.c.bf16 %v1466_v9, %v1465_v27  ;;  %v1963_v62 = vpop.permute.xlu0 %1962 }
 0x98e   :  { %v1965_v31 = vunpack.i.h.bf16 %v1963_v62  ;;  %v1964_v30 = vunpack.i.l.bf16 %v1963_v62  ;;  %v1463_v6 = vsel %vm1455_vm3, %v1454_v14, %v1970_v17  ;;  %v1462_v24 = vsel %vm1455_vm3, %v1453_v36, %v1969_v34 }
 0x98f   :  { %v1978_v47 = vpop.permute.xlu1 %1977  ;;  %1875 = vmatprep.mubr.msk.bf16.mxu1 %vm85_vm0, %v1473_v49 }
 0x990   :  { %v1980_v54 = vunpack.i.h.bf16 %v1978_v47  ;;  %v1979_v19 = vunpack.i.l.bf16 %v1978_v47  ;;  %1876 = vmatmul.mubr.msk.bf16.vlgmr.msra.gmra.mxu1 %vm85_vm0, %v1474_v43  ;;  %v1460_v23 = vsel %vm1455_vm3, %v1451_v5, %v1964_v30  ;;  %v1461_v3 = vsel %vm1455_vm3, %v1452_v40, %v1965_v31 }
 0x991   :  { %v1973_v42 = vpop.permute.xlu0 %1972 }
 0x992   :  { %v1975_v28 = vunpack.i.h.bf16 %v1973_v42  ;;  %v1974_v29 = vunpack.i.l.bf16 %v1973_v42  ;;  %v1472_v35 = vsel %vm1464_vm4, %v1463_v6, %v1980_v54  ;;  %v1471_v0 = vsel %vm1464_vm4, %v1462_v24, %v1979_v19 }
 0x993   :  { %v1476_v58 = vpack.c.bf16 %v1472_v35, %v1471_v0 }
 0x994   :  { %v1469_v1 = vsel %vm1464_vm4, %v1460_v23, %v1974_v29  ;;  %v1470_v55 = vsel %vm1464_vm4, %v1461_v3, %v1975_v28 }
 0x995   :  { %v1475_v2 = vpack.c.bf16 %v1470_v55, %v1469_v1 }
 0x997   :  { %1879 = vmatprep.mubr.msk.bf16.mxu1 %vm85_vm0, %v1475_v2 }
 0x998   :  { %1880 = vmatmul.mubr.msk.bf16.gmra.mxu1 %vm85_vm0, %v1476_v58 }
 0xa50   :  { %v1877_v63 = vpop.f32.mrf.mxu1 }
 0xa51   :  { %v1559_v26 = vadd.f32 %v1877_v63, %v1636_v57 }
 0xa52   :  { %v1550_v32 = vpop.f32.mrf.mxu1 }
 0xa53   :  { %1583 = vst.msk [vmem:[%s2886_s6 + $0x10] sm:$0xff] %vm85_vm0, %v1559_v26  ;;  %v1551_v46 = vadd.f32 %v1636_v57, %v1550_v32 }
 0xa54   :  { %v1878_v48 = vpop.f32.mrf.mxu1 }
 0xa55   :  { %1581 = vst.msk [vmem:[%s2886_s6] sm:$0xff] %vm85_vm0, %v1551_v46  ;;  %v1562_v4 = vadd.f32 %v1878_v48, %v1636_v57 }
 0xa56   :  { %v1553_v7 = vpop.f32.mrf.mxu1 }
 0xa57   :  { %1584 = vst.msk [vmem:[%s2886_s6 + $0x18] sm:$0xff] %vm85_vm0, %v1562_v4  ;;  %v1554_v25 = vadd.f32 %v1636_v57, %v1553_v7 }
 0xa58   :  { %v1881_v56 = vpop.f32.mrf.mxu1 }
 0xa59   :  { %1582 = vst.msk [vmem:[%s2886_s6 + $0x8] sm:$0xff] %vm85_vm0, %v1554_v25  ;;  %v1575_v10 = vadd.f32 %v1881_v56, %v1636_v57 }
 0xa5a   :  { %v1566_v41 = vpop.f32.mrf.mxu1 }
 0xa5b   :  { %1587 = vst.msk [vmem:[%s2886_s6 + $0x30] sm:$0xff] %vm85_vm0, %v1575_v10  ;;  %v1567_v12 = vadd.f32 %v1636_v57, %v1566_v41 }
 0xa5c   :  { %v1882_v38 = vpop.f32.mrf.mxu1 }
 0xa5d   :  { %1585 = vst.msk [vmem:[%s2886_s6 + $0x20] sm:$0xff] %vm85_vm0, %v1567_v12  ;;  %v1578_v61 = vadd.f32 %v1882_v38, %v1636_v57 }
 0xa5e   :  { %v1569_v22 = vpop.f32.mrf.mxu1 }
 0xa5f   :  { %1588 = vst.msk [vmem:[%s2886_s6 + $0x38] sm:$0xff] %vm85_vm0, %v1578_v61  ;;  %v1570_v51 = vadd.f32 %v1636_v57, %v1569_v22 }
 0xa61   :  { %1586 = vst.msk [vmem:[%s2886_s6 + $0x28] sm:$0xff] %vm85_vm0, %v1570_v51 }

// kernel: _lambda_.14
= control target key start
LH: loop header
LB: loop body
LE: loop exit
PB: predicated region body
PF: predicated region fallthrough
CT: control target
= control target key end

     0   :  { %vm102_vm0 = vcmask 261120   ;;  %s807_s1 = inlined_call_operand.vmem [shape: bf16[128,32], index: 1, kind: input, shape index: {}]   ;;  %s808_s0 = inlined_call_operand.vmem [shape: f32[64,32], index: 0, kind: input, shape index: {}]   ;;  %s809_s3 = inlined_call_operand.vmem [shape: bf16[32,128], index: 3, kind: input, shape index: {}]   ;;  %s810_s2 = inlined_call_operand.vmem [shape: f32[1,128], index: 2, kind: input, shape index: {}]   ;;  %s811_s4 = inlined_call_operand.vmem [shape: f32[1,32], index: 4, kind: input, shape index: {}]   ;;  %s812_s5 = inlined_call_operand.vmem [shape: f32[1,32], index: 5, kind: input, shape index: {}]   ;;  %s813_s6 = inlined_call_operand.vmem [shape: f32[1,32], index: 6, kind: input, shape index: {}]   ;;  %s814_s7 = inlined_call_operand.vmem [shape: f32[64,32], index: 7, kind: output, shape index: {}]  }
   0x1   :  { %v539_v0 = vld [vmem:[%s807_s1 + $0x38] sm:$0xff]   ;;  %v540_v1 = vld [vmem:[%s807_s1 + $0x30] sm:$0xff]   ;;  %v541_v4 = vld [vmem:[%s807_s1 + $0x28] sm:$0xff]  }
   0x2   :  { %531 = vmatprep.subr.msk.bf16.mxu0 %vm102_vm0, %v539_v0  ;;  %v137_v2 = vsel %vm102_vm0, %v539_v0, 0  ;;  %v134_v3 = vsel %vm102_vm0, %v540_v1, 0  ;;  %v621_v5 = vld [vmem:[%s808_s0] sm:$0xff]  ;;  %v626_v6 = vld [vmem:[%s808_s0 + $0x8] sm:$0xff]  ;;  %v131_v9 = vsel %vm102_vm0, %v541_v4, 0  ;;  %v543_v12 = vld [vmem:[%s807_s1 + $0x18] sm:$0xff]  }
   0x3   :  { %496 = vmatpush3.bf16.xpose.msra.mxu0 %v137_v2  ;;  %v35_v7 = vpack.c.bf16 %v626_v6, %v621_v5  ;;  %v547_v8 = vld [vmem:[%s809_s3 + $0x8] sm:$0xff]   ;;  %v542_v10 = vld [vmem:[%s807_s1 + $0x20] sm:$0xff]   ;;  %v125_v13 = vsel %vm102_vm0, %v543_v12, 0  ;;  %v544_v14 = vld [vmem:[%s807_s1 + $0x10] sm:$0xff]  }
   0x4   :  { %532 = vmatprep.subr.msk.bf16.mxu0 %vm102_vm0, %v540_v1  ;;  %519 = vmatprep.subr.bf16.mxu1 %v547_v8  ;;  %v128_v11 = vsel %vm102_vm0, %v542_v10, 0  ;;  %v122_v15 = vsel %vm102_vm0, %v544_v14, 0  ;;  %v545_v16 = vld [vmem:[%s807_s1 + $0x8] sm:$0xff]   ;;  %v546_v18 = vld [vmem:[%s807_s1] sm:$0xff]   ;;  %v29_v20 = vld [vmem:[%s808_s0 + $0x10] sm:$0xff] }
   0x5   :  { %511 = vmatprep.mubr.msk.bf16.mxu0 %vm102_vm0, %v35_v7  ;;  %520 = vmatpush3.bf16.xpose.msra.mxu1 %v547_v8  ;;  %v119_v17 = vsel %vm102_vm0, %v545_v16, 0  ;;  %v116_v19 = vsel %vm102_vm0, %v546_v18, 0  ;;  %v667_v21 = vld [vmem:[%s808_s0 + $0x18] sm:$0xff]  ;;  %v672_v22 = vld [vmem:[%s808_s0 + $0x20] sm:$0xff]  ;;  %v677_v23 = vld [vmem:[%s808_s0 + $0x28] sm:$0xff] }
   0x6   :  { %v36_v24 = vpack.c.bf16 %v667_v21, %v29_v20  ;;  %v37_v25 = vpack.c.bf16 %v677_v23, %v672_v22  ;;  %v687_v26 = vld [vmem:[%s808_s0 + $0x30] sm:$0xff]  ;;  %v692_v27 = vld [vmem:[%s808_s0 + $0x38] sm:$0xff]  ;;  %v548_v29 = vld [vmem:[%s809_s3] sm:$0xff]  }
   0x7   :  { %v38_v28 = vpack.c.bf16 %v692_v27, %v687_v26  ;;  %521 = vmatprep.subr.bf16.mxu1 %v548_v29  ;;  %v459_v32 = vld [vmem:[%s810_s2] ss:$0 sm:$0xff] }
   0x8   :  { %v472_v59 = vld [vmem:[%s811_s4] ss:$0 sm:$0xff] }
   0xb   :  { %498 = vmatpush3.bf16.xpose.msra.mxu0 %v134_v3 }
   0xc   :  { %533 = vmatprep.subr.msk.bf16.mxu0 %vm102_vm0, %v541_v4 }
   0xd   :  { %522 = vmatpush3.bf16.xpose.msra.mxu1 %v548_v29 }
  0x13   :  { %500 = vmatpush3.bf16.xpose.msra.mxu0 %v131_v9 }
  0x14   :  { %534 = vmatprep.subr.msk.bf16.mxu0 %vm102_vm0, %v542_v10 }
  0x1b   :  { %502 = vmatpush3.bf16.xpose.msra.mxu0 %v128_v11 }
  0x1c   :  { %535 = vmatprep.subr.msk.bf16.mxu0 %vm102_vm0, %v543_v12 }
  0x23   :  { %504 = vmatpush3.bf16.xpose.msra.mxu0 %v125_v13 }
  0x24   :  { %536 = vmatprep.subr.msk.bf16.mxu0 %vm102_vm0, %v544_v14 }
  0x2b   :  { %506 = vmatpush3.bf16.xpose.msra.mxu0 %v122_v15 }
  0x2c   :  { %537 = vmatprep.subr.msk.bf16.mxu0 %vm102_vm0, %v545_v16 }
  0x33   :  { %508 = vmatpush3.bf16.xpose.msra.mxu0 %v119_v17 }
  0x34   :  { %538 = vmatprep.subr.msk.bf16.mxu0 %vm102_vm0, %v546_v18 }
  0x3b   :  { %510 = vmatpush3.bf16.xpose.msra.mxu0 %v116_v19 }
  0x42   :  { %512 = vmatmul.mubr.msk.bf16.vlgmr.msra.gmra.mxu0 %vm102_vm0, %v36_v24 }
  0x43   :  { %515 = vmatprep.mubr.msk.bf16.mxu0 %vm102_vm0, %v37_v25 }
  0x4a   :  { %516 = vmatmul.mubr.msk.bf16.gmra.mxu0 %vm102_vm0, %v38_v28 }
 0x102   :  { %v513_v30 = vpop.f32.mrf.mxu0 }
 0x103   :  { %v182_v36 = vadd.f32 %v513_v30, %v459_v32 }
 0x104   :  { %v173_v31 = vpop.f32.mrf.mxu0 }
 0x105   :  { %v174_v34 = vadd.f32 %v459_v32, %v173_v31  ;;  %v206_v43 = vmax.f32 %v182_v36, 0.0 }
 0x106   :  { %v514_v33 = vpop.f32.mrf.mxu0 }
 0x107   :  { %v185_v35 = vadd.f32 %v514_v33, %v459_v32  ;;  %v204_v41 = vmax.f32 %v174_v34, 0.0 }
 0x108   :  { %v176_v37 = vpop.f32.mrf.mxu0 }
 0x109   :  { %v177_v38 = vadd.f32 %v459_v32, %v176_v37  ;;  %v207_v39 = vmax.f32 %v185_v35, 0.0 }
 0x10a   :  { %v517_v40 = vpop.f32.mrf.mxu0 }
 0x10b   :  { %v205_v42 = vmax.f32 %v177_v38, 0.0  ;;  %v213_v46 = vpack.c.bf16 %v207_v39, %v206_v43  ;;  %v198_v50 = vadd.f32 %v517_v40, %v459_v32 }
 0x10c   :  { %v189_v44 = vpop.f32.mrf.mxu0 }
 0x10d   :  { %v212_v45 = vpack.c.bf16 %v205_v42, %v204_v41  ;;  %v190_v48 = vadd.f32 %v459_v32, %v189_v44  ;;  %v210_v56 = vmax.f32 %v198_v50, 0.0 }
 0x10e   :  { %v518_v47 = vpop.f32.mrf.mxu0 }
 0x10f   :  { %v201_v49 = vadd.f32 %v518_v47, %v459_v32  ;;  %523 = vmatprep.mubr.bf16.mxu1 %v212_v45  ;;  %v208_v54 = vmax.f32 %v190_v48, 0.0 }
 0x110   :  { %v192_v51 = vpop.f32.mrf.mxu0  ;;  %524 = vmatmul.mubr.bf16.vlgmr.msra.gmra.mxu1 %v213_v46 }
 0x111   :  { %v193_v52 = vadd.f32 %v459_v32, %v192_v51  ;;  %v211_v53 = vmax.f32 %v201_v49, 0.0 }
 0x113   :  { %v209_v55 = vmax.f32 %v193_v52, 0.0  ;;  %v215_v58 = vpack.c.bf16 %v211_v53, %v210_v56 }
 0x115   :  { %v214_v57 = vpack.c.bf16 %v209_v55, %v208_v54 }
 0x117   :  { %527 = vmatprep.mubr.bf16.mxu1 %v214_v57 }
 0x118   :  { %528 = vmatmul.mubr.bf16.gmra.mxu1 %v215_v58 }
 0x1d0   :  { %v525_v60 = vpop.f32.mrf.mxu1 }
 0x1d1   :  { %v282_v61 = vadd.f32 %v525_v60, %v472_v59 }
 0x1d2   :  { %v273_v62 = vpop.f32.mrf.mxu1 }
 0x1d3   :  { %v274_v63 = vadd.f32 %v472_v59, %v273_v62  ;;  %v306_v0 = vadd.f32 %v282_v61, %v29_v20 }
 0x1d4   :  { %v526_v1 = vpop.f32.mrf.mxu1 }
 0x1d5   :  { %v285_v2 = vadd.f32 %v526_v1, %v472_v59  ;;  %v318_v3 = vsel %vm102_vm0, %v306_v0, 0.0  ;;  %v304_v4 = vadd.f32 %v274_v63, %v621_v5 }
 0x1d6   :  { %319 = vadd.xlane.f32.xlu1 %v318_v3  ;;  %v276_v7 = vpop.f32.mrf.mxu1 }
 0x1d7   :  { %v277_v8 = vadd.f32 %v472_v59, %v276_v7  ;;  %v312_v9 = vsel %vm102_vm0, %v304_v4, 0.0  ;;  %v307_v10 = vadd.f32 %v285_v2, %v667_v21 }
 0x1d8   :  { %v529_v11 = vpop.f32.mrf.mxu1  ;;  %313 = vadd.xlane.f32.xlu0 %v312_v9 }
 0x1d9   :  { %v321_v12 = vsel %vm102_vm0, %v307_v10, 0.0  ;;  %v305_v13 = vadd.f32 %v277_v8, %v626_v6  ;;  %v298_v15 = vadd.f32 %v529_v11, %v472_v59 }
 0x1da   :  { %322 = vadd.xlane.f32.xlu1 %v321_v12  ;;  %v289_v14 = vpop.f32.mrf.mxu1 }
 0x1db   :  { %v290_v16 = vadd.f32 %v472_v59, %v289_v14  ;;  %v315_v17 = vsel %vm102_vm0, %v305_v13, 0.0  ;;  %v310_v25 = vadd.f32 %v298_v15, %v687_v26 }
 0x1dc   :  { %v530_v5 = vpop.f32.mrf.mxu1  ;;  %316 = vadd.xlane.f32.xlu0 %v315_v17 }
 0x1dd   :  { %v308_v18 = vadd.f32 %v290_v16, %v672_v22  ;;  %v301_v20 = vadd.f32 %v530_v5, %v472_v59  ;;  %v330_v29 = vsel %vm102_vm0, %v310_v25, 0.0 }
 0x1de   :  { %v292_v19 = vpop.f32.mrf.mxu1 }
 0x1df   :  { %v293_v24 = vadd.f32 %v472_v59, %v292_v19  ;;  %v324_v21 = vsel %vm102_vm0, %v308_v18, 0.0  ;;  %v311_v30 = vadd.f32 %v301_v20, %v692_v27 }
 0x1e0   :  { %325 = vadd.xlane.f32.xlu0 %v324_v21 }
 0x1e1   :  { %v309_v6 = vadd.f32 %v293_v24, %v677_v23  ;;  %v333_v22 = vsel %vm102_vm0, %v311_v30, 0.0 }
 0x1e3   :  { %v327_v28 = vsel %vm102_vm0, %v309_v6, 0.0 }
 0x1e4   :  { %328 = vadd.xlane.f32.xlu1 %v327_v28  ;;  %331 = vadd.xlane.f32.xlu0 %v330_v29 }
 0x1e8   :  { %334 = vadd.xlane.f32.xlu1 %v333_v22 }
 0x25f   :  { %v320_v31 = vpop.xlane.xlu1 %319 }
 0x260   :  { %v339_v32 = vmul.f32 0.03125, %v320_v31 }
 0x261   :  { %v314_v33 = vpop.xlane.xlu0 %313 }
 0x262   :  { %v721_v34 = vsub.f32 %v306_v0, %v339_v32  ;;  %v337_v26 = vmul.f32 0.03125, %v314_v33  ;;  %v476_v33 = vld [vmem:[%s813_s6] ss:$0 sm:$0xff] }
 0x263   :  { %v323_v35 = vpop.xlane.xlu1 %322 }
 0x264   :  { %v723_v36 = vsub.f32 %v304_v4, %v337_v26  ;;  %v340_v23 = vmul.f32 0.03125, %v323_v35  ;;  %v355_v37 = vmul.f32 %v721_v34, %v721_v34 }
 0x265   :  { %v317_v38 = vpop.xlane.xlu0 %316 }
 0x266   :  { %v727_v27 = vsub.f32 %v307_v10, %v340_v23  ;;  %v338_v39 = vmul.f32 0.03125, %v317_v38  ;;  %v367_v40 = vsel %vm102_vm0, %v355_v37, 0.0  ;;  %v353_v41 = vmul.f32 %v723_v36, %v723_v36 }
 0x267   :  { %368 = vadd.xlane.f32.xlu0 %v367_v40 }
 0x268   :  { %v732_v42 = vsub.f32 %v305_v13, %v338_v39  ;;  %v356_v43 = vmul.f32 %v727_v27, %v727_v27  ;;  %v361_v47 = vsel %vm102_vm0, %v353_v41, 0.0 }
 0x269   :  { %v326_v44 = vpop.xlane.xlu0 %325 }
 0x26a   :  { %v341_v45 = vmul.f32 0.03125, %v326_v44  ;;  %v370_v46 = vsel %vm102_vm0, %v356_v43, 0.0  ;;  %v354_v48 = vmul.f32 %v732_v42, %v732_v42 }
 0x26b   :  { %371 = vadd.xlane.f32.xlu1 %v370_v46  ;;  %362 = vadd.xlane.f32.xlu0 %v361_v47 }
 0x26c   :  { %v740_v49 = vsub.f32 %v308_v18, %v341_v45  ;;  %v364_v54 = vsel %vm102_vm0, %v354_v48, 0.0 }
 0x26d   :  { %v329_v50 = vpop.xlane.xlu1 %328  ;;  %v332_v51 = vpop.xlane.xlu0 %331 }
 0x26e   :  { %v342_v52 = vmul.f32 0.03125, %v329_v50  ;;  %v343_v53 = vmul.f32 0.03125, %v332_v51  ;;  %v357_v55 = vmul.f32 %v740_v49, %v740_v49 }
 0x26f   :  { %365 = vadd.xlane.f32.xlu1 %v364_v54 }
 0x270   :  { %v745_v56 = vsub.f32 %v309_v6, %v342_v52  ;;  %v747_v57 = vsub.f32 %v310_v25, %v343_v53  ;;  %v373_v58 = vsel %vm102_vm0, %v357_v55, 0.0 }
 0x271   :  { %v335_v59 = vpop.xlane.xlu1 %334  ;;  %374 = vadd.xlane.f32.xlu0 %v373_v58 }
 0x272   :  { %v344_v60 = vmul.f32 0.03125, %v335_v59  ;;  %v358_v61 = vmul.f32 %v745_v56, %v745_v56  ;;  %v359_v62 = vmul.f32 %v747_v57, %v747_v57 }
 0x274   :  { %v754_v63 = vsub.f32 %v311_v30, %v344_v60  ;;  %v376_v0 = vsel %vm102_vm0, %v358_v61, 0.0  ;;  %v379_v1 = vsel %vm102_vm0, %v359_v62, 0.0  ;;  %v475_v30 = vld [vmem:[%s812_s5] ss:$0 sm:$0xff] }
 0x275   :  { %377 = vadd.xlane.f32.xlu1 %v376_v0  ;;  %380 = vadd.xlane.f32.xlu0 %v379_v1 }
 0x276   :  { %v360_v2 = vmul.f32 %v754_v63, %v754_v63 }
 0x278   :  { %v382_v3 = vsel %vm102_vm0, %v360_v2, 0.0 }
 0x279   :  { %383 = vadd.xlane.f32.xlu1 %v382_v3 }
 0x2f0   :  { %v369_v4 = vpop.xlane.xlu0 %368 }
 0x2f1   :  { %v387_v7 = vmul.f32 0.03125, %v369_v4 }
 0x2f3   :  { %v395_v8 = vadd.f32 1e-05, %v387_v7 }
 0x2f4   :  { %v372_v9 = vpop.xlane.xlu1 %371  ;;  %v363_v10 = vpop.xlane.xlu0 %362 }
 0x2f5   :  { %549 = vrsqrt.f32 %v395_v8  ;;  %v388_v11 = vmul.f32 0.03125, %v372_v9  ;;  %v385_v12 = vmul.f32 0.03125, %v363_v10 }
 0x2f7   :  { %v396_v13 = vadd.f32 1e-05, %v388_v11  ;;  %v393_v14 = vadd.f32 1e-05, %v385_v12 }
 0x2f8   :  { %v366_v15 = vpop.xlane.xlu1 %365 }
 0x2f9   :  { %551 = vrsqrt.f32 %v396_v13  ;;  %v386_v16 = vmul.f32 0.03125, %v366_v15 }
 0x2fa   :  { %553 = vrsqrt.f32 %v393_v14  ;;  %v375_v17 = vpop.xlane.xlu0 %374 }
 0x2fb   :  { %v394_v5 = vadd.f32 1e-05, %v386_v16  ;;  %v389_v18 = vmul.f32 0.03125, %v375_v17 }
 0x2fd   :  { %555 = vrsqrt.f32 %v394_v5  ;;  %v397_v19 = vadd.f32 1e-05, %v389_v18 }
 0x2fe   :  { %v378_v20 = vpop.xlane.xlu1 %377  ;;  %v381_v24 = vpop.xlane.xlu0 %380 }
 0x2ff   :  { %557 = vrsqrt.f32 %v397_v19  ;;  %v390_v21 = vmul.f32 0.03125, %v378_v20  ;;  %v391_v25 = vmul.f32 0.03125, %v381_v24 }
 0x301   :  { %v398_v6 = vadd.f32 1e-05, %v390_v21  ;;  %v399_v28 = vadd.f32 1e-05, %v391_v25 }
 0x302   :  { %v550_v29 = vpop.eup %549  ;;  %v384_v22 = vpop.xlane.xlu1 %383 }
 0x303   :  { %v411_v31 = vmul.f32 %v550_v29, %v721_v34  ;;  %559 = vrsqrt.f32 %v398_v6  ;;  %v392_v32 = vmul.f32 0.03125, %v384_v22 }
 0x304   :  { %561 = vrsqrt.f32 %v399_v28 }
 0x305   :  { %v426_v26 = vmul.f32 %v475_v30, %v411_v31  ;;  %v400_v35 = vadd.f32 1e-05, %v392_v32 }
 0x306   :  { %v552_v23 = vpop.eup %551 }
 0x307   :  { %v554_v37 = vpop.eup %553  ;;  %v441_v38 = vadd.f32 %v476_v33, %v426_v26  ;;  %v412_v39 = vmul.f32 %v552_v23, %v727_v27  ;;  %563 = vrsqrt.f32 %v400_v35 }
 0x308   :  { %v409_v40 = vmul.f32 %v554_v37, %v723_v36 }
 0x309   :  { %449 = vst.msk [vmem:[%s814_s7 + $0x10] sm:$0xff] %vm102_vm0, %v441_v38  ;;  %v427_v34 = vmul.f32 %v475_v30, %v412_v39 }
 0x30a   :  { %v556_v41 = vpop.eup %555  ;;  %v424_v43 = vmul.f32 %v475_v30, %v409_v40 }
 0x30b   :  { %v442_v44 = vadd.f32 %v476_v33, %v427_v34  ;;  %v410_v45 = vmul.f32 %v556_v41, %v732_v42 }
 0x30c   :  { %v558_v46 = vpop.eup %557  ;;  %v439_v47 = vadd.f32 %v476_v33, %v424_v43 }
 0x30d   :  { %450 = vst.msk [vmem:[%s814_s7 + $0x18] sm:$0xff] %vm102_vm0, %v442_v44  ;;  %v425_v27 = vmul.f32 %v475_v30, %v410_v45  ;;  %v413_v36 = vmul.f32 %v558_v46, %v740_v49 }
 0x30e   :  { %447 = vst.msk [vmem:[%s814_s7] sm:$0xff] %vm102_vm0, %v439_v47 }
 0x30f   :  { %v440_v48 = vadd.f32 %v476_v33, %v425_v27  ;;  %v428_v50 = vmul.f32 %v475_v30, %v413_v36 }
 0x310   :  { %v560_v51 = vpop.eup %559 }
 0x311   :  { %v562_v52 = vpop.eup %561  ;;  %448 = vst.msk [vmem:[%s814_s7 + $0x8] sm:$0xff] %vm102_vm0, %v440_v48  ;;  %v443_v42 = vadd.f32 %v476_v33, %v428_v50  ;;  %v414_v53 = vmul.f32 %v560_v51, %v745_v56 }
 0x312   :  { %v415_v54 = vmul.f32 %v562_v52, %v747_v57 }
 0x313   :  { %451 = vst.msk [vmem:[%s814_s7 + $0x20] sm:$0xff] %vm102_vm0, %v443_v42  ;;  %v429_v49 = vmul.f32 %v475_v30, %v414_v53 }
 0x314   :  { %v564_v55 = vpop.eup %563  ;;  %v430_v58 = vmul.f32 %v475_v30, %v415_v54 }
 0x315   :  { %v444_v59 = vadd.f32 %v476_v33, %v429_v49  ;;  %v416_v60 = vmul.f32 %v564_v55, %v754_v63 }
 0x316   :  { %v445_v61 = vadd.f32 %v476_v33, %v430_v58 }
 0x317   :  { %452 = vst.msk [vmem:[%s814_s7 + $0x28] sm:$0xff] %vm102_vm0, %v444_v59  ;;  %v431_v56 = vmul.f32 %v475_v30, %v416_v60 }
 0x318   :  { %453 = vst.msk [vmem:[%s814_s7 + $0x30] sm:$0xff] %vm102_vm0, %v445_v61 }
 0x319   :  { %v446_v57 = vadd.f32 %v476_v33, %v431_v56 }
 0x31b   :  { %454 = vst.msk [vmem:[%s814_s7 + $0x38] sm:$0xff] %vm102_vm0, %v446_v57 }

// kernel: _lambda_.19
= control target key start
LH: loop header
LB: loop body
LE: loop exit
PB: predicated region body
PF: predicated region fallthrough
CT: control target
= control target key end

     0   :  { %vm35_vm0 = vcmask 261120   ;;  %vm116_vm1 = vcmask 23552   ;;  %s242_s1 = inlined_call_operand.vmem [shape: bf16[3,32], index: 1, kind: input, shape index: {}]   ;;  %s243_s0 = inlined_call_operand.vmem [shape: f32[64,32], index: 0, kind: input, shape index: {}]   ;;  %s244_s2 = inlined_call_operand.vmem [shape: f32[1,3], index: 2, kind: input, shape index: {}]   ;;  %s245_s3 = inlined_call_operand.vmem [shape: f32[64,3], index: 3, kind: output, shape index: {}]  }
   0x1   :  { %v27_v0 = vld [vmem:[%s242_s1] sm:$0x3]  ;;  %v16_v2 = vld [vmem:[%s243_s0 + $0x8] sm:$0xff]  ;;  %v17_v7 = vld [vmem:[%s243_s0 + $0x10] sm:$0xff] }
   0x2   :  { %v15_v1 = vld [vmem:[%s243_s0] sm:$0xff]  ;;  %151 = vmatprep.subr.msk.bf16.mxu0 %vm35_vm0, %v27_v0  ;;  %152 = vmatprep.subr.msk.bf16.mxu1 %vm35_vm0, %v27_v0  ;;  %v49_v3 = vsel %vm35_vm0, %v27_v0, 0  ;;  %v20_v6 = vld [vmem:[%s243_s0 + $0x28] sm:$0xff]  ;;  %v18_v9 = vld [vmem:[%s243_s0 + $0x18] sm:$0xff] }
   0x3   :  { %v23_v4 = vpack.c.bf16 %v16_v2, %v15_v1  ;;  %v19_v5 = vld [vmem:[%s243_s0 + $0x20] sm:$0xff]  ;;  %140 = vmatpush3.bf16.xpose.msra.mxu0 %v49_v3  ;;  %150 = vmatpush3.bf16.xpose.msra.mxu1 %v49_v3  ;;  %v21_v10 = vld [vmem:[%s243_s0 + $0x30] sm:$0xff]  ;;  %v22_v11 = vld [vmem:[%s243_s0 + $0x38] sm:$0xff]  ;;  %v24_v12 = vpack.c.bf16 %v18_v9, %v17_v7 }
   0x4   :  { %v25_v8 = vpack.c.bf16 %v20_v6, %v19_v5  ;;  %v26_v13 = vpack.c.bf16 %v22_v11, %v21_v10  ;;  %v129_v14 = vld [vmem:[%s244_s2] ss:$0 sm:$0xff] }
   0x5   :  { %141 = vmatprep.mubr.msk.bf16.mxu0 %vm35_vm0, %v23_v4 }
   0x6   :  { %145 = vmatprep.mubr.msk.bf16.mxu1 %vm35_vm0, %v25_v8 }
   0xa   :  { %142 = vmatmul.mubr.msk.bf16.vlgmr.msra.gmra.mxu0 %vm35_vm0, %v24_v12  ;;  %146 = vmatmul.mubr.msk.bf16.vlgmr.msra.gmra.mxu1 %vm35_vm0, %v26_v13 }
  0xca   :  { %v143_v15 = vpop.f32.mrf.mxu0  ;;  %v147_v16 = vpop.f32.mrf.mxu1 }
  0xcb   :  { %v94_v17 = vadd.f32 %v143_v15, %v129_v14  ;;  %v110_v18 = vadd.f32 %v147_v16, %v129_v14 }
  0xcc   :  { %v85_v19 = vpop.f32.mrf.mxu0  ;;  %v101_v20 = vpop.f32.mrf.mxu1 }
  0xcd   :  { %119 = vst.msk [vmem:[%s245_s3 + $0x10] sm:$0xff] %vm116_vm1, %v94_v17  ;;  %123 = vst.msk [vmem:[%s245_s3 + $0x30] sm:$0xff] %vm116_vm1, %v110_v18  ;;  %v86_v21 = vadd.f32 %v129_v14, %v85_v19  ;;  %v102_v22 = vadd.f32 %v129_v14, %v101_v20 }
  0xce   :  { %v144_v23 = vpop.f32.mrf.mxu0  ;;  %v148_v24 = vpop.f32.mrf.mxu1 }
  0xcf   :  { %117 = vst.msk [vmem:[%s245_s3] sm:$0xff] %vm116_vm1, %v86_v21  ;;  %121 = vst.msk [vmem:[%s245_s3 + $0x20] sm:$0xff] %vm116_vm1, %v102_v22  ;;  %v97_v25 = vadd.f32 %v144_v23, %v129_v14  ;;  %v113_v26 = vadd.f32 %v148_v24, %v129_v14 }
  0xd0   :  { %v88_v27 = vpop.f32.mrf.mxu0  ;;  %v104_v28 = vpop.f32.mrf.mxu1 }
  0xd1   :  { %120 = vst.msk [vmem:[%s245_s3 + $0x18] sm:$0xff] %vm116_vm1, %v97_v25  ;;  %124 = vst.msk [vmem:[%s245_s3 + $0x38] sm:$0xff] %vm116_vm1, %v113_v26  ;;  %v89_v29 = vadd.f32 %v129_v14, %v88_v27  ;;  %v105_v30 = vadd.f32 %v129_v14, %v104_v28 }
  0xd3   :  { %118 = vst.msk [vmem:[%s245_s3 + $0x8] sm:$0xff] %vm116_vm1, %v89_v29  ;;  %122 = vst.msk [vmem:[%s245_s3 + $0x28] sm:$0xff] %vm116_vm1, %v105_v30 }

</bundles_post_ra>
